<compile_context>
chip_gen: v7x
topology: tpu7x:2x2x1
jax: 0.10.0
libtpu: 0.0.40
codegen_flags: <defaults>
</compile_context>

<pallas_src>
import jax
import jax.numpy as jnp
from jax import lax
from jax.experimental import pallas as pl
from jax.experimental.pallas import tpu as pltpu


# -----------------------------------------------------------------------------------------
# Pallas kernel: fused upsample + concat + (conv3x3 -> BN -> ReLU) x 2, one batch per step.
# -----------------------------------------------------------------------------------------
def _up_concat_double_conv_kernel(
    in1_ref,          # (1, 2, H, Wh, C1)  bf16 skip connection, W-parity split, channels last
    in2_ref,          # (1, Hh, Wh, C2)    bf16 low-res path, channels last (half resolution)
    w1_ref,           # (3, 3*(C1+C2), Cmid) bf16 conv1 taps, rows ordered (kw, [skip, up])
    s1_ref, b1_ref,   # (1, Cmid) f32      folded BatchNorm1 scale / shift (conv bias folded)
    w2_ref,           # (3, 3*Cmid, Cmid)  bf16 conv2 taps, rows ordered (kw, c)
    s2_ref, b2_ref,   # (1, Cmid) f32
    o_ref,            # (1, 2, H, Wh, Cmid) bf16 even / odd output columns
):
    H = o_ref.shape[2]
    Wh = o_ref.shape[3]
    Hh = in2_ref.shape[1]
    C2 = in2_ref.shape[3]
    Cmid = o_ref.shape[4]
    HW = H * Wh
    f32 = jnp.float32
    bf16 = jnp.bfloat16

    def col_ids(shape):
        return lax.broadcasted_iota(jnp.int32, shape, dimension=1)

    # Shifted-column planes are built ONCE per plane (f32 XLU roll + boundary select),
    # not per conv tap, so no per-tap sublane-offset relayout copies remain.
    def shift_right_zero(x):
        # out[:, q, :] = x[:, q-1, :] for q >= 1, 0 at q == 0   (conv left zero-pad)
        return jnp.where(col_ids(x.shape) == 0, 0.0, pltpu.roll(x, 1, axis=1))

    def shift_left_zero(x):
        # out[:, q, :] = x[:, q+1, :] for q <= Wh-2, 0 at q == Wh-1  (conv right zero-pad)
        return jnp.where(col_ids(x.shape) == Wh - 1, 0.0, pltpu.roll(x, Wh - 1, axis=1))

    # ---------------- skip connection planes (already W-parity split) --------------------
    e1 = in1_ref[0, 0]                                   # (H, Wh, C1) bf16, even columns
    o1 = in1_ref[0, 1]                                   # (H, Wh, C1) bf16, odd  columns
    o1_m1 = shift_right_zero(o1.astype(f32)).astype(bf16)
    e1_p1 = shift_left_zero(e1.astype(f32)).astype(bf16)

    # -------- fused bilinear x2 upsample of inputs2 (align_corners=False), in VMEM -------
    x2 = in2_ref[0].astype(f32)                          # (Hh, Wh, C2)
    # rows: out[2k] = .75 x[k] + .25 x[k-1] ; out[2k+1] = .75 x[k] + .25 x[k+1]  (clamped)
    x2_up = jnp.concatenate([x2[:1], x2[:-1]], axis=0)
    x2_dn = jnp.concatenate([x2[1:], x2[-1:]], axis=0)
    r_even = 0.75 * x2 + 0.25 * x2_up
    r_odd = 0.75 * x2 + 0.25 * x2_dn
    # interleave rows (leading-dim merge only -> layout no-op)
    uph = jnp.stack([r_even, r_odd], axis=1).reshape(2 * Hh, Wh, C2)   # (H, Wh, C2)
    # columns: neighbours via XLU rolls (no column-halo scratch), boundaries via select.
    q2 = col_ids(uph.shape)
    first2 = q2 == 0
    last2 = q2 == Wh - 1
    uph_l = pltpu.roll(uph, 1, axis=1)        # uph[:, q-1, :] (wraps at q == 0, masked below)
    uph_r = pltpu.roll(uph, Wh - 1, axis=1)   # uph[:, q+1, :] (wraps at q == Wh-1, masked)
    e2 = (0.75 * uph + 0.25 * jnp.where(first2, uph, uph_l)).astype(bf16)   # even out cols
    o2 = (0.75 * uph + 0.25 * jnp.where(last2, uph, uph_r)).astype(bf16)    # odd  out cols
    o2_m1 = jnp.where(first2, 0.0, 0.75 * uph_l + 0.25 * uph).astype(bf16)  # odd col q-1
    e2_p1 = jnp.where(last2, 0.0, 0.75 * uph_r + 0.25 * uph).astype(bf16)   # even col q+1

    # ------- parity-split 3x3 conv + folded BN + ReLU, kw taps folded into K (im2col) ----
    def conv(blocks_even, blocks_odd, w_ref, s, b):
        # blocks_*: bf16 (H, Wh, C) planes ordered to match w_ref's (kw, channel) row order.
        def run(blocks):
            x = jnp.concatenate(blocks, axis=-1)                     # (H, Wh, K) lane concat
            K = x.shape[-1]
            zrow = jnp.zeros((1, Wh, K), bf16)
            # row halo via free major-axis concat; single reshape per parity per conv.
            xp = jnp.concatenate([zrow, x, zrow], axis=0).reshape((H + 2) * Wh, K)
            acc = None
            for kh in range(3):
                lhs = xp[kh * Wh:kh * Wh + HW]                       # aligned sublane slice
                t = jnp.dot(lhs, w_ref[kh], preferred_element_type=f32)
                acc = t if acc is None else acc + t
            return acc
        y_even = jnp.maximum(run(blocks_even) * s + b, 0.0)
        y_odd = jnp.maximum(run(blocks_odd) * s + b, 0.0)
        return y_even, y_odd

    s1 = s1_ref[...]
    b1 = b1_ref[...]
    # even output cols use input cols (O[q-1], E[q], O[q]); odd use (E[q], O[q], E[q+1]).
    y1e, y1o = conv(
        [o1_m1, o2_m1, e1, e2, o1, o2],
        [e1, e2, o1, o2, e1_p1, e2_p1],
        w1_ref, s1, b1)

    ey = y1e.reshape(H, Wh, Cmid)             # conv1 output planes (f32, pre-cast)
    oy = y1o.reshape(H, Wh, Cmid)
    oy_m1 = shift_right_zero(oy).astype(bf16)
    ey_p1 = shift_left_zero(ey).astype(bf16)
    ey_b = ey.astype(bf16)
    oy_b = oy.astype(bf16)

    s2 = s2_ref[...]
    b2 = b2_ref[...]
    y2e, y2o = conv([oy_m1, ey_b, oy_b], [ey_b, oy_b, ey_p1], w2_ref, s2, b2)

    o_ref[0, 0] = y2e.reshape(H, Wh, Cmid).astype(o_ref.dtype)
    o_ref[0, 1] = y2o.reshape(H, Wh, Cmid).astype(o_ref.dtype)


# -----------------------------------------------------------------------------------------
# Wrapper: parameter folding + cheap layout plumbing around the fused kernel.
# -----------------------------------------------------------------------------------------
def _fold_bn(conv_bias, gamma, beta, mean, var, eps=1e-5):
    scale = gamma / jnp.sqrt(var + eps)
    shift = scale * (conv_bias - mean) + beta
    return scale[None, :].astype(jnp.float32), shift[None, :].astype(jnp.float32)


def _derive_vmem_limit_bytes(H, Wh, Hh, C1, C2, Cmid):
    """Buffer-math based scoped-VMEM limit with chip-aware cap (v5e/v6e 128MiB, v7x 64MiB)."""
    bf = 2
    cin = C1 + C2
    # double-buffered bf16 I/O blocks
    io = 2 * (2 * H * Wh * C1 * bf + Hh * Wh * C2 * bf + 2 * H * Wh * Cmid * bf)
    wts = (9 * cin * Cmid + 9 * Cmid * Cmid) * bf + 4 * Cmid * 4
    # in-kernel working set (values the compiler keeps resident in VMEM)
    work = H * Wh * (
        (4 * C1 + 4 * C2 + 4 * Cmid) * bf      # E/O planes + shifted copies per source
        + 4 * C2 * 4                           # f32 upsample temporaries
        + (3 * cin + 3 * Cmid) * bf            # im2col operands (one parity each conv)
        + 4 * Cmid * 4                         # conv1 outputs + accumulators (f32)
    )
    need = io + wts + work
    try:
        phys = int(pltpu.get_tpu_info().vmem_capacity_bytes)
    except Exception:  # noqa: BLE001 - conservative fallback (v7x-sized)
        phys = 64 * 1024 * 1024
    # 2x slop for compiler-internal copies, capped below physical VMEM with headroom.
    return int(max(32 * 1024 * 1024, min(2 * need, phys - 8 * 1024 * 1024)))


def unet_up_concat_forward(inputs1, inputs2, params):
    """inputs1: (N, out_size, H, W) skip; inputs2: (N, in_size, H/2, W/2).  NCHW in/out."""
    N, C1, H, W = inputs1.shape
    _, C2, Hh, Wh = inputs2.shape
    assert H == 2 * Hh and W == 2 * Wh, "only offset == 0 (exact x2 skip) supported"
    assert W % 16 == 0, "W must be a multiple of 16 so W/2 fills TPU sublane tiles"
    w1 = params["w1"]                      # (3, 3, C1+C2, Cmid)  HWIO
    w2 = params["w2"]                      # (3, 3, Cmid, Cmid)
    Cmid = w1.shape[3]
    assert w1.shape[2] == C1 + C2

    s1, b1 = _fold_bn(params["b1"], params["g1"], params["beta1"], params["m1"], params["v1"])
    s2, b2 = _fold_bn(params["b2"], params["g2"], params["beta2"], params["m2"], params["v2"])
    # Fold the 3x3 kw taps into the matmul K dim: per kh the rows are (kw, [skip C1, up C2]).
    w1k = w1.reshape(3, 3 * (C1 + C2), Cmid).astype(jnp.bfloat16)
    w2k = w2.reshape(3, 3 * Cmid, Cmid).astype(jnp.bfloat16)

    # Layout plumbing only (no full-res upsample / concat / pad materialisation), bf16 I/O:
    in1_p = inputs1.reshape(N, C1, H, Wh, 2).transpose(0, 4, 2, 3, 1).astype(jnp.bfloat16)
    in2_t = inputs2.transpose(0, 2, 3, 1).astype(jnp.bfloat16)

    flops = 2 * N * H * W * 9 * ((C1 + C2) * Cmid + Cmid * Cmid)
    bytes_accessed = ((in1_p.size + in2_t.size + N * 2 * H * Wh * Cmid
                       + w1k.size + w2k.size) * 2
                      + (s1.size + b1.size + s2.size + b2.size) * 4)

    out_p = pl.pallas_call(
        _up_concat_double_conv_kernel,
        out_shape=jax.ShapeDtypeStruct((N, 2, H, Wh, Cmid), jnp.bfloat16),
        grid_spec=pltpu.PrefetchScalarGridSpec(
            num_scalar_prefetch=0,
            grid=(N,),
            in_specs=[
                pl.BlockSpec((1, 2, H, Wh, C1), lambda n: (n, 0, 0, 0, 0)),
                pl.BlockSpec((1, Hh, Wh, C2), lambda n: (n, 0, 0, 0)),
                pl.BlockSpec((3, 3 * (C1 + C2), Cmid), lambda n: (0, 0, 0)),
                pl.BlockSpec((1, Cmid), lambda n: (0, 0)),
                pl.BlockSpec((1, Cmid), lambda n: (0, 0)),
                pl.BlockSpec((3, 3 * Cmid, Cmid), lambda n: (0, 0, 0)),
                pl.BlockSpec((1, Cmid), lambda n: (0, 0)),
                pl.BlockSpec((1, Cmid), lambda n: (0, 0)),
            ],
            out_specs=pl.BlockSpec((1, 2, H, Wh, Cmid), lambda n: (n, 0, 0, 0, 0)),
        ),
        compiler_params=pltpu.CompilerParams(
            dimension_semantics=("parallel",),
            vmem_limit_bytes=_derive_vmem_limit_bytes(H, Wh, Hh, C1, C2, Cmid),
        ),
        cost_estimate=pl.CostEstimate(flops=int(flops), transcendentals=0,
                                      bytes_accessed=int(bytes_accessed)),
    )(in1_p, in2_t, w1k, s1, b1, w2k, s2, b2)

    # (N, 2, H, W/2, Cout) -> NCHW; the (W/2, 2) -> W merge is a free row-major reshape,
    # the channel transpose runs in XLA on bf16 (half the bytes).
    return out_p.transpose(0, 4, 2, 3, 1).reshape(N, Cmid, H, W).astype(jnp.float32)


# -----------------------------------------------------------------------------------------
# Pure-JAX reference (same upsample/pad/concat semantics, convs via lax, bf16-matched).
# -----------------------------------------------------------------------------------------
def _bilinear_up2_nchw(x):
    # matches nn.Upsample(scale_factor=(2, 2), mode='bilinear', align_corners=False)
    _, _, Hs, Ws = x.shape

    def idx(size):
        dst = jnp.arange(2 * size, dtype=jnp.float32)
        src = jnp.maximum((dst + 0.5) / 2.0 - 0.5, 0.0)
        i0 = jnp.floor(src).astype(jnp.int32)
        i1 = jnp.minimum(i0 + 1, size - 1)
        frac = src - i0.astype(jnp.float32)
        return i0, i1, frac

    i0, i1, fh = idx(Hs)
    j0, j1, fw = idx(Ws)
    xh = (x[:, :, i0, :] * (1.0 - fh)[None, None, :, None]
          + x[:, :, i1, :] * fh[None, None, :, None])
    xw = (xh[:, :, :, j0] * (1.0 - fw)[None, None, None, :]
          + xh[:, :, :, j1] * fw[None, None, None, :])
    return xw


def _reference(inputs1, inputs2, params):
    outputs2 = _bilinear_up2_nchw(inputs2)
    a = (outputs2.shape[2] - inputs1.shape[2]) // 2
    outputs1 = jnp.pad(inputs1, ((0, 0), (a, 0), (0, a), (a, a)))
    x = jnp.transpose(jnp.concatenate([outputs1, outputs2], axis=1), (0, 2, 3, 1))

    def conv_bn_relu(y, w_hwio, bias, g, beta, m, v):
        z = lax.conv_general_dilated(
            y.astype(jnp.bfloat16), w_hwio.astype(jnp.bfloat16), (1, 1), "SAME",
            dimension_numbers=("NHWC", "HWIO", "NHWC"),
            preferred_element_type=jnp.float32)
        s, sh = _fold_bn(bias, g, beta, m, v)
        return jnp.maximum(z * s[0] + sh[0], 0.0)

    y = conv_bn_relu(x, params["w1"], params["b1"], params["g1"],
                     params["beta1"], params["m1"], params["v1"])
    y = conv_bn_relu(y, params["w2"], params["b2"], params["g2"],
                     params["beta2"], params["m2"], params["v2"])
    return jnp.transpose(y, (0, 3, 1, 2))


if __name__ == "__main__":
    key = jax.random.PRNGKey(0)
    N = 2
    in_size, out_size = 8, 4          # UnetUpConcat(in_size=8, out_size=4)
    H, W = 16, 32                     # skip-connection spatial size (W/2 = 16, bf16 tile)

    k = jax.random.split(key, 16)
    inputs1 = jax.random.normal(k[0], (N, out_size, H, W), jnp.float32)
    inputs2 = jax.random.normal(k[1], (N, in_size, H // 2, W // 2), jnp.float32)

    cin = in_size + out_size          # concat channels feeding conv1
    params = {
        # conv weights stored HWIO (3,3,Cin,Cout); a real port transposes PyTorch OIHW.
        "w1": 0.1 * jax.random.normal(k[2], (3, 3, cin, out_size), jnp.float32),
        "b1": 0.05 * jax.random.normal(k[3], (out_size,), jnp.float32),
        "g1": 1.0 + 0.1 * jax.random.normal(k[4], (out_size,), jnp.float32),
        "beta1": 0.05 * jax.random.normal(k[5], (out_size,), jnp.float32),
        "m1": 0.1 * jax.random.normal(k[6], (out_size,), jnp.float32),
        "v1": 1.0 + 0.1 * jax.random.uniform(k[7], (out_size,), jnp.float32),
        "w2": 0.1 * jax.random.normal(k[8], (3, 3, out_size, out_size), jnp.float32),
        "b2": 0.05 * jax.random.normal(k[9], (out_size,), jnp.float32),
        "g2": 1.0 + 0.1 * jax.random.normal(k[10], (out_size,), jnp.float32),
        "beta2": 0.05 * jax.random.normal(k[11], (out_size,), jnp.float32),
        "m2": 0.1 * jax.random.normal(k[12], (out_size,), jnp.float32),
        "v2": 1.0 + 0.1 * jax.random.uniform(k[13], (out_size,), jnp.float32),
    }

    out = jax.block_until_ready(jax.jit(unet_up_concat_forward)(inputs1, inputs2, params))
    assert out.shape == (N, out_size, H, W), out.shape

    ref = jax.block_until_ready(_reference(inputs1, inputs2, params))
    max_err = float(jnp.max(jnp.abs(out - ref)))
    assert jnp.allclose(out, ref, rtol=2e-2, atol=2e-2), max_err

    print("KERNEL_OK")
</pallas_src>

<mosaic_0001>
module attributes {stable_mosaic.version = 11 : i64} {
  func.func @_up_concat_double_conv_kernel(%arg0: i32, %arg1: memref<1x2x16x16x4xbf16, #tpu.memory_space<vmem>>, %arg2: memref<1x8x16x8xbf16, #tpu.memory_space<vmem>>, %arg3: memref<3x36x4xbf16, #tpu.memory_space<vmem>>, %arg4: memref<1x4xf32, #tpu.memory_space<vmem>>, %arg5: memref<1x4xf32, #tpu.memory_space<vmem>>, %arg6: memref<3x12x4xbf16, #tpu.memory_space<vmem>>, %arg7: memref<1x4xf32, #tpu.memory_space<vmem>>, %arg8: memref<1x4xf32, #tpu.memory_space<vmem>>, %arg9: memref<1x2x16x16x4xbf16, #tpu.memory_space<vmem>>) attributes {dimension_semantics = [#tpu.dimension_semantics<parallel>], iteration_bounds = array<i64: 2>, scalar_prefetch = 0 : i64, scratch_operands = 0 : i64, tpu.core_type = #tpu.core_type<tc>, window_params = [{transform_indices = @transform_0, window_bounds = array<i64: 1, 2, 16, 16, 4>}, {transform_indices = @transform_1, window_bounds = array<i64: 1, 8, 16, 8>}, {pipeline_mode = #tpu.pipeline_mode<synchronous>, transform_indices = @transform_2, window_bounds = array<i64: 3, 36, 4>}, {pipeline_mode = #tpu.pipeline_mode<synchronous>, transform_indices = @transform_3, window_bounds = array<i64: 1, 4>}, {pipeline_mode = #tpu.pipeline_mode<synchronous>, transform_indices = @transform_4, window_bounds = array<i64: 1, 4>}, {pipeline_mode = #tpu.pipeline_mode<synchronous>, transform_indices = @transform_5, window_bounds = array<i64: 3, 12, 4>}, {pipeline_mode = #tpu.pipeline_mode<synchronous>, transform_indices = @transform_6, window_bounds = array<i64: 1, 4>}, {pipeline_mode = #tpu.pipeline_mode<synchronous>, transform_indices = @transform_7, window_bounds = array<i64: 1, 4>}, {transform_indices = @transform_8, window_bounds = array<i64: 1, 2, 16, 16, 4>}]} {
    %c0 = arith.constant 0 : index
    %c0_0 = arith.constant 0 : index
    %c0_1 = arith.constant 0 : index
    %c0_2 = arith.constant 0 : index
    %c0_3 = arith.constant 0 : index
    %0 = vector.load %arg1[%c0, %c0_0, %c0_1, %c0_2, %c0_3] : memref<1x2x16x16x4xbf16, #tpu.memory_space<vmem>>, vector<1x1x16x16x4xbf16>
    %1 = vector.shape_cast %0 : vector<1x1x16x16x4xbf16> to vector<16x16x4xbf16>
    %c0_4 = arith.constant 0 : index
    %c1 = arith.constant 1 : index
    %c0_5 = arith.constant 0 : index
    %c0_6 = arith.constant 0 : index
    %c0_7 = arith.constant 0 : index
    %2 = vector.load %arg1[%c0_4, %c1, %c0_5, %c0_6, %c0_7] : memref<1x2x16x16x4xbf16, #tpu.memory_space<vmem>>, vector<1x1x16x16x4xbf16>
    %3 = vector.shape_cast %2 : vector<1x1x16x16x4xbf16> to vector<16x16x4xbf16>
    %4 = arith.extf %3 : vector<16x16x4xbf16> to vector<16x16x4xf32>
    %5 = tpu.iota {dimensions = array<i32: 1>} : vector<16x16x4xi32>
    %c0_i32 = arith.constant 0 : i32
    %6 = vector.broadcast %c0_i32 : i32 to vector<16x16x4xi32>
    %7 = arith.cmpi eq, %5, %6 : vector<16x16x4xi32>
    %c1_i32 = arith.constant 1 : i32
    %8 = tpu.dynamic_rotate %4 by %c1_i32 dim 1 : vector<16x16x4xf32>, i32 -> vector<16x16x4xf32>
    %cst = arith.constant 0.000000e+00 : f32
    %9 = vector.broadcast %cst : f32 to vector<16x16x4xf32>
    %10 = arith.select %7, %9, %8 : vector<16x16x4xi1>, vector<16x16x4xf32>
    %11 = arith.truncf %10 : vector<16x16x4xf32> to vector<16x16x4xbf16>
    %12 = arith.extf %1 : vector<16x16x4xbf16> to vector<16x16x4xf32>
    %13 = tpu.iota {dimensions = array<i32: 1>} : vector<16x16x4xi32>
    %c15_i32 = arith.constant 15 : i32
    %14 = vector.broadcast %c15_i32 : i32 to vector<16x16x4xi32>
    %15 = arith.cmpi eq, %13, %14 : vector<16x16x4xi32>
    %c15_i32_8 = arith.constant 15 : i32
    %16 = tpu.dynamic_rotate %12 by %c15_i32_8 dim 1 : vector<16x16x4xf32>, i32 -> vector<16x16x4xf32>
    %cst_9 = arith.constant 0.000000e+00 : f32
    %17 = vector.broadcast %cst_9 : f32 to vector<16x16x4xf32>
    %18 = arith.select %15, %17, %16 : vector<16x16x4xi1>, vector<16x16x4xf32>
    %19 = arith.truncf %18 : vector<16x16x4xf32> to vector<16x16x4xbf16>
    %c0_10 = arith.constant 0 : index
    %c0_11 = arith.constant 0 : index
    %c0_12 = arith.constant 0 : index
    %c0_13 = arith.constant 0 : index
    %20 = vector.load %arg2[%c0_10, %c0_11, %c0_12, %c0_13] : memref<1x8x16x8xbf16, #tpu.memory_space<vmem>>, vector<1x8x16x8xbf16>
    %21 = vector.shape_cast %20 : vector<1x8x16x8xbf16> to vector<8x16x8xbf16>
    %22 = arith.extf %21 : vector<8x16x8xbf16> to vector<8x16x8xf32>
    %23 = vector.extract_strided_slice %22 {offsets = [0, 0, 0], sizes = [1, 16, 8], strides = [1, 1, 1]} : vector<8x16x8xf32> to vector<1x16x8xf32>
    %24 = vector.extract_strided_slice %22 {offsets = [0, 0, 0], sizes = [7, 16, 8], strides = [1, 1, 1]} : vector<8x16x8xf32> to vector<7x16x8xf32>
    %25 = tpu.concatenate %23, %24 in 0 : vector<1x16x8xf32>, vector<7x16x8xf32> -> vector<8x16x8xf32>
    %26 = vector.extract_strided_slice %22 {offsets = [1, 0, 0], sizes = [7, 16, 8], strides = [1, 1, 1]} : vector<8x16x8xf32> to vector<7x16x8xf32>
    %27 = vector.extract_strided_slice %22 {offsets = [7, 0, 0], sizes = [1, 16, 8], strides = [1, 1, 1]} : vector<8x16x8xf32> to vector<1x16x8xf32>
    %28 = tpu.concatenate %26, %27 in 0 : vector<7x16x8xf32>, vector<1x16x8xf32> -> vector<8x16x8xf32>
    %cst_14 = arith.constant 7.500000e-01 : f32
    %29 = vector.broadcast %cst_14 : f32 to vector<8x16x8xf32>
    %30 = arith.mulf %29, %22 : vector<8x16x8xf32>
    %cst_15 = arith.constant 2.500000e-01 : f32
    %31 = vector.broadcast %cst_15 : f32 to vector<8x16x8xf32>
    %32 = arith.mulf %31, %25 : vector<8x16x8xf32>
    %33 = arith.addf %30, %32 : vector<8x16x8xf32>
    %cst_16 = arith.constant 7.500000e-01 : f32
    %34 = vector.broadcast %cst_16 : f32 to vector<8x16x8xf32>
    %35 = arith.mulf %34, %22 : vector<8x16x8xf32>
    %cst_17 = arith.constant 2.500000e-01 : f32
    %36 = vector.broadcast %cst_17 : f32 to vector<8x16x8xf32>
    %37 = arith.mulf %36, %28 : vector<8x16x8xf32>
    %38 = arith.addf %35, %37 : vector<8x16x8xf32>
    %39 = vector.shape_cast %33 : vector<8x16x8xf32> to vector<8x1x16x8xf32>
    %40 = vector.shape_cast %38 : vector<8x16x8xf32> to vector<8x1x16x8xf32>
    %41 = tpu.concatenate %39, %40 in 1 : vector<8x1x16x8xf32>, vector<8x1x16x8xf32> -> vector<8x2x16x8xf32>
    %42 = vector.shape_cast %41 : vector<8x2x16x8xf32> to vector<16x16x8xf32>
    %43 = tpu.iota {dimensions = array<i32: 1>} : vector<16x16x8xi32>
    %c0_i32_18 = arith.constant 0 : i32
    %44 = vector.broadcast %c0_i32_18 : i32 to vector<16x16x8xi32>
    %45 = arith.cmpi eq, %43, %44 : vector<16x16x8xi32>
    %c15_i32_19 = arith.constant 15 : i32
    %46 = vector.broadcast %c15_i32_19 : i32 to vector<16x16x8xi32>
    %47 = arith.cmpi eq, %43, %46 : vector<16x16x8xi32>
    %c1_i32_20 = arith.constant 1 : i32
    %48 = tpu.dynamic_rotate %42 by %c1_i32_20 dim 1 : vector<16x16x8xf32>, i32 -> vector<16x16x8xf32>
    %c15_i32_21 = arith.constant 15 : i32
    %49 = tpu.dynamic_rotate %42 by %c15_i32_21 dim 1 : vector<16x16x8xf32>, i32 -> vector<16x16x8xf32>
    %cst_22 = arith.constant 7.500000e-01 : f32
    %50 = vector.broadcast %cst_22 : f32 to vector<16x16x8xf32>
    %51 = arith.mulf %50, %42 : vector<16x16x8xf32>
    %52 = arith.select %45, %42, %48 : vector<16x16x8xi1>, vector<16x16x8xf32>
    %cst_23 = arith.constant 2.500000e-01 : f32
    %53 = vector.broadcast %cst_23 : f32 to vector<16x16x8xf32>
    %54 = arith.mulf %53, %52 : vector<16x16x8xf32>
    %55 = arith.addf %51, %54 : vector<16x16x8xf32>
    %56 = arith.truncf %55 : vector<16x16x8xf32> to vector<16x16x8xbf16>
    %cst_24 = arith.constant 7.500000e-01 : f32
    %57 = vector.broadcast %cst_24 : f32 to vector<16x16x8xf32>
    %58 = arith.mulf %57, %42 : vector<16x16x8xf32>
    %59 = arith.select %47, %42, %49 : vector<16x16x8xi1>, vector<16x16x8xf32>
    %cst_25 = arith.constant 2.500000e-01 : f32
    %60 = vector.broadcast %cst_25 : f32 to vector<16x16x8xf32>
    %61 = arith.mulf %60, %59 : vector<16x16x8xf32>
    %62 = arith.addf %58, %61 : vector<16x16x8xf32>
    %63 = arith.truncf %62 : vector<16x16x8xf32> to vector<16x16x8xbf16>
    %cst_26 = arith.constant 7.500000e-01 : f32
    %64 = vector.broadcast %cst_26 : f32 to vector<16x16x8xf32>
    %65 = arith.mulf %64, %48 : vector<16x16x8xf32>
    %cst_27 = arith.constant 2.500000e-01 : f32
    %66 = vector.broadcast %cst_27 : f32 to vector<16x16x8xf32>
    %67 = arith.mulf %66, %42 : vector<16x16x8xf32>
    %68 = arith.addf %65, %67 : vector<16x16x8xf32>
    %cst_28 = arith.constant 0.000000e+00 : f32
    %69 = vector.broadcast %cst_28 : f32 to vector<16x16x8xf32>
    %70 = arith.select %45, %69, %68 : vector<16x16x8xi1>, vector<16x16x8xf32>
    %71 = arith.truncf %70 : vector<16x16x8xf32> to vector<16x16x8xbf16>
    %cst_29 = arith.constant 7.500000e-01 : f32
    %72 = vector.broadcast %cst_29 : f32 to vector<16x16x8xf32>
    %73 = arith.mulf %72, %49 : vector<16x16x8xf32>
    %cst_30 = arith.constant 2.500000e-01 : f32
    %74 = vector.broadcast %cst_30 : f32 to vector<16x16x8xf32>
    %75 = arith.mulf %74, %42 : vector<16x16x8xf32>
    %76 = arith.addf %73, %75 : vector<16x16x8xf32>
    %cst_31 = arith.constant 0.000000e+00 : f32
    %77 = vector.broadcast %cst_31 : f32 to vector<16x16x8xf32>
    %78 = arith.select %47, %77, %76 : vector<16x16x8xi1>, vector<16x16x8xf32>
    %79 = arith.truncf %78 : vector<16x16x8xf32> to vector<16x16x8xbf16>
    %c0_32 = arith.constant 0 : index
    %c0_33 = arith.constant 0 : index
    %80 = vector.load %arg4[%c0_32, %c0_33] : memref<1x4xf32, #tpu.memory_space<vmem>>, vector<1x4xf32>
    %c0_34 = arith.constant 0 : index
    %c0_35 = arith.constant 0 : index
    %81 = vector.load %arg5[%c0_34, %c0_35] : memref<1x4xf32, #tpu.memory_space<vmem>>, vector<1x4xf32>
    %82 = tpu.concatenate %11, %71, %1, %56, %3, %63 in 2 : vector<16x16x4xbf16>, vector<16x16x8xbf16>, vector<16x16x4xbf16>, vector<16x16x8xbf16>, vector<16x16x4xbf16>, vector<16x16x8xbf16> -> vector<16x16x36xbf16>
    %cst_36 = arith.constant 0.000000e+00 : bf16
    %83 = vector.broadcast %cst_36 : bf16 to vector<1x16x36xbf16>
    %84 = tpu.concatenate %83, %82, %83 in 0 : vector<1x16x36xbf16>, vector<16x16x36xbf16>, vector<1x16x36xbf16> -> vector<18x16x36xbf16>
    %85 = vector.shape_cast %84 : vector<18x16x36xbf16> to vector<288x36xbf16>
    %86 = vector.extract_strided_slice %85 {offsets = [0, 0], sizes = [256, 36], strides = [1, 1]} : vector<288x36xbf16> to vector<256x36xbf16>
    %c0_37 = arith.constant 0 : index
    %c0_38 = arith.constant 0 : index
    %c0_39 = arith.constant 0 : index
    %87 = vector.load %arg3[%c0_37, %c0_38, %c0_39] : memref<3x36x4xbf16, #tpu.memory_space<vmem>>, vector<1x36x4xbf16>
    %88 = vector.shape_cast %87 : vector<1x36x4xbf16> to vector<36x4xbf16>
    %cst_40 = arith.constant dense<0.000000e+00> : vector<256x4xf32>
    %89 = tpu.matmul %86, %88, %cst_40 {dimension_numbers = #tpu.dot_dimension_numbers<[1], [0], [0], [1], [0, 0, 1, 1], [], []>} : vector<256x36xbf16>, vector<36x4xbf16>, vector<256x4xf32> -> vector<256x4xf32>
    %90 = vector.extract_strided_slice %85 {offsets = [16, 0], sizes = [256, 36], strides = [1, 1]} : vector<288x36xbf16> to vector<256x36xbf16>
    %c1_41 = arith.constant 1 : index
    %c0_42 = arith.constant 0 : index
    %c0_43 = arith.constant 0 : index
    %91 = vector.load %arg3[%c1_41, %c0_42, %c0_43] : memref<3x36x4xbf16, #tpu.memory_space<vmem>>, vector<1x36x4xbf16>
    %92 = vector.shape_cast %91 : vector<1x36x4xbf16> to vector<36x4xbf16>
    %cst_44 = arith.constant dense<0.000000e+00> : vector<256x4xf32>
    %93 = tpu.matmul %90, %92, %cst_44 {dimension_numbers = #tpu.dot_dimension_numbers<[1], [0], [0], [1], [0, 0, 1, 1], [], []>} : vector<256x36xbf16>, vector<36x4xbf16>, vector<256x4xf32> -> vector<256x4xf32>
    %94 = arith.addf %89, %93 : vector<256x4xf32>
    %95 = vector.extract_strided_slice %85 {offsets = [32, 0], sizes = [256, 36], strides = [1, 1]} : vector<288x36xbf16> to vector<256x36xbf16>
    %c2 = arith.constant 2 : index
    %c0_45 = arith.constant 0 : index
    %c0_46 = arith.constant 0 : index
    %96 = vector.load %arg3[%c2, %c0_45, %c0_46] : memref<3x36x4xbf16, #tpu.memory_space<vmem>>, vector<1x36x4xbf16>
    %97 = vector.shape_cast %96 : vector<1x36x4xbf16> to vector<36x4xbf16>
    %cst_47 = arith.constant dense<0.000000e+00> : vector<256x4xf32>
    %98 = tpu.matmul %95, %97, %cst_47 {dimension_numbers = #tpu.dot_dimension_numbers<[1], [0], [0], [1], [0, 0, 1, 1], [], []>} : vector<256x36xbf16>, vector<36x4xbf16>, vector<256x4xf32> -> vector<256x4xf32>
    %99 = arith.addf %94, %98 : vector<256x4xf32>
    %100 = vector.broadcast %80 : vector<1x4xf32> to vector<256x4xf32>
    %101 = arith.mulf %99, %100 : vector<256x4xf32>
    %102 = vector.broadcast %81 : vector<1x4xf32> to vector<256x4xf32>
    %103 = arith.addf %101, %102 : vector<256x4xf32>
    %cst_48 = arith.constant 0.000000e+00 : f32
    %104 = vector.broadcast %cst_48 : f32 to vector<256x4xf32>
    %105 = arith.maximumf %103, %104 : vector<256x4xf32>
    %106 = tpu.concatenate %1, %56, %3, %63, %19, %79 in 2 : vector<16x16x4xbf16>, vector<16x16x8xbf16>, vector<16x16x4xbf16>, vector<16x16x8xbf16>, vector<16x16x4xbf16>, vector<16x16x8xbf16> -> vector<16x16x36xbf16>
    %cst_49 = arith.constant 0.000000e+00 : bf16
    %107 = vector.broadcast %cst_49 : bf16 to vector<1x16x36xbf16>
    %108 = tpu.concatenate %107, %106, %107 in 0 : vector<1x16x36xbf16>, vector<16x16x36xbf16>, vector<1x16x36xbf16> -> vector<18x16x36xbf16>
    %109 = vector.shape_cast %108 : vector<18x16x36xbf16> to vector<288x36xbf16>
    %110 = vector.extract_strided_slice %109 {offsets = [0, 0], sizes = [256, 36], strides = [1, 1]} : vector<288x36xbf16> to vector<256x36xbf16>
    %c0_50 = arith.constant 0 : index
    %c0_51 = arith.constant 0 : index
    %c0_52 = arith.constant 0 : index
    %111 = vector.load %arg3[%c0_50, %c0_51, %c0_52] : memref<3x36x4xbf16, #tpu.memory_space<vmem>>, vector<1x36x4xbf16>
    %112 = vector.shape_cast %111 : vector<1x36x4xbf16> to vector<36x4xbf16>
    %cst_53 = arith.constant dense<0.000000e+00> : vector<256x4xf32>
    %113 = tpu.matmul %110, %112, %cst_53 {dimension_numbers = #tpu.dot_dimension_numbers<[1], [0], [0], [1], [0, 0, 1, 1], [], []>} : vector<256x36xbf16>, vector<36x4xbf16>, vector<256x4xf32> -> vector<256x4xf32>
    %114 = vector.extract_strided_slice %109 {offsets = [16, 0], sizes = [256, 36], strides = [1, 1]} : vector<288x36xbf16> to vector<256x36xbf16>
    %c1_54 = arith.constant 1 : index
    %c0_55 = arith.constant 0 : index
    %c0_56 = arith.constant 0 : index
    %115 = vector.load %arg3[%c1_54, %c0_55, %c0_56] : memref<3x36x4xbf16, #tpu.memory_space<vmem>>, vector<1x36x4xbf16>
    %116 = vector.shape_cast %115 : vector<1x36x4xbf16> to vector<36x4xbf16>
    %cst_57 = arith.constant dense<0.000000e+00> : vector<256x4xf32>
    %117 = tpu.matmul %114, %116, %cst_57 {dimension_numbers = #tpu.dot_dimension_numbers<[1], [0], [0], [1], [0, 0, 1, 1], [], []>} : vector<256x36xbf16>, vector<36x4xbf16>, vector<256x4xf32> -> vector<256x4xf32>
    %118 = arith.addf %113, %117 : vector<256x4xf32>
    %119 = vector.extract_strided_slice %109 {offsets = [32, 0], sizes = [256, 36], strides = [1, 1]} : vector<288x36xbf16> to vector<256x36xbf16>
    %c2_58 = arith.constant 2 : index
    %c0_59 = arith.constant 0 : index
    %c0_60 = arith.constant 0 : index
    %120 = vector.load %arg3[%c2_58, %c0_59, %c0_60] : memref<3x36x4xbf16, #tpu.memory_space<vmem>>, vector<1x36x4xbf16>
    %121 = vector.shape_cast %120 : vector<1x36x4xbf16> to vector<36x4xbf16>
    %cst_61 = arith.constant dense<0.000000e+00> : vector<256x4xf32>
    %122 = tpu.matmul %119, %121, %cst_61 {dimension_numbers = #tpu.dot_dimension_numbers<[1], [0], [0], [1], [0, 0, 1, 1], [], []>} : vector<256x36xbf16>, vector<36x4xbf16>, vector<256x4xf32> -> vector<256x4xf32>
    %123 = arith.addf %118, %122 : vector<256x4xf32>
    %124 = vector.broadcast %80 : vector<1x4xf32> to vector<256x4xf32>
    %125 = arith.mulf %123, %124 : vector<256x4xf32>
    %126 = vector.broadcast %81 : vector<1x4xf32> to vector<256x4xf32>
    %127 = arith.addf %125, %126 : vector<256x4xf32>
    %cst_62 = arith.constant 0.000000e+00 : f32
    %128 = vector.broadcast %cst_62 : f32 to vector<256x4xf32>
    %129 = arith.maximumf %127, %128 : vector<256x4xf32>
    %130 = vector.shape_cast %105 : vector<256x4xf32> to vector<16x16x4xf32>
    %131 = vector.shape_cast %129 : vector<256x4xf32> to vector<16x16x4xf32>
    %132 = tpu.iota {dimensions = array<i32: 1>} : vector<16x16x4xi32>
    %c0_i32_63 = arith.constant 0 : i32
    %133 = vector.broadcast %c0_i32_63 : i32 to vector<16x16x4xi32>
    %134 = arith.cmpi eq, %132, %133 : vector<16x16x4xi32>
    %c1_i32_64 = arith.constant 1 : i32
    %135 = tpu.dynamic_rotate %131 by %c1_i32_64 dim 1 : vector<16x16x4xf32>, i32 -> vector<16x16x4xf32>
    %cst_65 = arith.constant 0.000000e+00 : f32
    %136 = vector.broadcast %cst_65 : f32 to vector<16x16x4xf32>
    %137 = arith.select %134, %136, %135 : vector<16x16x4xi1>, vector<16x16x4xf32>
    %138 = arith.truncf %137 : vector<16x16x4xf32> to vector<16x16x4xbf16>
    %139 = tpu.iota {dimensions = array<i32: 1>} : vector<16x16x4xi32>
    %c15_i32_66 = arith.constant 15 : i32
    %140 = vector.broadcast %c15_i32_66 : i32 to vector<16x16x4xi32>
    %141 = arith.cmpi eq, %139, %140 : vector<16x16x4xi32>
    %c15_i32_67 = arith.constant 15 : i32
    %142 = tpu.dynamic_rotate %130 by %c15_i32_67 dim 1 : vector<16x16x4xf32>, i32 -> vector<16x16x4xf32>
    %cst_68 = arith.constant 0.000000e+00 : f32
    %143 = vector.broadcast %cst_68 : f32 to vector<16x16x4xf32>
    %144 = arith.select %141, %143, %142 : vector<16x16x4xi1>, vector<16x16x4xf32>
    %145 = arith.truncf %144 : vector<16x16x4xf32> to vector<16x16x4xbf16>
    %146 = arith.truncf %130 : vector<16x16x4xf32> to vector<16x16x4xbf16>
    %147 = arith.truncf %131 : vector<16x16x4xf32> to vector<16x16x4xbf16>
    %c0_69 = arith.constant 0 : index
    %c0_70 = arith.constant 0 : index
    %148 = vector.load %arg7[%c0_69, %c0_70] : memref<1x4xf32, #tpu.memory_space<vmem>>, vector<1x4xf32>
    %c0_71 = arith.constant 0 : index
    %c0_72 = arith.constant 0 : index
    %149 = vector.load %arg8[%c0_71, %c0_72] : memref<1x4xf32, #tpu.memory_space<vmem>>, vector<1x4xf32>
    %150 = tpu.concatenate %138, %146, %147 in 2 : vector<16x16x4xbf16>, vector<16x16x4xbf16>, vector<16x16x4xbf16> -> vector<16x16x12xbf16>
    %cst_73 = arith.constant 0.000000e+00 : bf16
    %151 = vector.broadcast %cst_73 : bf16 to vector<1x16x12xbf16>
    %152 = tpu.concatenate %151, %150, %151 in 0 : vector<1x16x12xbf16>, vector<16x16x12xbf16>, vector<1x16x12xbf16> -> vector<18x16x12xbf16>
    %153 = vector.shape_cast %152 : vector<18x16x12xbf16> to vector<288x12xbf16>
    %154 = vector.extract_strided_slice %153 {offsets = [0, 0], sizes = [256, 12], strides = [1, 1]} : vector<288x12xbf16> to vector<256x12xbf16>
    %c0_74 = arith.constant 0 : index
    %c0_75 = arith.constant 0 : index
    %c0_76 = arith.constant 0 : index
    %155 = vector.load %arg6[%c0_74, %c0_75, %c0_76] : memref<3x12x4xbf16, #tpu.memory_space<vmem>>, vector<1x12x4xbf16>
    %156 = vector.shape_cast %155 : vector<1x12x4xbf16> to vector<12x4xbf16>
    %cst_77 = arith.constant dense<0.000000e+00> : vector<256x4xf32>
    %157 = tpu.matmul %154, %156, %cst_77 {dimension_numbers = #tpu.dot_dimension_numbers<[1], [0], [0], [1], [0, 0, 1, 1], [], []>} : vector<256x12xbf16>, vector<12x4xbf16>, vector<256x4xf32> -> vector<256x4xf32>
    %158 = vector.extract_strided_slice %153 {offsets = [16, 0], sizes = [256, 12], strides = [1, 1]} : vector<288x12xbf16> to vector<256x12xbf16>
    %c1_78 = arith.constant 1 : index
    %c0_79 = arith.constant 0 : index
    %c0_80 = arith.constant 0 : index
    %159 = vector.load %arg6[%c1_78, %c0_79, %c0_80] : memref<3x12x4xbf16, #tpu.memory_space<vmem>>, vector<1x12x4xbf16>
    %160 = vector.shape_cast %159 : vector<1x12x4xbf16> to vector<12x4xbf16>
    %cst_81 = arith.constant dense<0.000000e+00> : vector<256x4xf32>
    %161 = tpu.matmul %158, %160, %cst_81 {dimension_numbers = #tpu.dot_dimension_numbers<[1], [0], [0], [1], [0, 0, 1, 1], [], []>} : vector<256x12xbf16>, vector<12x4xbf16>, vector<256x4xf32> -> vector<256x4xf32>
    %162 = arith.addf %157, %161 : vector<256x4xf32>
    %163 = vector.extract_strided_slice %153 {offsets = [32, 0], sizes = [256, 12], strides = [1, 1]} : vector<288x12xbf16> to vector<256x12xbf16>
    %c2_82 = arith.constant 2 : index
    %c0_83 = arith.constant 0 : index
    %c0_84 = arith.constant 0 : index
    %164 = vector.load %arg6[%c2_82, %c0_83, %c0_84] : memref<3x12x4xbf16, #tpu.memory_space<vmem>>, vector<1x12x4xbf16>
    %165 = vector.shape_cast %164 : vector<1x12x4xbf16> to vector<12x4xbf16>
    %cst_85 = arith.constant dense<0.000000e+00> : vector<256x4xf32>
    %166 = tpu.matmul %163, %165, %cst_85 {dimension_numbers = #tpu.dot_dimension_numbers<[1], [0], [0], [1], [0, 0, 1, 1], [], []>} : vector<256x12xbf16>, vector<12x4xbf16>, vector<256x4xf32> -> vector<256x4xf32>
    %167 = arith.addf %162, %166 : vector<256x4xf32>
    %168 = vector.broadcast %148 : vector<1x4xf32> to vector<256x4xf32>
    %169 = arith.mulf %167, %168 : vector<256x4xf32>
    %170 = vector.broadcast %149 : vector<1x4xf32> to vector<256x4xf32>
    %171 = arith.addf %169, %170 : vector<256x4xf32>
    %cst_86 = arith.constant 0.000000e+00 : f32
    %172 = vector.broadcast %cst_86 : f32 to vector<256x4xf32>
    %173 = arith.maximumf %171, %172 : vector<256x4xf32>
    %174 = tpu.concatenate %146, %147, %145 in 2 : vector<16x16x4xbf16>, vector<16x16x4xbf16>, vector<16x16x4xbf16> -> vector<16x16x12xbf16>
    %cst_87 = arith.constant 0.000000e+00 : bf16
    %175 = vector.broadcast %cst_87 : bf16 to vector<1x16x12xbf16>
    %176 = tpu.concatenate %175, %174, %175 in 0 : vector<1x16x12xbf16>, vector<16x16x12xbf16>, vector<1x16x12xbf16> -> vector<18x16x12xbf16>
    %177 = vector.shape_cast %176 : vector<18x16x12xbf16> to vector<288x12xbf16>
    %178 = vector.extract_strided_slice %177 {offsets = [0, 0], sizes = [256, 12], strides = [1, 1]} : vector<288x12xbf16> to vector<256x12xbf16>
    %c0_88 = arith.constant 0 : index
    %c0_89 = arith.constant 0 : index
    %c0_90 = arith.constant 0 : index
    %179 = vector.load %arg6[%c0_88, %c0_89, %c0_90] : memref<3x12x4xbf16, #tpu.memory_space<vmem>>, vector<1x12x4xbf16>
    %180 = vector.shape_cast %179 : vector<1x12x4xbf16> to vector<12x4xbf16>
    %cst_91 = arith.constant dense<0.000000e+00> : vector<256x4xf32>
    %181 = tpu.matmul %178, %180, %cst_91 {dimension_numbers = #tpu.dot_dimension_numbers<[1], [0], [0], [1], [0, 0, 1, 1], [], []>} : vector<256x12xbf16>, vector<12x4xbf16>, vector<256x4xf32> -> vector<256x4xf32>
    %182 = vector.extract_strided_slice %177 {offsets = [16, 0], sizes = [256, 12], strides = [1, 1]} : vector<288x12xbf16> to vector<256x12xbf16>
    %c1_92 = arith.constant 1 : index
    %c0_93 = arith.constant 0 : index
    %c0_94 = arith.constant 0 : index
    %183 = vector.load %arg6[%c1_92, %c0_93, %c0_94] : memref<3x12x4xbf16, #tpu.memory_space<vmem>>, vector<1x12x4xbf16>
    %184 = vector.shape_cast %183 : vector<1x12x4xbf16> to vector<12x4xbf16>
    %cst_95 = arith.constant dense<0.000000e+00> : vector<256x4xf32>
    %185 = tpu.matmul %182, %184, %cst_95 {dimension_numbers = #tpu.dot_dimension_numbers<[1], [0], [0], [1], [0, 0, 1, 1], [], []>} : vector<256x12xbf16>, vector<12x4xbf16>, vector<256x4xf32> -> vector<256x4xf32>
    %186 = arith.addf %181, %185 : vector<256x4xf32>
    %187 = vector.extract_strided_slice %177 {offsets = [32, 0], sizes = [256, 12], strides = [1, 1]} : vector<288x12xbf16> to vector<256x12xbf16>
    %c2_96 = arith.constant 2 : index
    %c0_97 = arith.constant 0 : index
    %c0_98 = arith.constant 0 : index
    %188 = vector.load %arg6[%c2_96, %c0_97, %c0_98] : memref<3x12x4xbf16, #tpu.memory_space<vmem>>, vector<1x12x4xbf16>
    %189 = vector.shape_cast %188 : vector<1x12x4xbf16> to vector<12x4xbf16>
    %cst_99 = arith.constant dense<0.000000e+00> : vector<256x4xf32>
    %190 = tpu.matmul %187, %189, %cst_99 {dimension_numbers = #tpu.dot_dimension_numbers<[1], [0], [0], [1], [0, 0, 1, 1], [], []>} : vector<256x12xbf16>, vector<12x4xbf16>, vector<256x4xf32> -> vector<256x4xf32>
    %191 = arith.addf %186, %190 : vector<256x4xf32>
    %192 = vector.broadcast %148 : vector<1x4xf32> to vector<256x4xf32>
    %193 = arith.mulf %191, %192 : vector<256x4xf32>
    %194 = vector.broadcast %149 : vector<1x4xf32> to vector<256x4xf32>
    %195 = arith.addf %193, %194 : vector<256x4xf32>
    %cst_100 = arith.constant 0.000000e+00 : f32
    %196 = vector.broadcast %cst_100 : f32 to vector<256x4xf32>
    %197 = arith.maximumf %195, %196 : vector<256x4xf32>
    %198 = vector.shape_cast %173 : vector<256x4xf32> to vector<16x16x4xf32>
    %199 = arith.truncf %198 : vector<16x16x4xf32> to vector<16x16x4xbf16>
    %c0_101 = arith.constant 0 : index
    %c0_102 = arith.constant 0 : index
    %c0_103 = arith.constant 0 : index
    %c0_104 = arith.constant 0 : index
    %c0_105 = arith.constant 0 : index
    %200 = vector.load %arg9[%c0_101, %c0_102, %c0_103, %c0_104, %c0_105] : memref<1x2x16x16x4xbf16, #tpu.memory_space<vmem>>, vector<1x1x16x16x4xbf16>
    %201 = vector.shape_cast %200 : vector<1x1x16x16x4xbf16> to vector<16x16x4xbf16>
    %202 = vector.shape_cast %199 : vector<16x16x4xbf16> to vector<1x1x16x16x4xbf16>
    tpu.vector_store %arg9[%c0_101, %c0_102, %c0_103, %c0_104, %c0_105], %202 {strides = array<i32>} : memref<1x2x16x16x4xbf16, #tpu.memory_space<vmem>>, vector<1x1x16x16x4xbf16>,
    %203 = vector.shape_cast %197 : vector<256x4xf32> to vector<16x16x4xf32>
    %204 = arith.truncf %203 : vector<16x16x4xf32> to vector<16x16x4xbf16>
    %c0_106 = arith.constant 0 : index
    %c1_107 = arith.constant 1 : index
    %c0_108 = arith.constant 0 : index
    %c0_109 = arith.constant 0 : index
    %c0_110 = arith.constant 0 : index
    %205 = vector.load %arg9[%c0_106, %c1_107, %c0_108, %c0_109, %c0_110] : memref<1x2x16x16x4xbf16, #tpu.memory_space<vmem>>, vector<1x1x16x16x4xbf16>
    %206 = vector.shape_cast %205 : vector<1x1x16x16x4xbf16> to vector<16x16x4xbf16>
    %207 = vector.shape_cast %204 : vector<16x16x4xbf16> to vector<1x1x16x16x4xbf16>
    tpu.vector_store %arg9[%c0_106, %c1_107, %c0_108, %c0_109, %c0_110], %207 {strides = array<i32>} : memref<1x2x16x16x4xbf16, #tpu.memory_space<vmem>>, vector<1x1x16x16x4xbf16>,
    return
  }
  func.func @transform_0(%arg0: i32) -> (i32, i32, i32, i32, i32) {
    %c0_i32 = arith.constant 0 : i32
    %c0_i32_0 = arith.constant 0 : i32
    %c0_i32_1 = arith.constant 0 : i32
    %c0_i32_2 = arith.constant 0 : i32
    %c0_i32_3 = arith.constant 0 : i32
    return %arg0, %c0_i32, %c0_i32_0, %c0_i32_1, %c0_i32_2 : i32, i32, i32, i32, i32
  }
  func.func @transform_1(%arg0: i32) -> (i32, i32, i32, i32) {
    %c0_i32 = arith.constant 0 : i32
    %c0_i32_0 = arith.constant 0 : i32
    %c0_i32_1 = arith.constant 0 : i32
    %c0_i32_2 = arith.constant 0 : i32
    return %arg0, %c0_i32, %c0_i32_0, %c0_i32_1 : i32, i32, i32, i32
  }
  func.func @transform_2(%arg0: i32) -> (i32, i32, i32) {
    %c0_i32 = arith.constant 0 : i32
    %c0_i32_0 = arith.constant 0 : i32
    %c0_i32_1 = arith.constant 0 : i32
    %c0_i32_2 = arith.constant 0 : i32
    return %c0_i32, %c0_i32_0, %c0_i32_1 : i32, i32, i32
  }
  func.func @transform_3(%arg0: i32) -> (i32, i32) {
    %c0_i32 = arith.constant 0 : i32
    %c0_i32_0 = arith.constant 0 : i32
    %c0_i32_1 = arith.constant 0 : i32
    return %c0_i32, %c0_i32_0 : i32, i32
  }
  func.func @transform_4(%arg0: i32) -> (i32, i32) {
    %c0_i32 = arith.constant 0 : i32
    %c0_i32_0 = arith.constant 0 : i32
    %c0_i32_1 = arith.constant 0 : i32
    return %c0_i32, %c0_i32_0 : i32, i32
  }
  func.func @transform_5(%arg0: i32) -> (i32, i32, i32) {
    %c0_i32 = arith.constant 0 : i32
    %c0_i32_0 = arith.constant 0 : i32
    %c0_i32_1 = arith.constant 0 : i32
    %c0_i32_2 = arith.constant 0 : i32
    return %c0_i32, %c0_i32_0, %c0_i32_1 : i32, i32, i32
  }
  func.func @transform_6(%arg0: i32) -> (i32, i32) {
    %c0_i32 = arith.constant 0 : i32
    %c0_i32_0 = arith.constant 0 : i32
    %c0_i32_1 = arith.constant 0 : i32
    return %c0_i32, %c0_i32_0 : i32, i32
  }
  func.func @transform_7(%arg0: i32) -> (i32, i32) {
    %c0_i32 = arith.constant 0 : i32
    %c0_i32_0 = arith.constant 0 : i32
    %c0_i32_1 = arith.constant 0 : i32
    return %c0_i32, %c0_i32_0 : i32, i32
  }
  func.func @transform_8(%arg0: i32) -> (i32, i32, i32, i32, i32) {
    %c0_i32 = arith.constant 0 : i32
    %c0_i32_0 = arith.constant 0 : i32
    %c0_i32_1 = arith.constant 0 : i32
    %c0_i32_2 = arith.constant 0 : i32
    %c0_i32_3 = arith.constant 0 : i32
    return %arg0, %c0_i32, %c0_i32_0, %c0_i32_1, %c0_i32_2 : i32, i32, i32, i32, i32
  }
}

</mosaic_0001>

<bundles_post_ra>
// kernel: unet_up_concat_forward.1
= control target key start
LH: loop header
LB: loop body
LE: loop exit
PB: predicated region body
PF: predicated region fallthrough
CT: control target
= control target key end

     0   :  { %s7595_s27 = smov 0   ;;  %s11596_s0 = inlined_call_operand.vmem [shape: bf16[2,2,16,16,4], index: 0, kind: input, shape index: {}]   ;;  %s11597_s1 = inlined_call_operand.vmem [shape: bf16[2,8,16,8], index: 1, kind: input, shape index: {}]   ;;  %s11598_s2 = inlined_call_operand.vmem [shape: bf16[3,36,4], index: 2, kind: input, shape index: {}]   ;;  %s11599_s3 = inlined_call_operand.vmem [shape: f32[1,4], index: 3, kind: input, shape index: {}]   ;;  %s11600_s4 = inlined_call_operand.vmem [shape: f32[1,4], index: 4, kind: input, shape index: {}]   ;;  %s11601_s5 = inlined_call_operand.vmem [shape: bf16[3,12,4], index: 5, kind: input, shape index: {}]   ;;  %s11602_s6 = inlined_call_operand.vmem [shape: f32[1,4], index: 6, kind: input, shape index: {}]   ;;  %s11603_s7 = inlined_call_operand.vmem [shape: f32[1,4], index: 7, kind: input, shape index: {}]   ;;  %s11604_s8 = inlined_call_operand.vmem [shape: bf16[2,2,16,16,4], index: 8, kind: output, shape index: {}]  }
   0x1 LB: > { %s6035_s28 = sadd.s32 4294967295, %s7541_s27   ;;  %p6039_p0 = scmp.ge.s32.totalorder %s7541_s27, 1  ;;  %s7541_s27 = sphi %s7595_s27, %s18_s27  }
   0x2   : > { %p272_p1 = scmp.lt.s32.totalorder %s7541_s27, 3 }
   0x4   : > { %p273_p2 = pnand %p6039_p0, %p272_p1 }
   0x6   : > { %276 = sbr.rel (%p273_p2) target bundleno = 1366 (0x556), region = 52 }
   0xd   : > { %p311_p3 = scmp.lt.s32.totalorder %s6035_s28, 1  ;;  %v424_v0 = vlaneseq  ;;  %s7543_s15 = smov 12   ;;  %v7473_v35 = vld [vmem:[%s11598_s2 + $0x14] sm:$0xff]   ;;  %v7474_v52 = vld [vmem:[%s11598_s2 + $0x1c] sm:$0xff]   ;;  %vm2035_vm4 = vcmask 1041408   ;;  %vm1795_vm5 = vcmask 31744  }
   0xe   : > { %s7544_s16 = smov 24   ;;  %6744 = vmatprep.subr.bf16.mxu0 %v7473_v35  ;;  %6858 = vmatprep.subr.bf16.mxu1 %v7473_v35  ;;  %s7545_s21 = smov 4   ;;  %vm1844_vm6 = vcmask 97280   ;;  %vm1877_vm7 = vcmask 130048   ;;  %vm1910_vm8 = vcmask 195584   ;;  %vm1943_vm9 = vcmask 228352  }
   0xf   : > { %s11818_s28 = smov (!%p311_p3, %s6035_s28), 1  ;;  %v7631_v5 = vshrl.u32 %v424_v0, 7  ;;  %6745 = vmatpush3.bf16.msra.mxu0 %v7473_v35  ;;  %6859 = vmatpush3.bf16.msra.mxu1 %v7473_v35  ;;  %s7546_s22 = smov 16   ;;  %vm2002_vm10 = vcmask 293888   ;;  %vm4195_vm11 = vcmask 1045504   ;;  %vm4120_vm12 = vcmask 64512  }
  0x10   : > { %s6422_s29 = sshll.u32 %s11818_s28, 8  ;;  %s6423_s30 = sshll.u32 %s11818_s28, 6  ;;  %6746 = vmatprep.subr.bf16.mxu0 %v7474_v52  ;;  %6860 = vmatprep.subr.bf16.mxu1 %v7474_v52  ;;  %vm5774_vm13 = vcmask 27648  }
  0x11   : > { %s7612_s11 = scalar_lea.vmem %s11596_s0, %s6422_s29  ;;  %s7626_s14 = scalar_lea.vmem %s11597_s1, %s6423_s30  ;;  %vm427_vm0 = vcmp.eq.s32.totalorder %v7631_v5, 0  ;;  %v7645_v15 = vadd.s32 8, %v7631_v5  ;;  %vm461_vm1 = vcmp.lt.s32.totalorder %v7631_v5, 1  ;;  %vm608_vm2 = vcmp.lt.s32.totalorder %v7631_v5, 7 }
  0x12   : > { %v7615_v1 = vld [vmem:[%s7612_s11] sm:$0xff]   ;;  %v7621_v3 = vld [vmem:[%s7612_s11 + $0x8] sm:$0xff]   ;;  %s7547_s23 = smov 28   ;;  %s7549_s24 = smov 8  }
  0x13   : > { %v7618_v2 = vld [vmem:[%s7612_s11 + $0x80] sm:$0xff]   ;;  %v7629_v4 = vld [vmem:[%s7612_s11 + $0x88] sm:$0xff]   ;;  %1555 = vrot.lane.b32.xlu1 %v7615_v1, %s7543_s15  ;;  %v544_v19 = vunpack.c.l.bf16 %v7621_v3  ;;  %v545_v23 = vunpack.c.h.bf16 %v7621_v3  ;;  %vm575_vm3 = vcmp.eq.s32.totalorder %v7645_v15, 15  ;;  %6747 = vmatpush3.bf16.msra.mxu0 %v7474_v52  ;;  %s11342_s17 = scalar_lea.vmem %s11604_s8, %s6422_s29 }
  0x14   : > { %v6490_v6 = vld [vmem:[%s7626_s14] sm:$0xff]   ;;  %v6521_v7 = vld [vmem:[%s7626_s14 + $0x8] sm:$0xff]   ;;  %1715 = vrot.lane.b32.xlu0 %v7618_v2, %s7544_s16  ;;  %6861 = vmatpush3.bf16.msra.mxu1 %v7474_v52 }
  0x15   : > { %v6491_v8 = vunpack.c.l.bf16 %v6490_v6  ;;  %v6492_v9 = vunpack.c.h.bf16 %v6490_v6  ;;  %v6495_v10 = vunpack.c.l.bf16 %v6521_v7  ;;  %v6496_v11 = vunpack.c.h.bf16 %v6521_v7 }
  0x17   : > { %1557 = vrot.lane.b32.xlu1 %v7621_v3, %s7543_s15  ;;  %v721_v12 = vmul.f32 0.75, %v6491_v8  ;;  %v722_v13 = vmul.f32 0.75, %v6492_v9  ;;  %v7642_v14 = vmul.f32 0.25, %v6491_v8  ;;  %v7650_v16 = vmul.f32 0.25, %v6492_v9 }
  0x18   : > { %1717 = vrot.lane.b32.xlu0 %v7629_v4, %s7544_s16  ;;  %v7652_v17 = vmul.f32 0.25, %v6495_v10  ;;  %v7654_v18 = vmul.f32 0.25, %v6496_v11  ;;  %v7660_v21 = vmul.f32 0.75, %v6495_v10  ;;  %v7662_v22 = vmul.f32 0.75, %v6496_v11 }
  0x19   : > { %v7658_v20 = vadd.f32 %v7642_v14, %v721_v12  ;;  %v7667_v24 = vadd.f32 %v7650_v16, %v722_v13 }
  0x1a   : > { %v7670_v25 = vadd.f32 %v7652_v17, %v721_v12  ;;  %v7673_v26 = vadd.f32 %v7654_v18, %v722_v13  ;;  %v7756_v35 = vadd.f32 %v7650_v16, %v7662_v22 }
  0x1b   : > { %2739 = vrot.lane.b32.xlu1 %v7618_v2, %s7543_s15  ;;  %v785_v27 = vrot.slane %v7658_v20, 7  ;;  %v7679_v28 = vmul.f32 0.25, %v7658_v20  ;;  %v7682_v29 = vmul.f32 0.75, %v7658_v20  ;;  %v849_v30 = vrot.slane %v7658_v20, 1 }
  0x1c   : > { %v801_v31 = vrot.slane %v7667_v24, 7  ;;  %v7688_v32 = vmul.f32 0.25, %v7667_v24  ;;  %v786_v33 = vrot.slane %v7670_v25, 7  ;;  %v802_v34 = vrot.slane %v7673_v26, 7 }
  0x1d   : > { %v7696_v36 = vmul.f32 0.75, %v7670_v25  ;;  %v7699_v37 = vmul.f32 0.75, %v7673_v26  ;;  %v7702_v38 = vmul.f32 0.25, %v7670_v25  ;;  %v7705_v39 = vmul.f32 0.25, %v7673_v26 }
  0x1e   : > { %v817_v40 = vsel %vm461_vm1, %v785_v27, %v801_v31  ;;  %v833_v41 = vsel %vm461_vm1, %v801_v31, %v785_v27  ;;  %v818_v42 = vsel %vm461_vm1, %v786_v33, %v802_v34  ;;  %v834_v43 = vsel %vm461_vm1, %v802_v34, %v786_v33 }
  0x1f   : > { %v1169_v44 = vmul.f32 0.75, %v833_v41  ;;  %v1170_v45 = vmul.f32 0.75, %v817_v40  ;;  %v947_v46 = vsel %vm427_vm0, %v7670_v25, %v834_v43  ;;  %v980_v47 = vmul.f32 0.25, %v818_v42 }
  0x20   : > { %v979_v48 = vmul.f32 0.25, %v947_v46  ;;  %v1171_v49 = vmul.f32 0.75, %v834_v43  ;;  %v1172_v50 = vmul.f32 0.75, %v818_v42  ;;  %v914_v51 = vmul.f32 0.75, %v7667_v24 }
  0x21   : > { %v1233_v53 = vadd.f32 %v7679_v28, %v1169_v44  ;;  %v1234_v54 = vadd.f32 %v7688_v32, %v1170_v45  ;;  %v1012_v55 = vadd.f32 %v980_v47, %v7699_v37  ;;  %v945_v56 = vsel %vm427_vm0, %v7658_v20, %v833_v41  ;;  %v7773_v45 = vld [vmem:[%s7626_s14 + $0x10] sm:$0xff]  }
  0x22   : > { %v1011_v57 = vadd.f32 %v979_v48, %v7696_v36  ;;  %v1235_v58 = vadd.f32 %v7702_v38, %v1171_v49  ;;  %v1236_v59 = vadd.f32 %v7705_v39, %v1172_v50  ;;  %v977_v60 = vmul.f32 0.25, %v945_v56 }
  0x23   : > { %v1265_v61 = vsel %vm427_vm0, 0.0, %v1233_v53  ;;  %v978_v62 = vmul.f32 0.25, %v817_v40  ;;  %v865_v63 = vrot.slane %v7667_v24, 1  ;;  %v850_v0 = vrot.slane %v7670_v25, 1 }
  0x24   : > { %v1297_v6 = vpack.c.bf16 %v1234_v54, %v1265_v61  ;;  %v1042_v7 = vpack.c.bf16 %v1012_v55, %v1011_v57  ;;  %v1267_v8 = vsel %vm427_vm0, 0.0, %v1235_v58  ;;  %v1009_v9 = vadd.f32 %v977_v60, %v7682_v29 }
  0x25   : > { %v1298_v10 = vpack.c.bf16 %v1236_v59, %v1267_v8  ;;  %v1010_v11 = vadd.f32 %v978_v62, %v914_v51  ;;  %v881_v12 = vsel %vm608_vm2, %v849_v30, %v865_v63  ;;  %v897_v13 = vsel %vm608_vm2, %v865_v63, %v849_v30 }
  0x26   : > { %1443 = vrot.lane.b32.xlu0 %v1297_v6, %s7545_s21  ;;  %1605 = vrot.lane.b32.xlu1 %v1042_v7, %s7546_s22  ;;  %v1058_v20 = vsel %vm575_vm3, %v7667_v24, %v897_v13  ;;  %v1089_v25 = vmul.f32 0.25, %v881_v12  ;;  %v866_v27 = vrot.slane %v7673_v26, 1  ;;  %v7750_v31 = vadd.f32 %v7642_v14, %v7660_v21 }
  0x27   : > { %v577_v30 = vrot.slane %v544_v19, 1  ;;  %v1041_v33 = vpack.c.bf16 %v1010_v11, %v1009_v9  ;;  %v1090_v34 = vmul.f32 0.25, %v1058_v20  ;;  %v593_v19 = vrot.slane %v545_v23, 1 }
  0x28   : > { %v1121_v40 = vadd.f32 %v1089_v25, %v7682_v29  ;;  %v882_v24 = vsel %vm608_vm2, %v850_v0, %v866_v27  ;;  %v898_v41 = vsel %vm608_vm2, %v866_v27, %v850_v0  ;;  %v787_v14 = vrot.slane %v7750_v31, 7 }
  0x29   : > { %v1122_v42 = vadd.f32 %v1090_v34, %v914_v51  ;;  %v1060_v43 = vsel %vm575_vm3, %v7673_v26, %v898_v41  ;;  %v803_v16 = vrot.slane %v7756_v35, 7  ;;  %v1091_v29 = vmul.f32 0.25, %v882_v24 }
  0x2a   : > { %1445 = vrot.lane.b32.xlu0 %v1298_v10, %s7545_s21  ;;  %2707 = vrot.lane.b32.xlu1 %v1041_v33, %s7545_s21  ;;  %v1092_v44 = vmul.f32 0.25, %v1060_v43  ;;  %v543_v47 = vunpack.c.h.bf16 %v7615_v1  ;;  %v542_v23 = vunpack.c.l.bf16 %v7615_v1  ;;  %v626_v26 = vsel %vm608_vm2, %v593_v19, %v577_v30 }
  0x2b   : > { %v1153_v46 = vpack.c.bf16 %v1122_v42, %v1121_v40  ;;  %v7779_v48 = vsel %vm461_vm1, %v803_v16, %v787_v14  ;;  %v6499_v49 = vunpack.c.l.bf16 %v7773_v45  ;;  %v6500_v50 = vunpack.c.h.bf16 %v7773_v45 }
  0x2c   : > { %v1123_v51 = vadd.f32 %v1091_v29, %v7696_v36  ;;  %v1124_v52 = vadd.f32 %v1092_v44, %v7699_v37  ;;  %v7791_v53 = vsel %vm461_vm1, %v787_v14, %v803_v16  ;;  %v1173_v54 = vmul.f32 0.75, %v7779_v48 }
  0x2d   : > { %v7795_v55 = vmul.f32 0.25, %v7750_v31  ;;  %v7799_v56 = vmul.f32 0.25, %v6499_v49  ;;  %v7803_v57 = vmul.f32 0.25, %v6500_v50  ;;  %v592_v36 = vrot.slane %v543_v47, 1 }
  0x2e   : > { %1603 = vrot.lane.b32.xlu0 %v1041_v33, %s7546_s22  ;;  %1763 = vrot.lane.b32.xlu1 %v1153_v46, %s7547_s23  ;;  %v576_v58 = vrot.slane %v542_v23, 1  ;;  %v610_v37 = vsel %vm608_vm2, %v577_v30, %v593_v19  ;;  %v644_v59 = vsel %vm575_vm3, 0.0, %v626_v26  ;;  %v1174_v60 = vmul.f32 0.75, %v7791_v53 }
  0x2f   : > { %v7811_v61 = vmul.f32 0.25, %v7756_v35  ;;  %v7815_v62 = vadd.f32 %v7799_v56, %v7660_v21  ;;  %v7819_v63 = vadd.f32 %v7803_v57, %v7662_v22  ;;  %v1154_v0 = vpack.c.bf16 %v1124_v52, %v1123_v51  ;;  %v7866_v51 = vld [vmem:[%s7612_s11 + $0x18] sm:$0xff]  }
  0x30   : > { %v1314_v6 = vmul.f32 0.75, %v897_v13  ;;  %v1237_v8 = vadd.f32 %v7795_v55, %v1173_v54  ;;  %v674_v11 = vpack.c.bf16 %v644_v59, %v610_v37  ;;  %v625_v21 = vsel %vm608_vm2, %v592_v36, %v576_v58  ;;  %11674 = vst [vmem:[#allocation2_spill] sm:$0xff] %v7866_v51 }
  0x31   : > { %v788_v9 = vrot.slane %v7815_v62, 7  ;;  %v804_v10 = vrot.slane %v7819_v63, 7  ;;  %v7830_v22 = vmul.f32 0.25, %v7815_v62  ;;  %v1313_v20 = vmul.f32 0.75, %v881_v12 }
  0x32   : > { %2709 = vrot.lane.b32.xlu0 %v1042_v7, %s7545_s21  ;;  %2741 = vrot.lane.b32.xlu1 %v7629_v4, %s7543_s15  ;;  %v1238_v7 = vadd.f32 %v7811_v61, %v1174_v60  ;;  %v1316_v27 = vmul.f32 0.75, %v898_v41  ;;  %v7840_v34 = vmul.f32 0.25, %v7819_v63  ;;  %v1346_v12 = vadd.f32 %v1314_v6, %v7688_v32 }
  0x33   : > { %v820_v25 = vsel %vm461_vm1, %v788_v9, %v804_v10  ;;  %v836_v13 = vsel %vm461_vm1, %v804_v10, %v788_v9  ;;  %v1269_v40 = vsel %vm427_vm0, 0.0, %v1237_v8  ;;  %v609_v14 = vsel %vm608_vm2, %v576_v58, %v592_v36 }
  0x34   : > { %v1175_v30 = vmul.f32 0.75, %v836_v13  ;;  %v1176_v33 = vmul.f32 0.75, %v820_v25  ;;  %v642_v41 = vsel %vm575_vm3, 0.0, %v625_v21  ;;  %v1315_v42 = vmul.f32 0.75, %v882_v24  ;;  %v7894_v21 = vld [vmem:[%s7612_s11 + $0x10] sm:$0xff]  }
  0x35   : > { %v1345_v43 = vadd.f32 %v1313_v20, %v7679_v28  ;;  %v1348_v16 = vadd.f32 %v1316_v27, %v7705_v39  ;;  %v1299_v32 = vpack.c.bf16 %v1238_v7, %v1269_v40  ;;  %v673_v29 = vpack.c.bf16 %v642_v41, %v609_v14 }
  0x36   : > { %1765 = vrot.lane.b32.xlu0 %v1154_v0, %s7547_s23  ;;  %2773 = vrot.lane.b32.xlu1 %v1154_v0, %s7546_s22  ;;  %v1239_v19 = vadd.f32 %v7830_v22, %v1175_v30  ;;  %v1240_v44 = vadd.f32 %v7840_v34, %v1176_v33  ;;  %v1378_v47 = vsel %vm575_vm3, 0.0, %v1346_v12  ;;  %v951_v28 = vsel %vm427_vm0, %v7815_v62, %v836_v13 }
  0x37   : > { %v1347_v39 = vadd.f32 %v1315_v42, %v7702_v38  ;;  %v851_v24 = vrot.slane %v7750_v31, 1  ;;  %v1409_v26 = vpack.c.bf16 %v1378_v47, %v1345_v43  ;;  %v1380_v52 = vsel %vm575_vm3, 0.0, %v1348_v16 }
  0x38   : > { %v1271_v23 = vsel %vm427_vm0, 0.0, %v1239_v19  ;;  %v7871_v54 = vmul.f32 0.75, %v7815_v62  ;;  %v7874_v36 = vmul.f32 0.75, %v7819_v63  ;;  %v983_v58 = vmul.f32 0.25, %v951_v28 }
  0x39   : > { %v1300_v38 = vpack.c.bf16 %v1240_v44, %v1271_v23  ;;  %v984_v37 = vmul.f32 0.25, %v820_v25  ;;  %v949_v59 = vsel %vm427_vm0, %v7750_v31, %v7779_v48  ;;  %v1410_v60 = vpack.c.bf16 %v1380_v52, %v1347_v39 }
  0x3a   : > { %2771 = vrot.lane.b32.xlu0 %v1153_v46, %s7546_s22  ;;  %2821 = vrot.lane.b32.xlu1 %v674_v11, %s7544_s16  ;;  %v867_v46 = vrot.slane %v7756_v35, 1  ;;  %v917_v6 = vmul.f32 0.75, %v7750_v31  ;;  %v918_v8 = vmul.f32 0.75, %v7756_v35  ;;  %v981_v9 = vmul.f32 0.25, %v949_v59 }
  0x3b   : > { %v982_v10 = vmul.f32 0.25, %v7791_v53  ;;  %v1015_v11 = vadd.f32 %v983_v58, %v7871_v54  ;;  %v1016_v48 = vadd.f32 %v984_v37, %v7874_v36  ;;  %v725_v20 = vmul.f32 0.75, %v6499_v49  ;;  %v7915_v49 = vld [vmem:[%s7626_s14 + $0x18] sm:$0xff]  }
  0x3c   : > { %v7884_v0 = vsel %vm608_vm2, %v867_v46, %v851_v24  ;;  %v726_v31 = vmul.f32 0.75, %v6500_v50  ;;  %v7902_v7 = vsel %vm608_vm2, %v851_v24, %v867_v46  ;;  %v1013_v13 = vadd.f32 %v981_v9, %v917_v6 }
  0x3d   : > { %v1062_v53 = vsel %vm575_vm3, %v7756_v35, %v7884_v0  ;;  %v7909_v25 = vadd.f32 %v7652_v17, %v725_v20  ;;  %v1014_v27 = vadd.f32 %v982_v10, %v918_v8  ;;  %v7920_v45 = vpack.c.bf16 %v1016_v48, %v1015_v11 }
  0x3e   : > { %1447 = vrot.lane.b32.xlu1 %v1299_v32, %s7545_s21  ;;  %2819 = vrot.lane.b32.xlu0 %v673_v29, %s7544_s16  ;;  %v7912_v30 = vadd.f32 %v7654_v18, %v726_v31  ;;  %v1093_v50 = vmul.f32 0.25, %v7902_v7  ;;  %v1094_v35 = vmul.f32 0.25, %v1062_v53  ;;  %v852_v33 = vrot.slane %v7815_v62, 1  ;;  %v7944_v29 = vld [vmem:[%s7612_s11 + $0x90] sm:$0xff]  }
  0x3f   : > { %v789_v17 = vrot.slane %v7909_v25, 7  ;;  %v868_v18 = vrot.slane %v7819_v63, 1  ;;  %v7928_v40 = vmul.f32 0.25, %v7909_v25  ;;  %v6503_v41 = vunpack.c.l.bf16 %v7915_v49 }
  0x40   : > { %v805_v12 = vrot.slane %v7912_v30, 7  ;;  %v7931_v14 = vmul.f32 0.25, %v7912_v30  ;;  %v6504_v19 = vunpack.c.h.bf16 %v7915_v49  ;;  %v1043_v42 = vpack.c.bf16 %v1014_v27, %v1013_v13 }
  0x41   : > { %v1125_v16 = vadd.f32 %v1093_v50, %v917_v6  ;;  %v1126_v32 = vadd.f32 %v1094_v35, %v918_v8  ;;  %v548_v23 = vunpack.c.l.bf16 %v7866_v51  ;;  %v549_v28 = vunpack.c.h.bf16 %v7866_v51  ;;  %v7982_v8 = vld [vmem:[%s7612_s11 + $0x98] sm:$0xff]  }
  0x42   : > { %1449 = vrot.lane.b32.xlu1 %v1300_v38, %s7545_s21  ;;  %2867 = vrot.lane.b32.xlu0 %v1409_v26, %s7547_s23  ;;  %v821_v43 = vsel %vm461_vm1, %v789_v17, %v805_v12  ;;  %v837_v62 = vsel %vm461_vm1, %v805_v12, %v789_v17  ;;  %v7950_v39 = vsel %vm608_vm2, %v868_v18, %v852_v33  ;;  %v7958_v26 = vmul.f32 0.25, %v6503_v41 }
  0x43   : > { %v1177_v44 = vmul.f32 0.75, %v837_v62  ;;  %v1178_v47 = vmul.f32 0.75, %v821_v43  ;;  %v7962_v52 = vmul.f32 0.25, %v6504_v19  ;;  %v7966_v38 = vpack.c.bf16 %v1126_v32, %v1125_v16 }
  0x44   : > { %v7970_v58 = vsel %vm608_vm2, %v852_v33, %v868_v18  ;;  %v1064_v37 = vsel %vm575_vm3, %v7819_v63, %v7950_v39  ;;  %v546_v6 = vunpack.c.l.bf16 %v7894_v21  ;;  %v595_v10 = vrot.slane %v549_v28, 1 }
  0x45   : > { %v1241_v24 = vadd.f32 %v7928_v40, %v1177_v44  ;;  %v7954_v46 = vadd.f32 %v7931_v14, %v1178_v47  ;;  %v547_v11 = vunpack.c.h.bf16 %v7894_v21  ;;  %v7988_v48 = vadd.f32 %v7958_v26, %v725_v20 }
  0x46   : > { %1561 = vrot.lane.b32.xlu1 %v7866_v51, %s7543_s15  ;;  %2869 = vrot.lane.b32.xlu0 %v1410_v60, %s7547_s23  ;;  %v579_v60 = vrot.slane %v548_v23, 1  ;;  %v7991_v63 = vadd.f32 %v7962_v52, %v726_v31  ;;  %v1095_v53 = vmul.f32 0.25, %v7970_v58  ;;  %v1096_v13 = vmul.f32 0.25, %v1064_v37 }
  0x47   : > { %v7978_v59 = vsel %vm427_vm0, 0.0, %v1241_v24  ;;  %v578_v27 = vrot.slane %v546_v6, 1  ;;  %v594_v50 = vrot.slane %v547_v11, 1  ;;  %v790_v20 = vrot.slane %v7988_v48, 7 }
  0x48   : > { %v1301_v9 = vpack.c.bf16 %v7954_v46, %v7978_v59  ;;  %v628_v35 = vsel %vm608_vm2, %v595_v10, %v579_v60  ;;  %v806_v17 = vrot.slane %v7991_v63, 7  ;;  %v1127_v31 = vadd.f32 %v1095_v53, %v7871_v54 }
  0x49   : > { %v1128_v33 = vadd.f32 %v1096_v13, %v7874_v36  ;;  %v921_v18 = vmul.f32 0.75, %v7909_v25  ;;  %v922_v12 = vmul.f32 0.75, %v7912_v30  ;;  %v953_v16 = vsel %vm427_vm0, %v7909_v25, %v837_v62 }
  0x4a   : > { %1609 = vrot.lane.b32.xlu1 %v7920_v45, %s7546_s22  ;;  %1559 = vrot.lane.b32.xlu0 %v7894_v21, %s7543_s15  ;;  %v986_v32 = vmul.f32 0.25, %v821_v43  ;;  %v853_v54 = vrot.slane %v7909_v25, 1  ;;  %v612_v36 = vsel %vm608_vm2, %v579_v60, %v595_v10  ;;  %v648_v44 = vsel %vm575_vm3, 0.0, %v628_v35 }
  0x4b   : > { %v985_v47 = vmul.f32 0.25, %v953_v16  ;;  %v869_v23 = vrot.slane %v7912_v30, 1  ;;  %v627_v28 = vsel %vm608_vm2, %v594_v50, %v578_v27  ;;  %v1317_v62 = vmul.f32 0.75, %v7902_v7 }
  0x4c   : > { %v1018_v43 = vadd.f32 %v986_v32, %v922_v12  ;;  %v1156_v24 = vpack.c.bf16 %v1128_v33, %v1127_v31  ;;  %v8034_v6 = vmul.f32 0.25, %v7988_v48  ;;  %v822_v53 = vsel %vm461_vm1, %v790_v20, %v806_v17 }
  0x4d   : > { %v1017_v25 = vadd.f32 %v985_v47, %v921_v18  ;;  %v885_v37 = vsel %vm608_vm2, %v853_v54, %v869_v23  ;;  %v901_v60 = vsel %vm608_vm2, %v869_v23, %v853_v54  ;;  %v676_v33 = vpack.c.bf16 %v648_v44, %v612_v36 }
  0x4e   : > { %2711 = vrot.lane.b32.xlu1 %v1043_v42, %s7545_s21  ;;  %1607 = vrot.lane.b32.xlu0 %v1043_v42, %s7546_s22  ;;  %v1318_v42 = vmul.f32 0.75, %v7884_v0  ;;  %v838_v0 = vsel %vm461_vm1, %v806_v17, %v790_v20  ;;  %v1066_v10 = vsel %vm575_vm3, %v7912_v30, %v901_v60  ;;  %v1097_v11 = vmul.f32 0.25, %v885_v37 }
  0x4f   : > { %v1179_v13 = vmul.f32 0.75, %v838_v0  ;;  %v8042_v35 = vpack.c.bf16 %v1018_v43, %v1017_v25  ;;  %v1098_v31 = vmul.f32 0.25, %v1066_v10  ;;  %v646_v16 = vsel %vm575_vm3, 0.0, %v627_v28 }
  0x50   : > { %v1350_v7 = vadd.f32 %v1318_v42, %v7811_v61  ;;  %v1129_v61 = vadd.f32 %v1097_v11, %v921_v18  ;;  %v1349_v42 = vadd.f32 %v1317_v62, %v7795_v55  ;;  %v1320_v30 = vmul.f32 0.75, %v7950_v39  ;;  %v8114_v11 = vld [vmem:[%s7612_s11 + $0x28] sm:$0xff]  }
  0x51   : > { %v1130_v32 = vadd.f32 %v1098_v31, %v922_v12  ;;  %v8052_v20 = vmul.f32 0.75, %v6503_v41  ;;  %v1180_v17 = vmul.f32 0.75, %v822_v53  ;;  %v8063_v55 = vmul.f32 0.75, %v6504_v19  ;;  %11675 = vst [vmem:[#allocation3_spill] sm:$0xff] %v8114_v11 }
  0x52   : > { %1767 = vrot.lane.b32.xlu1 %v7966_v38, %s7547_s23  ;;  %1719 = vrot.lane.b32.xlu0 %v7944_v29, %s7544_s16  ;;  %v1243_v39 = vadd.f32 %v8034_v6, %v1179_v13  ;;  %v1319_v41 = vmul.f32 0.75, %v7970_v58  ;;  %v1352_v49 = vadd.f32 %v1320_v30, %v7840_v34  ;;  %v8083_v58 = vmul.f32 0.75, %v7988_v48 }
  0x53   : > { %v8066_v18 = vpack.c.bf16 %v1130_v32, %v1129_v61  ;;  %v8071_v12 = vadd.f32 %v7799_v56, %v8052_v20  ;;  %v8075_v54 = vadd.f32 %v7803_v57, %v8063_v55  ;;  %v955_v34 = vsel %vm427_vm0, %v7988_v48, %v838_v0 }
  0x54   : > { %v1275_v57 = vsel %vm427_vm0, 0.0, %v1243_v39  ;;  %v1351_v28 = vadd.f32 %v1319_v41, %v7830_v22  ;;  %v8100_v62 = vmul.f32 0.75, %v7991_v63  ;;  %v1384_v0 = vsel %vm575_vm3, 0.0, %v1352_v49 }
  0x55   : > { %v791_v56 = vrot.slane %v8071_v12, 7  ;;  %v807_v47 = vrot.slane %v8075_v54, 7  ;;  %v8093_v23 = vmul.f32 0.25, %v8071_v12  ;;  %v988_v25 = vmul.f32 0.25, %v822_v53 }
  0x56   : > { %2743 = vrot.lane.b32.xlu1 %v7944_v29, %s7543_s15  ;;  %1721 = vrot.lane.b32.xlu0 %v7982_v8, %s7544_s16  ;;  %v987_v13 = vmul.f32 0.25, %v955_v34  ;;  %v1321_v31 = vmul.f32 0.75, %v885_v37  ;;  %v1412_v59 = vpack.c.bf16 %v1384_v0, %v1351_v28  ;;  %v870_v39 = vrot.slane %v7991_v63, 1 }
  0x57   : > { %v823_v43 = vsel %vm461_vm1, %v791_v56, %v807_v47 }
  0x58   : > { %v1182_v10 = vmul.f32 0.75, %v823_v43  ;;  %v1019_v37 = vadd.f32 %v987_v13, %v8083_v58  ;;  %v871_v13 = vrot.slane %v8075_v54, 1 }
  0x5a   : > { %2745 = vrot.lane.b32.xlu1 %v7982_v8, %s7543_s15  ;;  %2713 = vrot.lane.b32.xlu0 %v7920_v45, %s7545_s21  ;;  %v611_v45 = vsel %vm608_vm2, %v578_v27, %v594_v50  ;;  %v8057_v27 = vmul.f32 0.25, %v7991_v63  ;;  %v1382_v50 = vsel %vm575_vm3, 0.0, %v1350_v7 }
  0x5b   : > { %v675_v36 = vpack.c.bf16 %v646_v16, %v611_v45  ;;  %v1411_v44 = vpack.c.bf16 %v1382_v50, %v1349_v42  ;;  %v8121_v16 = vadd.f32 %v1321_v31, %v7928_v40  ;;  %v8142_v42 = vld [vmem:[%s7626_s14 + $0x20] sm:$0xff]   ;;  %v854_v50 = vrot.slane %v7988_v48, 1 }
  0x5c   : > { %v1244_v19 = vadd.f32 %v8057_v27, %v1180_v17  ;;  %v6507_v17 = vunpack.c.l.bf16 %v8142_v42  ;;  %v6508_v41 = vunpack.c.h.bf16 %v8142_v42 }
  0x5d   : > { %v8170_v48 = vsel %vm608_vm2, %v870_v39, %v854_v50 }
  0x5e   : > { %2777 = vrot.lane.b32.xlu1 %v1156_v24, %s7546_s22  ;;  %1769 = vrot.lane.b32.xlu0 %v1156_v24, %s7547_s23  ;;  %v839_v24 = vsel %vm461_vm1, %v807_v47, %v791_v56  ;;  %v1302_v22 = vpack.c.bf16 %v1244_v19, %v1275_v57  ;;  %v8163_v49 = vmul.f32 0.25, %v6507_v17  ;;  %v8166_v19 = vld [vmem:[%s7612_s11 + $0xa0] sm:$0xff]   ;;  %v8174_v56 = vmul.f32 0.25, %v6508_v41 }
  0x5f   : > { %v1181_v7 = vmul.f32 0.75, %v839_v24  ;;  %v925_v47 = vmul.f32 0.75, %v8071_v12  ;;  %v926_v57 = vmul.f32 0.75, %v8075_v54  ;;  %v957_v0 = vsel %vm427_vm0, %v8071_v12, %v839_v24 }
  0x60   : > { %v8197_v24 = vadd.f32 %v8163_v49, %v8052_v20 }
  0x61   : > { %v1245_v45 = vadd.f32 %v8093_v23, %v1181_v7  ;;  %v8183_v7 = vsel %vm608_vm2, %v854_v50, %v870_v39 }
  0x62   : > { %2825 = vrot.lane.b32.xlu1 %v676_v33, %s7544_s16  ;;  %2775 = vrot.lane.b32.xlu0 %v7966_v38, %s7546_s22  ;;  %v8096_v38 = vmul.f32 0.25, %v8075_v54  ;;  %v1322_v33 = vmul.f32 0.75, %v901_v60  ;;  %v1020_v60 = vadd.f32 %v988_v25, %v8100_v62  ;;  %v990_v25 = vmul.f32 0.25, %v823_v43 }
  0x63   : > { %v1068_v43 = vsel %vm575_vm3, %v7991_v63, %v8170_v48  ;;  %v7476_v63 = vld [vmem:[%s11598_s2 + $0x24] ss:$0 sps:$4 sm:$0x33]  }
  0x64   : > { %v8118_v53 = vadd.f32 %v8096_v38, %v1182_v10  ;;  %v1354_v46 = vadd.f32 %v1322_v33, %v7931_v14  ;;  %v8139_v14 = vld [vmem:[%s7612_s11 + $0x20] sm:$0xff]   ;;  %v8149_v32 = vpack.c.bf16 %v1020_v60, %v1019_v37  ;;  %v989_v10 = vmul.f32 0.25, %v957_v0  ;;  %v8200_v33 = vld [vmem:[%s7612_s11 + $0xa8] sm:$0xff]   ;;  %7432 = vmatprep.subr.msk.bf16.mxu0 %vm2035_vm4, %v7476_v63  ;;  %7435 = vmatprep.subr.msk.bf16.mxu1 %vm2035_vm4, %v7476_v63 }
  0x65   : > { %11676 = vst [vmem:[#allocation4_spill] sm:$0xff] %v8139_v14  ;;  %v1022_v31 = vadd.f32 %v990_v25, %v926_v57  ;;  %v550_v20 = vunpack.c.l.bf16 %v8139_v14  ;;  %v1099_v60 = vmul.f32 0.25, %v8183_v7  ;;  %v1100_v50 = vmul.f32 0.25, %v1068_v43 }
  0x66   : > { %1451 = vrot.lane.b32.xlu1 %v1301_v9, %s7545_s21  ;;  %2823 = vrot.lane.b32.xlu0 %v675_v36, %s7544_s16  ;;  %v8126_v9 = vsel %vm427_vm0, 0.0, %v1245_v45  ;;  %v8136_v40 = vsel %vm575_vm3, 0.0, %v1354_v46  ;;  %v552_v36 = vunpack.c.l.bf16 %v8114_v11  ;;  %v1021_v45 = vadd.f32 %v989_v10, %v925_v47 }
  0x67   : > { %v792_v0 = vrot.slane %v8197_v24, 7  ;;  %v2037_v10 = vsel %vm2035_vm4, %v7476_v63, 0  ;;  %v1131_v43 = vadd.f32 %v1099_v60, %v8083_v58  ;;  %v392_v63 = vunpack.c.l.bf16 %v7618_v2 }
  0x68   : > { %v581_v34 = vrot.slane %v552_v36, 1  ;;  %v8222_v39 = vpack.c.bf16 %v1022_v31, %v1021_v45  ;;  %6749 = vmatpush3.bf16.msra.mxu0 %v2037_v10  ;;  %6863 = vmatpush3.bf16.msra.mxu1 %v2037_v10  ;;  %v1324_v10 = vmul.f32 0.75, %v8170_v48 }
  0x6a   : > { %1453 = vrot.lane.b32.xlu1 %v1302_v22, %s7545_s21  ;;  %2871 = vrot.lane.b32.xlu0 %v1411_v44, %s7547_s23  ;;  %v553_v44 = vunpack.c.h.bf16 %v8114_v11  ;;  %v855_v22 = vrot.slane %v8071_v12, 1  ;;  %v8204_v12 = vadd.f32 %v8174_v56, %v8063_v55 }
  0x6c   : > { %v597_v28 = vrot.slane %v553_v44, 1  ;;  %v8210_v46 = vsel %vm608_vm2, %v871_v13, %v855_v22  ;;  %v808_v25 = vrot.slane %v8204_v12, 7 }
  0x6d   : > { %v1070_v55 = vsel %vm575_vm3, %v8075_v54, %v8210_v46 }
  0x6e   : > { %1565 = vrot.lane.b32.xlu1 %v8114_v11, %s7543_s15  ;;  %2873 = vrot.lane.b32.xlu0 %v1412_v59, %s7547_s23  ;;  %v551_v59 = vunpack.c.h.bf16 %v8139_v14  ;;  %v1102_v36 = vmul.f32 0.25, %v1070_v55  ;;  %v630_v31 = vsel %vm608_vm2, %v597_v28, %v581_v34  ;;  %v840_v58 = vsel %vm461_vm1, %v808_v25, %v792_v0 }
  0x6f   : > { %v8254_v55 = vmul.f32 0.75, %v6507_v17  ;;  %v824_v17 = vsel %vm461_vm1, %v792_v0, %v808_v25  ;;  %v8285_v0 = vmul.f32 0.25, %v8204_v12 }
  0x70   : > { %v1134_v54 = vadd.f32 %v1102_v36, %v926_v57  ;;  %v393_v57 = vunpack.c.h.bf16 %v7618_v2 }
  0x72   : > { %1613 = vrot.lane.b32.xlu1 %v8149_v32, %s7546_s22  ;;  %1563 = vrot.lane.b32.xlu0 %v8139_v14, %s7543_s15 }
  0x76   : > { %2715 = vrot.lane.b32.xlu1 %v8042_v35, %s7545_s21  ;;  %1611 = vrot.lane.b32.xlu0 %v8042_v35, %s7546_s22  ;;  %v887_v35 = vsel %vm608_vm2, %v855_v22, %v871_v13  ;;  %v580_v22 = vrot.slane %v550_v20, 1  ;;  %v596_v13 = vrot.slane %v551_v59, 1  ;;  %v614_v20 = vsel %vm608_vm2, %v581_v34, %v597_v28 }
  0x77   : > { %v1101_v37 = vmul.f32 0.25, %v887_v35  ;;  %v652_v59 = vsel %vm575_vm3, 0.0, %v630_v31  ;;  %v1183_v34 = vmul.f32 0.75, %v840_v58  ;;  %v8274_v28 = vadd.f32 %v7958_v26, %v8254_v55 }
  0x78   : > { %v629_v2 = vsel %vm608_vm2, %v596_v13, %v580_v22  ;;  %v678_v42 = vpack.c.bf16 %v652_v59, %v614_v20  ;;  %v1326_v31 = vmul.f32 0.75, %v8210_v46  ;;  %v1323_v46 = vmul.f32 0.75, %v8183_v7 }
  0x79   : > { %v1133_v44 = vadd.f32 %v1101_v37, %v925_v47  ;;  %v1132_v47 = vadd.f32 %v1100_v50, %v8100_v62  ;;  %v394_v62 = vunpack.c.l.bf16 %v7629_v4  ;;  %v395_v37 = vunpack.c.h.bf16 %v7629_v4 }
  0x7a   : > { %1771 = vrot.lane.b32.xlu1 %v8066_v18, %s7547_s23  ;;  %1723 = vrot.lane.b32.xlu0 %v8166_v19, %s7544_s16  ;;  %v8261_v50 = vmul.f32 0.75, %v6508_v41  ;;  %v8270_v4 = vmul.f32 0.25, %v8197_v24  ;;  %v613_v41 = vsel %vm608_vm2, %v580_v22, %v596_v13  ;;  %v793_v25 = vrot.slane %v8274_v28, 7 }
  0x7b   : > { %v8237_v45 = vpack.c.bf16 %v1134_v54, %v1133_v44  ;;  %v1158_v60 = vpack.c.bf16 %v1132_v47, %v1131_v43  ;;  %v650_v44 = vsel %vm575_vm3, 0.0, %v629_v2  ;;  %v11606_v26 = vrot.slane %v8274_v28, 1 }
  0x7c   : > { %v8280_v36 = vadd.f32 %v7962_v52, %v8261_v50  ;;  %v1184_v54 = vmul.f32 0.75, %v824_v17  ;;  %v8298_v43 = vmul.f32 0.25, %v8274_v28  ;;  %v677_v61 = vpack.c.bf16 %v650_v44, %v613_v41 }
  0x7d   : > { %v1358_v11 = vadd.f32 %v1326_v31, %v8096_v38  ;;  %v445_v41 = vrot.slane %v393_v57, 7  ;;  %v429_v44 = vrot.slane %v392_v63, 7  ;;  %v446_v38 = vrot.slane %v395_v37, 7 }
  0x7e   : > { %2747 = vrot.lane.b32.xlu1 %v8166_v19, %s7543_s15  ;;  %1725 = vrot.lane.b32.xlu0 %v8200_v33, %s7544_s16  ;;  %v809_v22 = vrot.slane %v8280_v36, 7  ;;  %v873_v13 = vrot.slane %v8280_v36, 1  ;;  %v1218_v47 = vmul.f32 0.25, %v8280_v36 }
  0x7f   : > { %v8349_v57 = vsel %vm575_vm3, 0.0, %v1358_v11 }
  0x80   : > { %v8304_v48 = vsel %vm461_vm1, %v793_v25, %v809_v22  ;;  %v841_v20 = vsel %vm461_vm1, %v809_v22, %v793_v25  ;;  %v8314_v59 = vsel %vm608_vm2, %v873_v13, %v11606_v26  ;;  %v1248_v25 = vadd.f32 %v8285_v0, %v1184_v54 }
  0x81   : > { %v1185_v2 = vmul.f32 0.75, %v841_v20  ;;  %v1330_v30 = vmul.f32 0.75, %v8314_v59  ;;  %v1356_v22 = vadd.f32 %v1324_v10, %v8057_v27  ;;  %v430_v54 = vrot.slane %v394_v62, 7 }
  0x82   : > { %2749 = vrot.lane.b32.xlu1 %v8200_v33, %s7543_s15  ;;  %2717 = vrot.lane.b32.xlu0 %v8149_v32, %s7545_s21  ;;  %v1325_v32 = vmul.f32 0.75, %v887_v35  ;;  %v1247_v35 = vadd.f32 %v8270_v4, %v1183_v34  ;;  %v1186_v34 = vmul.f32 0.75, %v8304_v48  ;;  %v959_v27 = vsel %vm427_vm0, %v8197_v24, %v840_v58 }
  0x83   : > { %v1249_v7 = vadd.f32 %v8298_v43, %v1185_v2  ;;  %v8333_v26 = vadd.f32 %v1330_v30, %v1218_v47  ;;  %v1355_v10 = vadd.f32 %v1323_v46, %v8034_v6  ;;  %v8352_v58 = vmul.f32 0.75, %v8197_v24  ;;  %v8369_v46 = vld [vmem:[%s7612_s11 + $0x38] sm:$0xff]  }
  0x84   : > { %v8355_v62 = vmul.f32 0.75, %v8204_v12  ;;  %v11677_v6 = vpack.c.bf16 %v8118_v53, %v8126_v9  ;;  %v1388_v11 = vsel %vm575_vm3, 0.0, %v1356_v22  ;;  %11678 = vst [vmem:[#allocation5_spill] sm:$0xff] %v8369_v46  ;;  %v478_v2 = vsel %vm461_vm1, %v445_v41, %v429_v44 }
  0x85   : > { %v8294_v52 = vpop.permute.xlu1 %1555  ;;  %v8345_v30 = vsel %vm427_vm0, 0.0, %v1249_v7  ;;  %v11680_v53 = vpack.c.bf16 %v8136_v40, %v8121_v16  ;;  %v556_v7 = vunpack.c.l.bf16 %v8369_v46  ;;  %v494_v16 = vsel %vm427_vm0, 0.0, %v478_v2 }
  0x86   : > { %2781 = vrot.lane.b32.xlu1 %v1158_v60, %s7546_s22  ;;  %1773 = vrot.lane.b32.xlu0 %v1158_v60, %s7547_s23  ;;  %v8317_v60 = vadd.f32 %v1325_v32, %v8093_v23  ;;  %v1279_v23 = vsel %vm427_vm0, 0.0, %v1247_v35  ;;  %v8331_v32 = vadd.f32 %v1218_v47, %v1186_v34  ;;  %v991_v35 = vmul.f32 0.25, %v959_v27 }
  0x87   : > { %v1304_v63 = vpack.c.bf16 %v1248_v25, %v1279_v23  ;;  %v992_v47 = vmul.f32 0.25, %v824_v17  ;;  %v1414_v34 = vpack.c.bf16 %v1388_v11, %v1355_v10  ;;  %v8374_v25 = vld [vmem:[%s7612_s11 + $0x30] sm:$0xff]   ;;  %v479_v23 = vsel %vm461_vm1, %v446_v38, %v430_v54 }
  0x88   : > { %11679 = vst [vmem:[#allocation6_spill] sm:$0xff] %v8374_v25  ;;  %v1023_v17 = vadd.f32 %v991_v35, %v8352_v58  ;;  %v462_v27 = vsel %vm461_vm1, %v429_v44, %v445_v41  ;;  %v463_v40 = vsel %vm461_vm1, %v430_v54, %v446_v38  ;;  %v856_v10 = vrot.slane %v8197_v24, 1 }
  0x89   : > { %v1024_v22 = vadd.f32 %v992_v47, %v8355_v62  ;;  %v496_v11 = vsel %vm427_vm0, 0.0, %v479_v23  ;;  %v929_v35 = vmul.f32 0.75, %v8274_v28  ;;  %v930_v47 = vmul.f32 0.75, %v8280_v36 }
  0x8a   : > { %2829 = vrot.lane.b32.xlu1 %v678_v42, %s7544_s16  ;;  %2779 = vrot.lane.b32.xlu0 %v8066_v18, %s7546_s22  ;;  %v8338_v42 = vpop.permute.xlu0 %1715  ;;  %v8340_v18 = vpop.permute.xlu1 %1557  ;;  %v961_v41 = vsel %vm427_vm0, %v8274_v28, %v841_v20  ;;  %v994_v54 = vmul.f32 0.25, %v8304_v48  ;;  %v11681_v38 = vrot.slane %v8274_v28, 1  ;;  %v526_v31 = vpack.c.bf16 %v462_v27, %v494_v16 }
  0x8b   : > { %v8411_v24 = vpack.c.bf16 %v1024_v22, %v1023_v17  ;;  %v993_v44 = vmul.f32 0.25, %v961_v41 }
  0x8c   : > { %v8420_v2 = vsel %vm608_vm2, %v11681_v38, %v873_v13  ;;  %v1026_v23 = vadd.f32 %v994_v54, %v930_v47  ;;  %v557_v38 = vunpack.c.h.bf16 %v8369_v46 }
  0x8d   : > { %v1105_v17 = vmul.f32 0.25, %v8420_v2  ;;  %v1025_v13 = vadd.f32 %v993_v44, %v929_v35  ;;  %v8444_v44 = vld [vmem:[%s7612_s11 + $0xb0] sm:$0xff]  }
  0x8e   : > { %1455 = vrot.lane.b32.xlu1 %v11677_v6, %s7545_s21  ;;  %2827 = vrot.lane.b32.xlu0 %v677_v61, %s7544_s16  ;;  %v8381_v9 = vpop.permute.xlu0 %1717  ;;  %v8383_v61 = vpop.permute.xlu1 %2739  ;;  %v8399_v6 = vld [vmem:[%s7626_s14 + $0x28] sm:$0xff]   ;;  %11682 = vst [vmem:[#allocation7_spill] sm:$0xff] %v8444_v44 }
  0x8f   : > { %v6511_v20 = vunpack.c.l.bf16 %v8399_v6  ;;  %v1137_v37 = vadd.f32 %v1105_v17, %v929_v35 }
  0x91   : > { %v8454_v16 = vmul.f32 0.25, %v6511_v20 }
  0x92   : > { %1457 = vrot.lane.b32.xlu1 %v1304_v63, %s7545_s21  ;;  %2875 = vrot.lane.b32.xlu0 %v11680_v53, %s7547_s23  ;;  %v872_v63 = vrot.slane %v8204_v12, 1  ;;  %v6512_v53 = vunpack.c.h.bf16 %v8399_v6  ;;  %v396_v6 = vunpack.c.l.bf16 %v7944_v29 }
  0x94   : > { %v8433_v28 = vsel %vm608_vm2, %v872_v63, %v856_v10  ;;  %v8448_v54 = vsel %vm608_vm2, %v856_v10, %v872_v63  ;;  %v8456_v35 = vmul.f32 0.25, %v6512_v53  ;;  %v599_v63 = vrot.slane %v557_v38, 1 }
  0x95   : > { %v1072_v27 = vsel %vm575_vm3, %v8204_v12, %v8433_v28  ;;  %v554_v12 = vunpack.c.l.bf16 %v8374_v25 }
  0x96   : > { %1569 = vrot.lane.b32.xlu1 %v8369_v46, %s7543_s15  ;;  %2877 = vrot.lane.b32.xlu0 %v1414_v34, %s7547_s23  ;;  %v1074_v34 = vsel %vm575_vm3, %v8280_v36, %v8314_v59  ;;  %v527_v36 = vpack.c.bf16 %v463_v40, %v496_v11  ;;  %v8441_v59 = vpack.c.bf16 %v1026_v23, %v1025_v13  ;;  %v397_v40 = vunpack.c.h.bf16 %v7944_v29  ;;  %v8472_v29 = vld [vmem:[%s7612_s11 + $0xb8] sm:$0xff]  }
  0x97   : > { %v1106_v41 = vmul.f32 0.25, %v1074_v34  ;;  %11683 = vst [vmem:[#allocation8_spill] sm:$0xff] %v8472_v29  ;;  %v399_v11 = vunpack.c.h.bf16 %v7982_v8 }
  0x98   : > { %v1444_v48 = vpop.permute.xlu0 %1443  ;;  %v8429_v22 = vpop.permute.xlu1 %1605 }
  0x99   : > { %v1138_v14 = vadd.f32 %v1106_v41, %v930_v47  ;;  %v583_v47 = vrot.slane %v556_v7, 1  ;;  %v1798_v13 = vsel %vm1795_vm5, %v526_v31, %v1444_v48  ;;  %v1103_v7 = vmul.f32 0.25, %v8448_v54 }
  0x9a   : > { %1617 = vrot.lane.b32.xlu1 %v8411_v24, %s7546_s22  ;;  %1567 = vrot.lane.b32.xlu0 %v8374_v25, %s7543_s15  ;;  %v8478_v31 = vadd.f32 %v8454_v16, %v8254_v55  ;;  %v8482_v48 = vadd.f32 %v8456_v35, %v8261_v50 }
  0x9b   : > { %v8462_v10 = vpack.c.bf16 %v1138_v14, %v1137_v37  ;;  %v1104_v14 = vmul.f32 0.25, %v1072_v27  ;;  %v555_v37 = vunpack.c.h.bf16 %v8374_v25  ;;  %v632_v55 = vsel %vm608_vm2, %v599_v63, %v583_v47 }
  0x9c   : > { %v1446_v34 = vpop.permute.xlu0 %1445  ;;  %v8460_v17 = vpop.permute.xlu1 %2707 }
  0x9d   : > { %v1801_v23 = vsel %vm1795_vm5, %v527_v36, %v1446_v34  ;;  %v1136_v34 = vadd.f32 %v1104_v14, %v8355_v62  ;;  %v1329_v62 = vmul.f32 0.75, %v8420_v2  ;;  %v582_v14 = vrot.slane %v554_v12, 1 }
  0x9e   : > { %2719 = vrot.lane.b32.xlu1 %v8222_v39, %s7545_s21  ;;  %1615 = vrot.lane.b32.xlu0 %v8222_v39, %s7546_s22  ;;  %v1846_v39 = vsel %vm1844_vm6, %v1798_v13, %v8294_v52  ;;  %v1848_v36 = vsel %vm1844_vm6, %v1801_v23, %v8340_v18  ;;  %v1135_v52 = vadd.f32 %v1103_v7, %v8352_v58  ;;  %v8499_v13 = vmul.f32 0.75, %v6511_v20 }
  0x9f   : > { %v794_v23 = vrot.slane %v8478_v31, 7  ;;  %v1881_v58 = vsel %vm1877_vm7, %v1848_v36, %v8429_v22  ;;  %v447_v7 = vrot.slane %v397_v40, 7  ;;  %v616_v2 = vsel %vm608_vm2, %v583_v47, %v599_v63 }
  0xa0   : > { %v1604_v41 = vpop.permute.xlu0 %1603  ;;  %v1764_v38 = vpop.permute.xlu1 %1763  ;;  %v8520_v20 = vadd.f32 %v8163_v49, %v8499_v13  ;;  %v656_v49 = vsel %vm575_vm3, 0.0, %v632_v55  ;;  %v8549_v63 = vadd.f32 %v1329_v62, %v8298_v43 }
  0xa1   : > { %v1879_v27 = vsel %vm1877_vm7, %v1846_v39, %v1604_v41  ;;  %v810_v41 = vrot.slane %v8482_v48, 7  ;;  %v8506_v39 = vmul.f32 0.75, %v6512_v53  ;;  %v431_v53 = vrot.slane %v396_v6, 7 }
  0xa2   : > { %1775 = vrot.lane.b32.xlu1 %v8237_v45, %s7547_s23  ;;  %1727 = vrot.lane.b32.xlu0 %v8444_v44, %s7544_s16  ;;  %v1912_v50 = vsel %vm1910_vm8, %v1879_v27, %v8338_v42  ;;  %v598_v27 = vrot.slane %v555_v37, 1  ;;  %v795_v22 = vrot.slane %v8520_v20, 7  ;;  %v1914_v6 = vsel %vm1910_vm8, %v1881_v58, %v8381_v9 }
  0xa3   : > { %v8502_v18 = vsel %vm1943_vm9, %v1912_v50, %v1764_v38  ;;  %v8524_v38 = vadd.f32 %v8174_v56, %v8506_v39  ;;  %v1160_v56 = vpack.c.bf16 %v1136_v34, %v1135_v52  ;;  %v842_v40 = vsel %vm461_vm1, %v810_v41, %v794_v23 }
  0xa4   : > { %11684 = vst [vmem:[#allocation9_spill] sm:$0xff] %v8502_v18  ;;  %v8509_v46 = vpop.permute.xlu0 %2709  ;;  %6750 = vmatprep.mubr.msk.bf16.mxu0 %vm2002_vm10, %v8502_v18  ;;  %v8513_v42 = vpop.permute.xlu1 %2741  ;;  %v8543_v50 = vmul.f32 0.25, %v8520_v20  ;;  %v8554_v9 = vsel %vm575_vm3, 0.0, %v8333_v26  ;;  %v8560_v52 = vmul.f32 0.25, %v8478_v31  ;;  %v826_v26 = vsel %vm461_vm1, %v794_v23, %v810_v41 }
  0xa5   : > { %v811_v12 = vrot.slane %v8524_v38, 7  ;;  %v8546_v47 = vmul.f32 0.25, %v8524_v38  ;;  %v1187_v43 = vmul.f32 0.75, %v842_v40  ;;  %v1188_v51 = vmul.f32 0.75, %v826_v26 }
  0xa6   : > { %2751 = vrot.lane.b32.xlu1 %v8444_v44, %s7543_s15  ;;  %1729 = vrot.lane.b32.xlu0 %v8472_v29, %s7544_s16  ;;  %v680_v44 = vpack.c.bf16 %v656_v49, %v616_v2  ;;  %v2901_v2 = vsel %vm1795_vm5, %v7615_v1, %v8460_v17  ;;  %v1328_v49 = vmul.f32 0.75, %v8433_v28 }
  0xa7   : > { %v827_v34 = vsel %vm461_vm1, %v795_v22, %v811_v12  ;;  %v843_v58 = vsel %vm461_vm1, %v811_v12, %v795_v22  ;;  %v11686_v12 = vunpack.c.l.bf16 %v7982_v8  ;;  %v8591_v22 = vmul.f32 0.25, %v8482_v48 }
  0xa8   : > { %v1766_v37 = vpop.permute.xlu0 %1765  ;;  %v8540_v36 = vpop.permute.xlu1 %2773  ;;  %v1189_v62 = vmul.f32 0.75, %v843_v58  ;;  %v615_v8 = vsel %vm608_vm2, %v582_v14, %v598_v27 }
  0xa9   : > { %v8557_v55 = vsel %vm1943_vm9, %v1914_v6, %v1766_v37  ;;  %v1190_v6 = vmul.f32 0.75, %v827_v34  ;;  %v631_v37 = vsel %vm608_vm2, %v598_v27, %v582_v14  ;;  %v8580_v18 = vrot.slane %v11686_v12, 7 }
  0xaa   : > { %11685 = vst [vmem:[#allocation10_spill] sm:$0xff] %v8557_v55  ;;  %2753 = vrot.lane.b32.xlu1 %v8472_v29, %s7543_s15  ;;  %6751 = vmatmul.mubr.msk.bf16.vlgmr.msra.gmra.mrb[0].mxu0 %vm2002_vm10, %v8557_v55  ;;  %v8582_v55 = vrot.slane %v399_v11, 7  ;;  %v1253_v41 = vadd.f32 %v8543_v50, %v1189_v62  ;;  %v654_v11 = vsel %vm575_vm3, 0.0, %v631_v37  ;;  %v1251_v62 = vadd.f32 %v8560_v52, %v1187_v43 }
  0xab   : > { %2721 = vrot.lane.b32.xlu0 %v8411_v24, %s7545_s21  ;;  %v8586_v29 = vadd.f32 %v8546_v47, %v1190_v6  ;;  %v480_v24 = vsel %vm461_vm1, %v447_v7, %v431_v53  ;;  %v8612_v27 = vsel %vm461_vm1, %v431_v53, %v447_v7  ;;  %v679_v28 = vpack.c.bf16 %v654_v11, %v615_v8 }
  0xac   : > { %v2772_v25 = vpop.permute.xlu0 %2771  ;;  %v2822_v23 = vpop.permute.xlu1 %2821  ;;  %v8601_v6 = vsel %vm427_vm0, 0.0, %v1253_v41  ;;  %v8616_v43 = vsel %vm427_vm0, 0.0, %v480_v24  ;;  %v481_v1 = vsel %vm461_vm1, %v8582_v55, %v8580_v18  ;;  %v1252_v17 = vadd.f32 %v8591_v22, %v1188_v51 }
  0xad   : > { %v2948_v53 = vsel %vm1844_vm6, %v2901_v2, %v8383_v61  ;;  %v1283_v7 = vsel %vm427_vm0, 0.0, %v1251_v62  ;;  %v8632_v41 = vmul.f32 0.75, %v8478_v31  ;;  %v963_v24 = vsel %vm427_vm0, %v8478_v31, %v842_v40  ;;  %v8651_v40 = vld [vmem:[%s7612_s11 + $0x48] sm:$0xff]  }
  0xae   : > { %2785 = vrot.lane.b32.xlu1 %v1160_v56, %s7546_s22  ;;  %v2904_v51 = vsel %vm1795_vm5, %v7621_v3, %v8509_v46  ;;  %v1360_v61 = vadd.f32 %v1328_v49, %v8285_v0  ;;  %11687 = vst [vmem:[#allocation11_spill] sm:$0xff] %v8651_v40  ;;  %v933_v2 = vmul.f32 0.75, %v8520_v20  ;;  %v934_v3 = vmul.f32 0.75, %v8524_v38 }
  0xaf   : > { %1777 = vrot.lane.b32.xlu0 %v1160_v56, %s7547_s23  ;;  %v1327_v56 = vmul.f32 0.75, %v8448_v54  ;;  %v2980_v54 = vsel %vm1877_vm7, %v2948_v53, %v2772_v25  ;;  %v1306_v46 = vpack.c.bf16 %v1252_v17, %v1283_v7  ;;  %v995_v25 = vmul.f32 0.25, %v963_v24 }
  0xb0   : > { %v8618_v37 = vpop.permute.xlu1 %1447  ;;  %v2820_v12 = vpop.permute.xlu0 %2819  ;;  %v996_v49 = vmul.f32 0.25, %v826_v26  ;;  %v11689_v53 = vpack.c.bf16 %v8331_v32, %v8345_v30  ;;  %v998_v14 = vmul.f32 0.25, %v827_v34  ;;  %v1392_v34 = vsel %vm575_vm3, 0.0, %v1360_v61 }
  0xb1   : > { %v3012_v8 = vsel %vm1910_vm8, %v2980_v54, %v2820_v12  ;;  %v2950_v12 = vsel %vm1844_vm6, %v2904_v51, %v8513_v42  ;;  %v1359_v26 = vadd.f32 %v1327_v56, %v8270_v4  ;;  %v875_v42 = vrot.slane %v8524_v38, 1 }
  0xb2   : > { %2833 = vrot.lane.b32.xlu1 %v680_v44, %s7544_s16  ;;  %v8645_v44 = vmul.f32 0.75, %v8482_v48  ;;  %v2982_v17 = vsel %vm1877_vm7, %v2950_v12, %v8540_v36  ;;  %v1027_v36 = vadd.f32 %v995_v25, %v8632_v41  ;;  %v8711_v12 = vld [vmem:[%s7612_s11 + $0x40] sm:$0xff]  }
  0xb3   : > { %2783 = vrot.lane.b32.xlu0 %v8237_v45, %s7546_s22  ;;  %v965_v45 = vsel %vm427_vm0, %v8520_v20, %v843_v58  ;;  %v859_v58 = vrot.slane %v8520_v20, 1  ;;  %v3014_v7 = vsel %vm1910_vm8, %v2982_v17, %v2822_v23  ;;  %v1030_v20 = vadd.f32 %v998_v14, %v934_v3  ;;  %11692 = vst [vmem:[#allocation14_spill] sm:$0xff] %v8711_v12 }
  0xb4   : > { %v8648_v11 = vpop.permute.xlu1 %1449  ;;  %v2868_v62 = vpop.permute.xlu0 %2867  ;;  %v997_v54 = vmul.f32 0.25, %v965_v45  ;;  %v1028_v14 = vadd.f32 %v996_v49, %v8645_v44  ;;  %v6526_v45 = vld [vmem:[%s7626_s14 + $0x30] sm:$0xff]  }
  0xb5   : > { %v8659_v0 = vsel %vm1943_vm9, %v3012_v8, %v2868_v62  ;;  %v8686_v4 = vsel %vm608_vm2, %v859_v58, %v875_v42  ;;  %v8690_v23 = vsel %vm608_vm2, %v875_v42, %v859_v58  ;;  %v11691_v8 = vpack.c.bf16 %v8349_v57, %v8317_v60 }
  0xb6   : > { %11688 = vst [vmem:[#allocation12_spill] sm:$0xff] %v8659_v0  ;;  %1459 = vrot.lane.b32.xlu1 %v11689_v53, %s7545_s21  ;;  %6864 = vmatprep.mubr.msk.bf16.mxu1 %vm2002_vm10, %v8659_v0  ;;  %v1029_v24 = vadd.f32 %v997_v54, %v933_v2  ;;  %v1078_v56 = vsel %vm575_vm3, %v8524_v38, %v8690_v23  ;;  %v1109_v61 = vmul.f32 0.25, %v8686_v4  ;;  %v500_v60 = vsel %vm427_vm0, 0.0, %v481_v1 }
  0xb7   : > { %2831 = vrot.lane.b32.xlu0 %v679_v28, %s7544_s16  ;;  %v1416_v62 = vpack.c.bf16 %v1392_v34, %v1359_v26  ;;  %v528_v54 = vpack.c.bf16 %v8612_v27, %v8616_v43  ;;  %v465_v38 = vsel %vm461_vm1, %v8580_v18, %v8582_v55  ;;  %v560_v58 = vunpack.c.l.bf16 %v8651_v40 }
  0xb8   : > { %v8676_v32 = vpop.permute.xlu1 %1561  ;;  %v2870_v30 = vpop.permute.xlu0 %2869  ;;  %v8696_v28 = vpack.c.bf16 %v1030_v20, %v1029_v24  ;;  %v1141_v53 = vadd.f32 %v1109_v61, %v933_v2  ;;  %v8724_v17 = vpack.c.bf16 %v1028_v14, %v1027_v36  ;;  %v6515_v2 = vunpack.c.l.bf16 %v6526_v45 }
  0xb9   : > { %v8681_v51 = vsel %vm1943_vm9, %v3014_v7, %v2870_v30  ;;  %v6516_v26 = vunpack.c.h.bf16 %v6526_v45  ;;  %v858_v27 = vrot.slane %v8478_v31, 1  ;;  %v874_v43 = vrot.slane %v8482_v48, 1  ;;  %v8760_v45 = vld [vmem:[%s7612_s11 + $0xc0] sm:$0xff]  }
  0xba   : > { %11690 = vst [vmem:[#allocation13_spill] sm:$0xff] %v8681_v51  ;;  %1461 = vrot.lane.b32.xlu1 %v1306_v46, %s7545_s21  ;;  %6865 = vmatmul.mubr.msk.bf16.vlgmr.msra.gmra.mrb[0].mxu1 %vm2002_vm10, %v8681_v51  ;;  %v1110_v46 = vmul.f32 0.25, %v1078_v56  ;;  %v561_v55 = vunpack.c.h.bf16 %v8651_v40  ;;  %v529_v42 = vpack.c.bf16 %v465_v38, %v500_v60  ;;  %v1804_v7 = vsel %vm1795_vm5, %v528_v54, %v8618_v37 }
  0xbb   : > { %2879 = vrot.lane.b32.xlu0 %v11691_v8, %s7547_s23  ;;  %v8736_v30 = vrot.slane %v560_v58, 1  ;;  %v8740_v31 = vmul.f32 0.25, %v6515_v2  ;;  %v8742_v34 = vmul.f32 0.25, %v6516_v26  ;;  %v8746_v24 = vsel %vm608_vm2, %v874_v43, %v858_v27 }
  0xbc   : > { %v8708_v25 = vpop.permute.xlu1 %1609  ;;  %v1560_v49 = vpop.permute.xlu0 %1559  ;;  %v1142_v57 = vadd.f32 %v1110_v46, %v934_v3  ;;  %v8751_v36 = vmul.f32 0.75, %v6515_v2  ;;  %v8753_v37 = vmul.f32 0.75, %v6516_v26  ;;  %v8755_v14 = vrot.slane %v561_v55, 1 }
  0xbd   : > { %v1850_v20 = vsel %vm1844_vm6, %v1804_v7, %v1560_v49  ;;  %v558_v61 = vunpack.c.l.bf16 %v8711_v12  ;;  %v8764_v46 = vsel %vm608_vm2, %v858_v27, %v874_v43  ;;  %v559_v49 = vunpack.c.h.bf16 %v8711_v12  ;;  %v8803_v27 = vld [vmem:[%s7612_s11 + $0xc8] sm:$0xff]  }
  0xbe   : > { %1573 = vrot.lane.b32.xlu1 %v8651_v40, %s7543_s15  ;;  %v8729_v18 = vpack.c.bf16 %v1142_v57, %v1141_v53  ;;  %v8770_v54 = vadd.f32 %v8454_v16, %v8751_v36  ;;  %v8774_v38 = vadd.f32 %v8456_v35, %v8753_v37  ;;  %v1076_v57 = vsel %vm575_vm3, %v8482_v48, %v8746_v24 }
  0xbf   : > { %2881 = vrot.lane.b32.xlu0 %v1416_v62, %s7547_s23  ;;  %v8787_v58 = vadd.f32 %v8740_v31, %v8499_v13  ;;  %v8791_v16 = vadd.f32 %v8742_v34, %v8506_v39  ;;  %v1107_v35 = vmul.f32 0.25, %v8764_v46  ;;  %v1334_v55 = vmul.f32 0.75, %v8690_v23 }
  0xc0   : > { %v8732_v1 = vpop.permute.xlu1 %2711  ;;  %v1608_v3 = vpop.permute.xlu0 %1607  ;;  %v797_v2 = vrot.slane %v8770_v54, 7  ;;  %v813_v48 = vrot.slane %v8774_v38, 7  ;;  %v8806_v39 = vmul.f32 0.25, %v8770_v54  ;;  %v8809_v43 = vmul.f32 0.25, %v8774_v38 }
  0xc1   : > { %v1883_v56 = vsel %vm1877_vm7, %v1850_v20, %v1608_v3  ;;  %v1807_v3 = vsel %vm1795_vm5, %v529_v42, %v8648_v11  ;;  %v1108_v7 = vmul.f32 0.25, %v1076_v57  ;;  %v584_v42 = vrot.slane %v558_v61, 1 }
  0xc2   : > { %1621 = vrot.lane.b32.xlu1 %v8724_v17, %s7546_s22  ;;  %v8817_v20 = vsel %vm461_vm1, %v797_v2, %v813_v48  ;;  %v1852_v57 = vsel %vm1844_vm6, %v1807_v3, %v8676_v32 }
  0xc3   : > { %1571 = vrot.lane.b32.xlu0 %v8711_v12, %s7543_s15  ;;  %v1194_v11 = vmul.f32 0.75, %v8817_v20  ;;  %v1140_v32 = vadd.f32 %v1108_v7, %v8645_v44  ;;  %v1885_v3 = vsel %vm1877_vm7, %v1852_v57, %v8708_v25  ;;  %v8884_v44 = vmul.f32 0.25, %v8787_v58 }
  0xc4   : > { %v1768_v8 = vpop.permute.xlu1 %1767  ;;  %v1720_v62 = vpop.permute.xlu0 %1719 }
  0xc5   : > { %v1916_v53 = vsel %vm1910_vm8, %v1883_v56, %v1720_v62  ;;  %v8821_v56 = vsel %vm461_vm1, %v813_v48, %v797_v2  ;;  %v600_v2 = vrot.slane %v559_v49, 1  ;;  %v8843_v61 = vadd.f32 %v8809_v43, %v1194_v11 }
  0xc6   : > { %2723 = vrot.lane.b32.xlu1 %v8441_v59, %s7545_s21  ;;  %v8779_v60 = vsel %vm1943_vm9, %v1916_v53, %v1768_v8  ;;  %v796_v8 = vrot.slane %v8787_v58, 7  ;;  %v1193_v23 = vmul.f32 0.75, %v8821_v56  ;;  %v1366_v53 = vadd.f32 %v1334_v55, %v8546_v47 }
  0xc7   : > { %11693 = vst [vmem:[#allocation15_spill] sm:$0xff] %v8779_v60  ;;  %1619 = vrot.lane.b32.xlu0 %v8441_v59, %s7546_s22  ;;  %6754 = vmatprep.mubr.msk.bf16.mxu0 %vm2002_vm10, %v8779_v60  ;;  %v1333_v59 = vmul.f32 0.75, %v8686_v4  ;;  %v812_v4 = vrot.slane %v8791_v16, 7  ;;  %v400_v60 = vunpack.c.l.bf16 %v8166_v19  ;;  %v1139_v47 = vadd.f32 %v1107_v35, %v8632_v41 }
  0xc8   : > { %v8800_v26 = vpop.permute.xlu1 %2743  ;;  %v1722_v13 = vpop.permute.xlu0 %1721  ;;  %v1257_v0 = vadd.f32 %v8806_v39, %v1193_v23  ;;  %v401_v55 = vunpack.c.h.bf16 %v8166_v19  ;;  %v402_v35 = vunpack.c.l.bf16 %v8200_v33  ;;  %v634_v19 = vsel %vm608_vm2, %v8755_v14, %v8736_v30 }
  0xc9   : > { %v8832_v62 = vadd.f32 %v1333_v59, %v8543_v50  ;;  %v8848_v50 = vsel %vm575_vm3, 0.0, %v1366_v53  ;;  %v844_v49 = vsel %vm461_vm1, %v812_v4, %v796_v8  ;;  %v1918_v7 = vsel %vm1910_vm8, %v1885_v3, %v1722_v13 }
  0xca   : > { %1779 = vrot.lane.b32.xlu1 %v8462_v10, %s7547_s23  ;;  %v8858_v59 = vsel %vm427_vm0, 0.0, %v1257_v0  ;;  %v633_v25 = vsel %vm608_vm2, %v600_v2, %v584_v42  ;;  %v403_v11 = vunpack.c.h.bf16 %v8200_v33  ;;  %v1191_v57 = vmul.f32 0.75, %v844_v49 }
  0xcb   : > { %1731 = vrot.lane.b32.xlu0 %v8760_v45, %s7544_s16  ;;  %v1332_v13 = vmul.f32 0.75, %v8746_v24  ;;  %v1162_v3 = vpack.c.bf16 %v1140_v32, %v1139_v47  ;;  %v828_v41 = vsel %vm461_vm1, %v796_v8, %v812_v4  ;;  %v618_v33 = vsel %vm608_vm2, %v8736_v30, %v8755_v14 }
  0xcc   : > { %v8837_v48 = vpop.permute.xlu1 %2745  ;;  %v8839_v51 = vpop.permute.xlu0 %2713  ;;  %v660_v24 = vsel %vm575_vm3, 0.0, %v634_v19  ;;  %v658_v47 = vsel %vm575_vm3, 0.0, %v633_v25  ;;  %v8905_v32 = vrot.slane %v400_v60, 7  ;;  %v8907_v8 = vrot.slane %v401_v55, 7 }
  0xcd   : > { %v8909_v4 = vrot.slane %v402_v35, 7  ;;  %v1192_v30 = vmul.f32 0.75, %v828_v41  ;;  %v8914_v14 = vmul.f32 0.25, %v8791_v16  ;;  %v1255_v19 = vadd.f32 %v8884_v44, %v1191_v57 }
  0xce   : > { %2755 = vrot.lane.b32.xlu1 %v8760_v45, %s7543_s15  ;;  %v682_v60 = vpack.c.bf16 %v660_v24, %v618_v33  ;;  %v937_v35 = vmul.f32 0.75, %v8770_v54  ;;  %v938_v25 = vmul.f32 0.75, %v8774_v38  ;;  %v1002_v57 = vmul.f32 0.25, %v8817_v20 }
  0xcf   : > { %1733 = vrot.lane.b32.xlu0 %v8803_v27, %s7544_s16  ;;  %v877_v24 = vrot.slane %v8774_v38, 1  ;;  %v1287_v20 = vsel %vm427_vm0, 0.0, %v1255_v19 }
  0xd0   : > { %v8871_v0 = vpop.permute.xlu1 %2777  ;;  %v1770_v23 = vpop.permute.xlu0 %1769 }
  0xd1   : > { %v8881_v53 = vsel %vm1943_vm9, %v1918_v7, %v1770_v23  ;;  %v617_v7 = vsel %vm608_vm2, %v584_v42, %v600_v2  ;;  %v1364_v42 = vadd.f32 %v1332_v13, %v8591_v22  ;;  %v1331_v2 = vmul.f32 0.75, %v8764_v46 }
  0xd2   : > { %11694 = vst [vmem:[#allocation16_spill] sm:$0xff] %v8881_v53  ;;  %2757 = vrot.lane.b32.xlu1 %v8803_v27, %s7543_s15  ;;  %6755 = vmatmul.mubr.msk.bf16.gmra.mrb[4].mxu0 %vm2002_vm10, %v8881_v53  ;;  %v8911_v53 = vrot.slane %v403_v11, 7  ;;  %v681_v55 = vpack.c.bf16 %v658_v47, %v617_v7  ;;  %v969_v11 = vsel %vm427_vm0, %v8770_v54, %v8821_v56 }
  0xd3   : > { %2725 = vrot.lane.b32.xlu0 %v8724_v17, %s7545_s21  ;;  %v967_v13 = vsel %vm427_vm0, %v8787_v58, %v844_v49  ;;  %v1001_v33 = vmul.f32 0.25, %v969_v11  ;;  %v2907_v7 = vsel %vm1795_vm5, %v7894_v21, %v8732_v1  ;;  %v1256_v56 = vadd.f32 %v8914_v14, %v1192_v30  ;;  %v11695_v21 = vld [vmem:[#allocation2_spill] sm:$0xff] }
  0xd4   : > { %v2826_v17 = vpop.permute.xlu1 %2825  ;;  %v2776_v23 = vpop.permute.xlu0 %2775  ;;  %v1034_v47 = vadd.f32 %v1002_v57, %v938_v25  ;;  %v2952_v40 = vsel %vm1844_vm6, %v2907_v7, %v8800_v26  ;;  %v2910_v1 = vsel %vm1795_vm5, %v11695_v21, %v8839_v51  ;;  %v8967_v51 = vmul.f32 0.75, %v8787_v58 }
  0xd5   : > { %v1033_v49 = vadd.f32 %v1001_v33, %v937_v35  ;;  %v2984_v30 = vsel %vm1877_vm7, %v2952_v40, %v2776_v23  ;;  %v11697_v7 = vpack.c.bf16 %v8586_v29, %v8601_v6  ;;  %v999_v21 = vmul.f32 0.25, %v967_v13 }
  0xd6   : > { %2789 = vrot.lane.b32.xlu1 %v1162_v3, %s7546_s22  ;;  %v482_v29 = vsel %vm461_vm1, %v8907_v8, %v8905_v32 }
  0xd7   : > { %1781 = vrot.lane.b32.xlu0 %v1162_v3, %s7547_s23  ;;  %v861_v3 = vrot.slane %v8770_v54, 1  ;;  %v8969_v40 = vpack.c.bf16 %v1034_v47, %v1033_v49  ;;  %v1308_v47 = vpack.c.bf16 %v1256_v56, %v1287_v20  ;;  %v8986_v49 = vld [vmem:[%s7612_s11 + $0x58] sm:$0xff]   ;;  %v466_v20 = vsel %vm461_vm1, %v8905_v32, %v8907_v8  ;;  %v9035_v8 = vld [vmem:[%s7612_s11 + $0x50] sm:$0xff]  }
  0xd8   : > { %v8928_v22 = vpop.permute.xlu1 %1451  ;;  %v2824_v46 = vpop.permute.xlu0 %2823  ;;  %11698 = vst [vmem:[#allocation17_spill] sm:$0xff] %v8986_v49  ;;  %11701 = vst [vmem:[#allocation19_spill] sm:$0xff] %v9035_v8 }
  0xd9   : > { %v8946_v54 = vsel %vm608_vm2, %v861_v3, %v877_v24  ;;  %v8950_v11 = vsel %vm608_vm2, %v877_v24, %v861_v3  ;;  %v1000_v3 = vmul.f32 0.25, %v828_v41 }
  0xda   : > { %2837 = vrot.lane.b32.xlu1 %v682_v60, %s7544_s16  ;;  %v1082_v26 = vsel %vm575_vm3, %v8774_v38, %v8950_v11  ;;  %v1113_v19 = vmul.f32 0.25, %v8946_v54  ;;  %v3016_v60 = vsel %vm1910_vm8, %v2984_v30, %v2824_v46  ;;  %v8975_v38 = vmul.f32 0.75, %v8791_v16 }
  0xdb   : > { %2787 = vrot.lane.b32.xlu0 %v8462_v10, %s7546_s22  ;;  %v1114_v10 = vmul.f32 0.25, %v1082_v26  ;;  %v2954_v46 = vsel %vm1844_vm6, %v2910_v1, %v8837_v48  ;;  %v1363_v48 = vadd.f32 %v1331_v2, %v8560_v52  ;;  %v483_v52 = vsel %vm461_vm1, %v8911_v53, %v8909_v4 }
  0xdc   : > { %v8964_v57 = vpop.permute.xlu1 %1453  ;;  %v2872_v33 = vpop.permute.xlu0 %2871  ;;  %v1145_v24 = vadd.f32 %v1113_v19, %v937_v35  ;;  %v2986_v41 = vsel %vm1877_vm7, %v2954_v46, %v8871_v0  ;;  %v6527_v35 = vld [vmem:[%s7626_s14 + $0x38] sm:$0xff]   ;;  %v502_v26 = vsel %vm427_vm0, 0.0, %v482_v29  ;;  %v11700_v19 = vpack.c.bf16 %v8554_v9, %v8549_v63 }
  0xdd   : > { %v8972_v23 = vsel %vm1943_vm9, %v3016_v60, %v2872_v33  ;;  %v1146_v30 = vadd.f32 %v1114_v10, %v938_v25  ;;  %v3018_v1 = vsel %vm1910_vm8, %v2986_v41, %v2826_v17  ;;  %v1396_v25 = vsel %vm575_vm3, 0.0, %v1364_v42 }
  0xde   : > { %11696 = vst [vmem:[#allocation2_spill] sm:$0xff] %v8972_v23  ;;  %1463 = vrot.lane.b32.xlu1 %v11697_v7, %s7545_s21  ;;  %6868 = vmatprep.mubr.msk.bf16.mxu1 %vm2002_vm10, %v8972_v23  ;;  %v1031_v17 = vadd.f32 %v999_v21, %v8967_v51  ;;  %v1032_v42 = vadd.f32 %v1000_v3, %v8975_v38  ;;  %v6519_v2 = vunpack.c.l.bf16 %v6527_v35  ;;  %v504_v10 = vsel %vm427_vm0, 0.0, %v483_v52 }
  0xdf   : > { %2835 = vrot.lane.b32.xlu0 %v681_v55, %s7544_s16  ;;  %v9002_v13 = vpack.c.bf16 %v1146_v30, %v1145_v24  ;;  %v6520_v55 = vunpack.c.h.bf16 %v6527_v35  ;;  %v1418_v60 = vpack.c.bf16 %v1396_v25, %v1363_v48  ;;  %v467_v33 = vsel %vm461_vm1, %v8909_v4, %v8911_v53 }
  0xe0   : > { %v8998_v6 = vpop.permute.xlu1 %1565  ;;  %v2874_v56 = vpop.permute.xlu0 %2873  ;;  %v9037_v24 = vmul.f32 0.75, %v6519_v2  ;;  %v530_v63 = vpack.c.bf16 %v466_v20, %v502_v26  ;;  %v9043_v9 = vpack.c.bf16 %v1032_v42, %v1031_v17  ;;  %v531_v7 = vpack.c.bf16 %v467_v33, %v504_v10 }
  0xe1   : > { %v9009_v0 = vsel %vm1943_vm9, %v3018_v1, %v2874_v56  ;;  %v9039_v46 = vmul.f32 0.75, %v6520_v55  ;;  %v860_v30 = vrot.slane %v8787_v58, 1  ;;  %v876_v41 = vrot.slane %v8791_v16, 1  ;;  %v9074_v58 = vld [vmem:[%s7612_s11 + $0xd0] sm:$0xff]  }
  0xe2   : > { %11699 = vst [vmem:[#allocation18_spill] sm:$0xff] %v9009_v0  ;;  %1465 = vrot.lane.b32.xlu1 %v1308_v47, %s7545_s21  ;;  %6869 = vmatmul.mubr.msk.bf16.gmra.mrb[4].mxu1 %vm2002_vm10, %v9009_v0  ;;  %v9047_v53 = vadd.f32 %v8740_v31, %v9037_v24  ;;  %v564_v35 = vunpack.c.l.bf16 %v8986_v49  ;;  %v9061_v1 = vmul.f32 0.25, %v6519_v2  ;;  %v1810_v56 = vsel %vm1795_vm5, %v530_v63, %v8928_v22 }
  0xe3   : > { %2883 = vrot.lane.b32.xlu0 %v11700_v19, %s7547_s23  ;;  %v9051_v4 = vadd.f32 %v8742_v34, %v9039_v46  ;;  %11702 = vst [vmem:[#allocation20_spill] sm:$0xff] %v9074_v58  ;;  %v9076_v25 = vmul.f32 0.25, %v6520_v55  ;;  %v1337_v20 = vmul.f32 0.75, %v8946_v54  ;;  %v565_v55 = vunpack.c.h.bf16 %v8986_v49 }
  0xe4   : > { %v9032_v3 = vpop.permute.xlu1 %1613  ;;  %v1564_v32 = vpop.permute.xlu0 %1563  ;;  %v799_v48 = vrot.slane %v9047_v53, 7  ;;  %v9064_v34 = vmul.f32 0.25, %v9047_v53  ;;  %v9093_v33 = vsel %vm608_vm2, %v876_v41, %v860_v30  ;;  %v1338_v10 = vmul.f32 0.75, %v8950_v11 }
  0xe5   : > { %v815_v31 = vrot.slane %v9051_v4, 7  ;;  %v9067_v29 = vmul.f32 0.25, %v9051_v4  ;;  %v1854_v42 = vsel %vm1844_vm6, %v1810_v56, %v1564_v32  ;;  %v9111_v11 = vadd.f32 %v1337_v20, %v8806_v39 }
  0xe6   : > { %1577 = vrot.lane.b32.xlu1 %v8986_v49, %s7543_s15  ;;  %v1080_v56 = vsel %vm575_vm3, %v8791_v16, %v9093_v33  ;;  %v9128_v39 = vadd.f32 %v9076_v25, %v8753_v37  ;;  %v1813_v37 = vsel %vm1795_vm5, %v531_v7, %v8964_v57 }
  0xe7   : > { %2885 = vrot.lane.b32.xlu0 %v1418_v60, %s7547_s23  ;;  %v9080_v52 = vsel %vm461_vm1, %v799_v48, %v815_v31  ;;  %v847_v17 = vsel %vm461_vm1, %v815_v31, %v799_v48  ;;  %v1370_v31 = vadd.f32 %v1338_v10, %v8809_v43  ;;  %v1112_v10 = vmul.f32 0.25, %v1080_v56 }
  0xe8   : > { %v9054_v47 = vpop.permute.xlu1 %2715  ;;  %v1612_v21 = vpop.permute.xlu0 %1611  ;;  %v1197_v22 = vmul.f32 0.75, %v847_v17  ;;  %v1198_v2 = vmul.f32 0.75, %v9080_v52  ;;  %v814_v7 = vrot.slane %v9128_v39, 7 }
  0xe9   : > { %v1887_v26 = vsel %vm1877_vm7, %v1854_v42, %v1612_v21  ;;  %v9108_v21 = vsel %vm608_vm2, %v860_v30, %v876_v41  ;;  %v9124_v30 = vadd.f32 %v9061_v1, %v8751_v36  ;;  %v9137_v42 = vld [vmem:[%s7612_s11 + $0xd8] sm:$0xff]   ;;  %v9143_v36 = vsel %vm575_vm3, 0.0, %v1370_v31 }
  0xea   : > { %1625 = vrot.lane.b32.xlu1 %v9043_v9, %s7546_s22  ;;  %v1261_v63 = vadd.f32 %v9064_v34, %v1197_v22  ;;  %v9099_v48 = vadd.f32 %v9067_v29, %v1198_v2  ;;  %11704 = vst [vmem:[#allocation22_spill] sm:$0xff] %v9137_v42  ;;  %v562_v22 = vunpack.c.l.bf16 %v9035_v8  ;;  %v563_v2 = vunpack.c.h.bf16 %v9035_v8 }
  0xeb   : > { %1575 = vrot.lane.b32.xlu0 %v9035_v8, %s7543_s15  ;;  %v798_v57 = vrot.slane %v9124_v30, 7  ;;  %v1144_v20 = vadd.f32 %v1112_v10, %v8975_v38 }
  0xec   : > { %v1772_v19 = vpop.permute.xlu1 %1771  ;;  %v1724_v60 = vpop.permute.xlu0 %1723  ;;  %v9132_v43 = vsel %vm427_vm0, 0.0, %v1261_v63  ;;  %v602_v31 = vrot.slane %v563_v2, 1 }
  0xed   : > { %v1920_v32 = vsel %vm1910_vm8, %v1887_v26, %v1724_v60  ;;  %v587_v26 = vrot.slane %v564_v35, 1  ;;  %v1111_v60 = vmul.f32 0.25, %v9108_v21 }
  0xee   : > { %2727 = vrot.lane.b32.xlu1 %v8696_v28, %s7545_s21  ;;  %v9104_v54 = vsel %vm1943_vm9, %v1920_v32, %v1772_v19  ;;  %v603_v19 = vrot.slane %v565_v55, 1  ;;  %v1856_v32 = vsel %vm1844_vm6, %v1813_v37, %v8998_v6  ;;  %v586_v55 = vrot.slane %v562_v22, 1 }
  0xef   : > { %11703 = vst [vmem:[#allocation21_spill] sm:$0xff] %v9104_v54  ;;  %1623 = vrot.lane.b32.xlu0 %v8696_v28, %s7546_s22  ;;  %6758 = vmatprep.mubr.msk.bf16.mxu0 %vm2002_vm10, %v9104_v54  ;;  %v1143_v56 = vadd.f32 %v1111_v60, %v8967_v51  ;;  %v1889_v6 = vsel %vm1877_vm7, %v1856_v32, %v9032_v3  ;;  %v941_v22 = vmul.f32 0.75, %v9047_v53  ;;  %v942_v51 = vmul.f32 0.75, %v9051_v4 }
  0xf0   : > { %v9134_v28 = vpop.permute.xlu1 %2747  ;;  %v1726_v41 = vpop.permute.xlu0 %1725  ;;  %v620_v16 = vsel %vm608_vm2, %v587_v26, %v603_v19  ;;  %v636_v0 = vsel %vm608_vm2, %v603_v19, %v587_v26  ;;  %v846_v37 = vsel %vm461_vm1, %v814_v7, %v798_v57  ;;  %v973_v26 = vsel %vm427_vm0, %v9047_v53, %v847_v17 }
  0xf1   : > { %v1922_v38 = vsel %vm1910_vm8, %v1889_v6, %v1726_v41  ;;  %v1006_v3 = vmul.f32 0.25, %v9080_v52  ;;  %v863_v19 = vrot.slane %v9047_v53, 1  ;;  %v664_v32 = vsel %vm575_vm3, 0.0, %v636_v0 }
  0xf2   : > { %1783 = vrot.lane.b32.xlu1 %v8729_v18, %s7547_s23  ;;  %v1005_v23 = vmul.f32 0.25, %v973_v26  ;;  %v879_v41 = vrot.slane %v9051_v4, 1  ;;  %v1164_v17 = vpack.c.bf16 %v1144_v20, %v1143_v56  ;;  %v830_v52 = vsel %vm461_vm1, %v798_v57, %v814_v7 }
  0xf3   : > { %1735 = vrot.lane.b32.xlu0 %v9074_v58, %s7544_s16  ;;  %v9201_v53 = vmul.f32 0.25, %v9124_v30  ;;  %v1038_v6 = vadd.f32 %v1006_v3, %v942_v51  ;;  %v1195_v0 = vmul.f32 0.75, %v846_v37  ;;  %v635_v57 = vsel %vm608_vm2, %v602_v31, %v586_v55  ;;  %v11706_v3 = vld [vmem:[#allocation7_spill] sm:$0xff] }
  0xf4   : > { %v9160_v63 = vpop.permute.xlu1 %2749  ;;  %v9162_v35 = vpop.permute.xlu0 %2717  ;;  %v911_v26 = vsel %vm608_vm2, %v879_v41, %v863_v19  ;;  %v684_v49 = vpack.c.bf16 %v664_v32, %v620_v16  ;;  %v1196_v8 = vmul.f32 0.75, %v830_v52  ;;  %v1336_v32 = vmul.f32 0.75, %v9093_v33 }
  0xf5   : > { %v1086_v7 = vsel %vm575_vm3, %v9051_v4, %v911_v26  ;;  %v662_v4 = vsel %vm575_vm3, 0.0, %v635_v57  ;;  %v11708_v57 = vld [vmem:[#allocation3_spill] sm:$0xff] }
  0xf6   : > { %2759 = vrot.lane.b32.xlu1 %v9074_v58, %s7543_s15  ;;  %v2916_v33 = vsel %vm1795_vm5, %v11708_v57, %v9162_v35 }
  0xf7   : > { %1737 = vrot.lane.b32.xlu0 %v9137_v42, %s7544_s16 }
  0xf8   : > { %v9181_v2 = vpop.permute.xlu1 %2781  ;;  %v1774_v60 = vpop.permute.xlu0 %1773 }
  0xf9   : > { %v9189_v10 = vsel %vm1943_vm9, %v1922_v38, %v1774_v60  ;;  %v1037_v38 = vadd.f32 %v1005_v23, %v941_v22  ;;  %v895_v60 = vsel %vm608_vm2, %v863_v19, %v879_v41  ;;  %v1118_v23 = vmul.f32 0.25, %v1086_v7 }
  0xfa   : > { %11705 = vst [vmem:[#allocation23_spill] sm:$0xff] %v9189_v10  ;;  %2761 = vrot.lane.b32.xlu1 %v9137_v42, %s7543_s15  ;;  %6759 = vmatmul.mubr.msk.bf16.gmra.mrb[8].mxu0 %vm2002_vm10, %v9189_v10  ;;  %v1117_v56 = vmul.f32 0.25, %v895_v60  ;;  %v9219_v19 = vmul.f32 0.25, %v9128_v39  ;;  %v619_v42 = vsel %vm608_vm2, %v586_v55, %v602_v31  ;;  %v405_v7 = vunpack.c.h.bf16 %v11706_v3 }
  0xfb   : > { %2729 = vrot.lane.b32.xlu0 %v9043_v9, %s7545_s21  ;;  %v404_v9 = vunpack.c.l.bf16 %v11706_v3  ;;  %v9215_v54 = vpack.c.bf16 %v1038_v6, %v1037_v38  ;;  %v1259_v6 = vadd.f32 %v9201_v53, %v1195_v0  ;;  %v1150_v38 = vadd.f32 %v1118_v23, %v942_v51 }
  0xfc   : > { %v2830_v10 = vpop.permute.xlu1 %2829  ;;  %v2780_v20 = vpop.permute.xlu0 %2779  ;;  %v1149_v41 = vadd.f32 %v1117_v56, %v941_v22  ;;  %v11707_v22 = vld [vmem:[#allocation4_spill] sm:$0xff]  ;;  %v683_v31 = vpack.c.bf16 %v662_v4, %v619_v42  ;;  %v1260_v51 = vadd.f32 %v9219_v19, %v1196_v8  ;;  %v1335_v0 = vmul.f32 0.75, %v9108_v21 }
  0xfd   : > { %v435_v58 = vrot.slane %v404_v9, 7  ;;  %v11709_v8 = vld [vmem:[#allocation8_spill] sm:$0xff]  ;;  %v9261_v23 = vmul.f32 0.75, %v9124_v30  ;;  %v2958_v4 = vsel %vm1844_vm6, %v2916_v33, %v9160_v63 }
  0xfe   : > { %2793 = vrot.lane.b32.xlu1 %v1164_v17, %s7546_s22  ;;  %v9234_v56 = vpack.c.bf16 %v1150_v38, %v1149_v41  ;;  %v406_v42 = vunpack.c.l.bf16 %v11709_v8  ;;  %v9264_v41 = vmul.f32 0.75, %v9128_v39  ;;  %v1367_v63 = vadd.f32 %v1335_v0, %v8884_v44 }
  0xff   : > { %1785 = vrot.lane.b32.xlu0 %v1164_v17, %s7547_s23  ;;  %v2913_v17 = vsel %vm1795_vm5, %v11707_v22, %v9054_v47  ;;  %v1291_v47 = vsel %vm427_vm0, 0.0, %v1259_v6  ;;  %v11710_v6 = vpack.c.bf16 %v8843_v61, %v8858_v59  ;;  %v1342_v22 = vmul.f32 0.75, %v911_v26 }
 0x100   : > { %v9228_v12 = vpop.permute.xlu1 %1455  ;;  %v2828_v16 = vpop.permute.xlu0 %2827  ;;  %v2956_v55 = vsel %vm1844_vm6, %v2913_v17, %v9134_v28  ;;  %v451_v28 = vrot.slane %v405_v7, 7  ;;  %v1341_v7 = vmul.f32 0.75, %v895_v60  ;;  %v11711_v0 = vpack.c.bf16 %v8848_v50, %v8832_v62 }
 0x101   : > { %v2988_v3 = vsel %vm1877_vm7, %v2956_v55, %v2780_v20  ;;  %v1368_v20 = vadd.f32 %v1336_v32, %v8914_v14  ;;  %v1310_v14 = vpack.c.bf16 %v1260_v51, %v1291_v47  ;;  %v2990_v32 = vsel %vm1877_vm7, %v2958_v4, %v9181_v2 }
 0x102   : > { %2841 = vrot.lane.b32.xlu1 %v684_v49, %s7544_s16  ;;  %v971_v49 = vsel %vm427_vm0, %v9124_v30, %v846_v37  ;;  %v3020_v21 = vsel %vm1910_vm8, %v2988_v3, %v2828_v16  ;;  %v1004_v37 = vmul.f32 0.25, %v830_v52  ;;  %v407_v16 = vunpack.c.h.bf16 %v11709_v8  ;;  %v9279_v52 = vld [vmem:[%s7612_s11 + $0x68] sm:$0xff]   ;;  %v9312_v8 = vld [vmem:[%s7612_s11 + $0x60] sm:$0xff]  }
 0x103   : > { %2791 = vrot.lane.b32.xlu0 %v8729_v18, %s7546_s22  ;;  %v1003_v38 = vmul.f32 0.25, %v971_v49  ;;  %v3022_v61 = vsel %vm1910_vm8, %v2990_v32, %v2830_v10  ;;  %v484_v59 = vsel %vm461_vm1, %v451_v28, %v435_v58  ;;  %v1400_v55 = vsel %vm575_vm3, 0.0, %v1368_v20 }
 0x104   : > { %v9254_v9 = vpop.permute.xlu1 %1457  ;;  %v2876_v35 = vpop.permute.xlu0 %2875  ;;  %v9290_v2 = vadd.f32 %v1341_v7, %v9064_v34  ;;  %v1036_v10 = vadd.f32 %v1004_v37, %v9264_v41  ;;  %v1374_v26 = vadd.f32 %v1342_v22, %v9067_v29  ;;  %v468_v51 = vsel %vm461_vm1, %v435_v58, %v451_v28 }
 0x105   : > { %v9258_v18 = vsel %vm1943_vm9, %v3020_v21, %v2876_v35  ;;  %v1035_v44 = vadd.f32 %v1003_v38, %v9261_v23  ;;  %v506_v34 = vsel %vm427_vm0, 0.0, %v484_v59  ;;  %v1420_v57 = vpack.c.bf16 %v1400_v55, %v1367_v63 }
 0x106   : > { %1467 = vrot.lane.b32.xlu1 %v11710_v6, %s7545_s21  ;;  %6872 = vmatprep.mubr.msk.bf16.mxu1 %vm2002_vm10, %v9258_v18  ;;  %v436_v33 = vrot.slane %v406_v42, 7  ;;  %v452_v3 = vrot.slane %v407_v16, 7  ;;  %v9316_v29 = vsel %vm575_vm3, 0.0, %v1374_v26  ;;  %v532_v28 = vpack.c.bf16 %v468_v51, %v506_v34  ;;  %v9348_v16 = vld [vmem:[%s7612_s11 + $0xe0] sm:$0xff]   ;;  %v9384_v34 = vld [vmem:[%s7612_s11 + $0xe8] sm:$0xff]  }
 0x107   : > { %2839 = vrot.lane.b32.xlu0 %v683_v31, %s7544_s16  ;;  %v1423_v58 = vpack.c.bf16 %v9316_v29, %v9290_v2  ;;  %v9322_v62 = vpack.c.bf16 %v1036_v10, %v1035_v44  ;;  %v862_v50 = vrot.slane %v9124_v30, 1  ;;  %v878_v42 = vrot.slane %v9128_v39, 1 }
 0x108   : > { %v9285_v17 = vpop.permute.xlu1 %1569  ;;  %v2878_v60 = vpop.permute.xlu0 %2877  ;;  %v485_v21 = vsel %vm461_vm1, %v452_v3, %v436_v33  ;;  %v1816_v37 = vsel %vm1795_vm5, %v532_v28, %v9228_v12  ;;  %v469_v4 = vsel %vm461_vm1, %v436_v33, %v452_v3  ;;  %v9373_v55 = vadd.f32 %v9061_v1, %v9037_v24 }
 0x109   : > { %v9293_v31 = vsel %vm1943_vm9, %v3022_v61, %v2878_v60  ;;  %v508_v30 = vsel %vm427_vm0, 0.0, %v485_v21  ;;  %v9358_v61 = vsel %vm608_vm2, %v862_v50, %v878_v42  ;;  %v7494_v60 = vld [vmem:[%s11598_s2] sm:$0xff]   ;;  %v9377_v44 = vadd.f32 %v9076_v25, %v9039_v46 }
 0x10a   : > { %1469 = vrot.lane.b32.xlu1 %v1310_v14, %s7545_s21  ;;  %6873 = vmatmul.mubr.msk.bf16.gmra.mrb[8].mxu1 %vm2002_vm10, %v9293_v31  ;;  %v9344_v14 = vsel %vm608_vm2, %v878_v42, %v862_v50  ;;  %v533_v63 = vpack.c.bf16 %v469_v4, %v508_v30  ;;  %v569_v10 = vunpack.c.h.bf16 %v9279_v52  ;;  %v800_v46 = vrot.slane %v9373_v55, 7 }
 0x10b   : > { %2887 = vrot.lane.b32.xlu0 %v11711_v0, %s7547_s23  ;;  %v1084_v59 = vsel %vm575_vm3, %v9128_v39, %v9344_v14  ;;  %v568_v39 = vunpack.c.l.bf16 %v9279_v52  ;;  %6896 = vmatprep.subr.bf16.mxu1 %v7494_v60  ;;  %v816_v1 = vrot.slane %v9377_v44, 7  ;;  %v566_v33 = vunpack.c.l.bf16 %v9312_v8 }
 0x10c   : > { %v9309_v47 = vpop.permute.xlu1 %1617  ;;  %v1568_v49 = vpop.permute.xlu0 %1567  ;;  %6782 = vmatprep.subr.bf16.mxu0 %v7494_v60  ;;  %v1116_v0 = vmul.f32 0.25, %v1084_v59  ;;  %6897 = vmatpush3.bf16.msra.mxu1 %v7494_v60  ;;  %v1819_v24 = vsel %vm1795_vm5, %v533_v63, %v9254_v9  ;;  %v567_v9 = vunpack.c.h.bf16 %v9312_v8 }
 0x10d   : > { %v1858_v6 = vsel %vm1844_vm6, %v1816_v37, %v1568_v49  ;;  %6783 = vmatpush3.bf16.msra.mxu0 %v7494_v60  ;;  %v589_v25 = vrot.slane %v568_v39, 1  ;;  %v1860_v49 = vsel %vm1844_vm6, %v1819_v24, %v9285_v17  ;;  %v848_v21 = vsel %vm461_vm1, %v816_v1, %v800_v46 }
 0x10e   : > { %1581 = vrot.lane.b32.xlu1 %v9279_v52, %s7543_s15  ;;  %v1148_v42 = vadd.f32 %v1116_v0, %v9264_v41  ;;  %v604_v4 = vrot.slane %v567_v9, 1  ;;  %v408_v0 = vunpack.c.l.bf16 %v8760_v45  ;;  %v11712_v9 = vld [vmem:[#allocation6_spill] sm:$0xff] }
 0x10f   : > { %2889 = vrot.lane.b32.xlu0 %v1420_v57, %s7547_s23  ;;  %v605_v57 = vrot.slane %v569_v10, 1 }
 0x110   : > { %v9329_v35 = vpop.permute.xlu1 %2719  ;;  %v1616_v20 = vpop.permute.xlu0 %1615 }
 0x111   : > { %v1891_v12 = vsel %vm1877_vm7, %v1858_v6, %v1616_v20  ;;  %v1893_v20 = vsel %vm1877_vm7, %v1860_v49, %v9309_v47  ;;  %v638_v37 = vsel %vm608_vm2, %v605_v57, %v589_v25  ;;  %v832_v47 = vsel %vm461_vm1, %v800_v46, %v816_v1 }
 0x112   : > { %1629 = vrot.lane.b32.xlu1 %v9322_v62, %s7546_s22  ;;  %v668_v63 = vsel %vm575_vm3, 0.0, %v638_v37  ;;  %v1200_v10 = vmul.f32 0.75, %v832_v47  ;;  %v975_v37 = vsel %vm427_vm0, %v9373_v55, %v848_v21 }
 0x113   : > { %1579 = vrot.lane.b32.xlu0 %v9312_v8, %s7543_s15 }
 0x114   : > { %v1776_v38 = vpop.permute.xlu1 %1775  ;;  %v1728_v7 = vpop.permute.xlu0 %1727 }
 0x115   : > { %v1924_v32 = vsel %vm1910_vm8, %v1891_v12, %v1728_v7  ;;  %v9424_v7 = vmul.f32 0.25, %v9373_v55 }
 0x116   : > { %2731 = vrot.lane.b32.xlu1 %v8969_v40, %s7545_s21  ;;  %v9354_v22 = vsel %vm1943_vm9, %v1924_v32, %v1776_v38  ;;  %v1199_v38 = vmul.f32 0.75, %v848_v21  ;;  %v622_v32 = vsel %vm608_vm2, %v589_v25, %v605_v57  ;;  %v1340_v25 = vmul.f32 0.75, %v9344_v14  ;;  %v7495_v21 = vld [vmem:[%s11598_s2 + $0x8] sm:$0xff]  }
 0x117   : > { %1627 = vrot.lane.b32.xlu0 %v8969_v40, %s7546_s22  ;;  %6762 = vmatprep.mubr.msk.bf16.mxu0 %vm2002_vm10, %v9354_v22  ;;  %v1115_v40 = vmul.f32 0.25, %v9358_v61  ;;  %v409_v57 = vunpack.c.h.bf16 %v8760_v45  ;;  %v1339_v45 = vmul.f32 0.75, %v9358_v61 }
 0x118   : > { %v9381_v26 = vpop.permute.xlu1 %2751  ;;  %v1730_v51 = vpop.permute.xlu0 %1729  ;;  %6898 = vmatprep.subr.bf16.mxu1 %v7495_v21  ;;  %6784 = vmatprep.subr.bf16.mxu0 %v7495_v21 }
 0x119   : > { %v1147_v50 = vadd.f32 %v1115_v40, %v9261_v23  ;;  %v588_v23 = vrot.slane %v566_v33, 1  ;;  %v1926_v41 = vsel %vm1910_vm8, %v1893_v20, %v1730_v51  ;;  %v9437_v51 = vmul.f32 0.25, %v9377_v44  ;;  %6899 = vmatpush3.bf16.msra.mxu1 %v7495_v21  ;;  %6785 = vmatpush3.bf16.msra.mxu0 %v7495_v21 }
 0x11a   : > { %1787 = vrot.lane.b32.xlu1 %v9002_v13, %s7547_s23  ;;  %v1263_v40 = vadd.f32 %v9424_v7, %v1199_v38 }
 0x11b   : > { %1739 = vrot.lane.b32.xlu0 %v9348_v16, %s7544_s16  ;;  %v1166_v6 = vpack.c.bf16 %v1148_v42, %v1147_v50  ;;  %v637_v39 = vsel %vm608_vm2, %v604_v4, %v588_v23  ;;  %v621_v46 = vsel %vm608_vm2, %v588_v23, %v604_v4  ;;  %v1264_v49 = vadd.f32 %v9437_v51, %v1200_v10 }
 0x11c   : > { %v9396_v3 = vpop.permute.xlu1 %2753  ;;  %v666_v1 = vsel %vm575_vm3, 0.0, %v637_v39  ;;  %v2919_v50 = vsel %vm1795_vm5, %v11712_v9, %v9329_v35  ;;  %v1295_v42 = vsel %vm427_vm0, 0.0, %v1263_v40  ;;  %v437_v23 = vrot.slane %v408_v0, 7  ;;  %v11713_v35 = vld [vmem:[#allocation5_spill] sm:$0xff] }
 0x11d   : > { %v2722_v28 = vpop.permute.xlu0 %2721  ;;  %v2960_v20 = vsel %vm1844_vm6, %v2919_v50, %v9381_v26  ;;  %v685_v14 = vpack.c.bf16 %v666_v1, %v621_v46  ;;  %v1372_v26 = vadd.f32 %v1340_v25, %v9219_v19  ;;  %v1312_v61 = vpack.c.bf16 %v1264_v49, %v1295_v42 }
 0x11e   : > { %2763 = vrot.lane.b32.xlu1 %v9348_v16, %s7543_s15  ;;  %v2922_v4 = vsel %vm1795_vm5, %v11713_v35, %v2722_v28  ;;  %v9487_v19 = vmul.f32 0.75, %v9377_v44  ;;  %v1008_v39 = vmul.f32 0.25, %v832_v47  ;;  %v1371_v40 = vadd.f32 %v1339_v45, %v9201_v53 }
 0x11f   : > { %1741 = vrot.lane.b32.xlu0 %v9384_v34, %s7544_s16  ;;  %v2962_v10 = vsel %vm1844_vm6, %v2922_v4, %v9396_v3  ;;  %v1404_v3 = vsel %vm575_vm3, 0.0, %v1372_v26  ;;  %v880_v35 = vrot.slane %v9377_v44, 1 }
 0x120   : > { %v9411_v17 = vpop.permute.xlu1 %2785  ;;  %v1040_v25 = vadd.f32 %v1008_v39, %v9487_v19 }
 0x121   : > { %v1778_v30 = vpop.permute.xlu0 %1777  ;;  %v2994_v0 = vsel %vm1877_vm7, %v2962_v10, %v9411_v17 }
 0x122   : > { %v9417_v12 = vsel %vm1943_vm9, %v1926_v41, %v1778_v30  ;;  %2765 = vrot.lane.b32.xlu1 %v9384_v34, %s7543_s15 }
 0x123   : > { %2733 = vrot.lane.b32.xlu0 %v9322_v62, %s7545_s21  ;;  %6763 = vmatmul.mubr.msk.bf16.gmra.mrb[12].mxu0 %vm2002_vm10, %v9417_v12  ;;  %v686_v62 = vpack.c.bf16 %v668_v63, %v622_v32  ;;  %v9474_v32 = vmul.f32 0.75, %v9373_v55  ;;  %v11714_v63 = vpack.c.bf16 %v9099_v48, %v9132_v43  ;;  %v410_v48 = vunpack.c.l.bf16 %v8803_v27 }
 0x124   : > { %v2834_v59 = vpop.permute.xlu1 %2833  ;;  %v411_v43 = vunpack.c.h.bf16 %v8803_v27 }
 0x125   : > { %v2784_v60 = vpop.permute.xlu0 %2783  ;;  %v3026_v46 = vsel %vm1910_vm8, %v2994_v0, %v2834_v59  ;;  %v11715_v59 = vpack.c.bf16 %v9143_v36, %v9111_v11 }
 0x126   : > { %2797 = vrot.lane.b32.xlu1 %v1166_v6, %s7546_s22  ;;  %v2992_v41 = vsel %vm1877_vm7, %v2960_v20, %v2784_v60  ;;  %v1007_v60 = vmul.f32 0.25, %v975_v37  ;;  %v454_v49 = vrot.slane %v411_v43, 7  ;;  %v9526_v20 = vld [vmem:[%s7612_s11 + $0x70] sm:$0xff]  }
 0x127   : > { %1789 = vrot.lane.b32.xlu0 %v1166_v6, %s7547_s23  ;;  %v453_v6 = vrot.slane %v409_v57, 7  ;;  %v1422_v57 = vpack.c.bf16 %v1404_v3, %v1371_v40  ;;  %v9574_v3 = vld [vmem:[%s7612_s11 + $0xf8] sm:$0xff]  }
 0x128   : > { %v9443_v24 = vpop.permute.xlu1 %1459  ;;  %v1039_v17 = vadd.f32 %v1007_v60, %v9474_v32 }
 0x129   : > { %v2832_v33 = vpop.permute.xlu0 %2831  ;;  %v486_v1 = vsel %vm461_vm1, %v453_v6, %v437_v23  ;;  %v470_v9 = vsel %vm461_vm1, %v437_v23, %v453_v6  ;;  %v864_v23 = vrot.slane %v9373_v55, 1 }
 0x12a   : > { %2845 = vrot.lane.b32.xlu1 %v686_v62, %s7544_s16  ;;  %v9495_v62 = vld [vmem:[%s7612_s11 + $0x78] sm:$0xff]   ;;  %v510_v50 = vsel %vm427_vm0, 0.0, %v486_v1  ;;  %v9530_v11 = vpack.c.bf16 %v1040_v25, %v1039_v17 }
 0x12b   : > { %2795 = vrot.lane.b32.xlu0 %v9002_v13, %s7546_s22  ;;  %v3024_v13 = vsel %vm1910_vm8, %v2992_v41, %v2832_v33  ;;  %v438_v33 = vrot.slane %v410_v48, 7  ;;  %v534_v36 = vpack.c.bf16 %v470_v9, %v510_v50  ;;  %v896_v10 = vsel %vm608_vm2, %v864_v23, %v880_v35 }
 0x12c   : > { %v9469_v30 = vpop.permute.xlu1 %1461  ;;  %v572_v48 = vunpack.c.l.bf16 %v9495_v62  ;;  %v573_v43 = vunpack.c.h.bf16 %v9495_v62  ;;  %v1119_v1 = vmul.f32 0.25, %v896_v10 }
 0x12d   : > { %v2880_v38 = vpop.permute.xlu0 %2879  ;;  %v487_v45 = vsel %vm461_vm1, %v454_v49, %v438_v33  ;;  %v1822_v41 = vsel %vm1795_vm5, %v534_v36, %v9443_v24  ;;  %v471_v26 = vsel %vm461_vm1, %v438_v33, %v454_v49  ;;  %v570_v33 = vunpack.c.l.bf16 %v9526_v20 }
 0x12e   : > { %v9480_v28 = vsel %vm1943_vm9, %v3024_v13, %v2880_v38  ;;  %1471 = vrot.lane.b32.xlu1 %v11714_v63, %s7545_s21  ;;  %v512_v6 = vsel %vm427_vm0, 0.0, %v487_v45  ;;  %v9551_v38 = vld [vmem:[%s7612_s11 + $0xf0] sm:$0xff]   ;;  %v591_v17 = vrot.slane %v572_v48, 1  ;;  %v607_v25 = vrot.slane %v573_v43, 1 }
 0x12f   : > { %2843 = vrot.lane.b32.xlu0 %v685_v14, %s7544_s16  ;;  %6876 = vmatprep.mubr.msk.bf16.mxu1 %vm2002_vm10, %v9480_v28  ;;  %v535_v63 = vpack.c.bf16 %v471_v26, %v512_v6  ;;  %v571_v49 = vunpack.c.h.bf16 %v9526_v20  ;;  %v1151_v50 = vadd.f32 %v1119_v1, %v9474_v32  ;;  %v11716_v48 = vld [vmem:[#allocation20_spill] sm:$0xff]  ;;  %v11717_v1 = vld [vmem:[#allocation14_spill] sm:$0xff] }
 0x130   : > { %v9502_v47 = vpop.permute.xlu1 %1573  ;;  %v412_v43 = vunpack.c.l.bf16 %v11716_v48 }
 0x131   : > { %v2882_v53 = vpop.permute.xlu0 %2881 }
 0x132   : > { %v9510_v27 = vsel %vm1943_vm9, %v3026_v46, %v2882_v53  ;;  %1473 = vrot.lane.b32.xlu1 %v1312_v61, %s7545_s21  ;;  %v912_v61 = vsel %vm608_vm2, %v880_v35, %v864_v23  ;;  %v1825_v46 = vsel %vm1795_vm5, %v535_v63, %v9469_v30  ;;  %v640_v23 = vsel %vm608_vm2, %v607_v25, %v591_v17 }
 0x133   : > { %2891 = vrot.lane.b32.xlu0 %v11715_v59, %s7547_s23  ;;  %6877 = vmatmul.mubr.msk.bf16.gmra.mrb[12].mxu1 %vm2002_vm10, %v9510_v27  ;;  %v1088_v40 = vsel %vm575_vm3, %v9377_v44, %v912_v61  ;;  %v7496_v44 = vld [vmem:[%s11598_s2 + $0x10] ss:$0 sps:$4 sm:$0x33]   ;;  %v1344_v36 = vmul.f32 0.75, %v912_v61  ;;  %v590_v35 = vrot.slane %v570_v33, 1 }
 0x134   : > { %v1622_v42 = vpop.permute.xlu1 %1621  ;;  %v1120_v53 = vmul.f32 0.25, %v1088_v40  ;;  %7436 = vmatprep.subr.msk.bf16.mxu1 %vm2035_vm4, %v7496_v44  ;;  %7433 = vmatprep.subr.msk.bf16.mxu0 %vm2035_vm4, %v7496_v44  ;;  %v2219_v30 = vsel %vm2035_vm4, %v7496_v44, 0 }
 0x135   : > { %v1572_v14 = vpop.permute.xlu0 %1571  ;;  %6901 = vmatpush3.bf16.msra.mxu1 %v2219_v30  ;;  %6787 = vmatpush3.bf16.msra.mxu0 %v2219_v30 }
 0x136   : > { %1585 = vrot.lane.b32.xlu1 %v9495_v62, %s7543_s15  ;;  %v1862_v55 = vsel %vm1844_vm6, %v1822_v41, %v1572_v14  ;;  %v1152_v14 = vadd.f32 %v1120_v53, %v9487_v19  ;;  %v1343_v19 = vmul.f32 0.75, %v896_v10 }
 0x137   : > { %2893 = vrot.lane.b32.xlu0 %v1422_v57, %s7547_s23  ;;  %v1864_v57 = vsel %vm1844_vm6, %v1825_v46, %v9502_v47 }
 0x138   : > { %v9535_v37 = vpop.permute.xlu1 %2723  ;;  %v1897_v47 = vsel %vm1877_vm7, %v1864_v57, %v1622_v42  ;;  %v1168_v32 = vpack.c.bf16 %v1152_v14, %v1151_v50  ;;  %v624_v42 = vsel %vm608_vm2, %v591_v17, %v607_v25  ;;  %v11718_v25 = vld [vmem:[#allocation11_spill] sm:$0xff] }
 0x139   : > { %v1620_v4 = vpop.permute.xlu0 %1619 }
 0x13a   : > { %1633 = vrot.lane.b32.xlu1 %v9530_v11, %s7546_s22  ;;  %v1895_v24 = vsel %vm1877_vm7, %v1862_v55, %v1620_v4  ;;  %v606_v4 = vrot.slane %v571_v49, 1  ;;  %v672_v55 = vsel %vm575_vm3, 0.0, %v640_v23  ;;  %v9644_v49 = vld [vmem:[%s11598_s2 + $0x28] sm:$0xff]  }
 0x13b   : > { %1583 = vrot.lane.b32.xlu0 %v9526_v20, %s7543_s15  ;;  %v688_v63 = vpack.c.bf16 %v672_v55, %v624_v42  ;;  %6934 = vmatprep.subr.bf16.mxu1 %v9644_v49 }
 0x13c   : > { %v1780_v13 = vpop.permute.xlu1 %1779  ;;  %v623_v40 = vsel %vm608_vm2, %v590_v35, %v606_v4  ;;  %6820 = vmatprep.subr.bf16.mxu0 %v9644_v49 }
 0x13d   : > { %v1732_v21 = vpop.permute.xlu0 %1731 }
 0x13e   : > { %v1928_v60 = vsel %vm1910_vm8, %v1895_v24, %v1732_v21  ;;  %2735 = vrot.lane.b32.xlu1 %v9215_v54, %s7545_s21  ;;  %v639_v21 = vsel %vm608_vm2, %v606_v4, %v590_v35 }
 0x13f   : > { %1631 = vrot.lane.b32.xlu0 %v9215_v54, %s7546_s22  ;;  %v9562_v39 = vsel %vm1943_vm9, %v1928_v60, %v1780_v13  ;;  %v1376_v13 = vadd.f32 %v1344_v36, %v9437_v51  ;;  %v670_v51 = vsel %vm575_vm3, 0.0, %v639_v21 }
 0x140   : > { %6766 = vmatprep.mubr.msk.bf16.mxu0 %vm2002_vm10, %v9562_v39  ;;  %v2756_v0 = vpop.permute.xlu1 %2755  ;;  %v687_v17 = vpack.c.bf16 %v670_v51, %v623_v40 }
 0x141   : > { %v1734_v54 = vpop.permute.xlu0 %1733  ;;  %v1408_v60 = vsel %vm575_vm3, 0.0, %v1376_v13 }
 0x142   : > { %1791 = vrot.lane.b32.xlu1 %v9234_v56, %s7547_s23  ;;  %v1930_v41 = vsel %vm1910_vm8, %v1897_v47, %v1734_v54  ;;  %v413_v54 = vunpack.c.h.bf16 %v11716_v48 }
 0x143   : > { %1743 = vrot.lane.b32.xlu0 %v9551_v38, %s7544_s16 }
 0x144   : > { %v9585_v59 = vpop.permute.xlu1 %2757  ;;  %v455_v50 = vrot.slane %v413_v54, 7 }
 0x145   : > { %v2726_v9 = vpop.permute.xlu0 %2725 }
 0x146   : > { %2767 = vrot.lane.b32.xlu1 %v9551_v38, %s7543_s15  ;;  %v2928_v30 = vsel %vm1795_vm5, %v11718_v25, %v2726_v9  ;;  %v11719_v9 = vld [vmem:[#allocation22_spill] sm:$0xff] }
 0x147   : > { %1745 = vrot.lane.b32.xlu0 %v9574_v3, %s7544_s16  ;;  %v414_v47 = vunpack.c.l.bf16 %v11719_v9  ;;  %v415_v23 = vunpack.c.h.bf16 %v11719_v9  ;;  %v417_v9 = vunpack.c.h.bf16 %v9348_v16 }
 0x148   : > { %v2790_v45 = vpop.permute.xlu1 %2789 }
 0x149   : > { %v1782_v26 = vpop.permute.xlu0 %1781 }
 0x14a   : > { %v9605_v6 = vsel %vm1943_vm9, %v1930_v41, %v1782_v26  ;;  %2769 = vrot.lane.b32.xlu1 %v9574_v3, %s7543_s15 }
 0x14b   : > { %2737 = vrot.lane.b32.xlu0 %v9530_v11, %s7545_s21  ;;  %6767 = vmatmul.mubr.msk.bf16.gmra.mrb[16].mxu0 %vm2002_vm10, %v9605_v6  ;;  %v1375_v11 = vadd.f32 %v1343_v19, %v9424_v7  ;;  %v2925_v7 = vsel %vm1795_vm5, %v11717_v1, %v9535_v37  ;;  %v439_v37 = vrot.slane %v412_v43, 7  ;;  %v456_v19 = vrot.slane %v415_v23, 7  ;;  %v11720_v23 = vld [vmem:[#allocation19_spill] sm:$0xff] }
 0x14c   : > { %v2838_v61 = vpop.permute.xlu1 %2837  ;;  %v2964_v44 = vsel %vm1844_vm6, %v2925_v7, %v2756_v0 }
 0x14d   : > { %v2788_v24 = vpop.permute.xlu0 %2787  ;;  %v1424_v53 = vpack.c.bf16 %v1408_v60, %v1375_v11  ;;  %v488_v26 = vsel %vm461_vm1, %v455_v50, %v439_v37  ;;  %v472_v42 = vsel %vm461_vm1, %v439_v37, %v455_v50 }
 0x14e   : > { %2801 = vrot.lane.b32.xlu1 %v1168_v32, %s7546_s22  ;;  %v2996_v57 = vsel %vm1877_vm7, %v2964_v44, %v2788_v24  ;;  %v514_v55 = vsel %vm427_vm0, 0.0, %v488_v26 }
 0x14f   : > { %1793 = vrot.lane.b32.xlu0 %v1168_v32, %s7547_s23  ;;  %v536_v24 = vpack.c.bf16 %v472_v42, %v514_v55  ;;  %v457_v42 = vrot.slane %v417_v9, 7 }
 0x150   : > { %v1464_v10 = vpop.permute.xlu1 %1463 }
 0x151   : > { %v2836_v46 = vpop.permute.xlu0 %2835  ;;  %v1828_v29 = vsel %vm1795_vm5, %v536_v24, %v1464_v10  ;;  %v418_v24 = vunpack.c.l.bf16 %v9384_v34 }
 0x152   : > { %2849 = vrot.lane.b32.xlu1 %v688_v63, %s7544_s16  ;;  %v3028_v14 = vsel %vm1910_vm8, %v2996_v57, %v2836_v46 }
 0x153   : > { %2799 = vrot.lane.b32.xlu0 %v9234_v56, %s7546_s22  ;;  %v2966_v56 = vsel %vm1844_vm6, %v2928_v30, %v9585_v59 }
 0x154   : > { %v1466_v33 = vpop.permute.xlu1 %1465  ;;  %v2998_v35 = vsel %vm1877_vm7, %v2966_v56, %v2790_v45  ;;  %v440_v45 = vrot.slane %v414_v47, 7 }
 0x155   : > { %v2884_v0 = vpop.permute.xlu0 %2883  ;;  %v3030_v41 = vsel %vm1910_vm8, %v2998_v35, %v2838_v61 }
 0x156   : > { %v9648_v36 = vsel %vm1943_vm9, %v3028_v14, %v2884_v0  ;;  %2897 = vrot.lane.b32.xlu1 %v1424_v53, %s7547_s23  ;;  %v489_v21 = vsel %vm461_vm1, %v456_v19, %v440_v45 }
 0x157   : > { %2847 = vrot.lane.b32.xlu0 %v687_v17, %s7544_s16  ;;  %6880 = vmatprep.mubr.msk.bf16.mxu1 %vm2002_vm10, %v9648_v36  ;;  %v516_v11 = vsel %vm427_vm0, 0.0, %v489_v21  ;;  %v419_v21 = vunpack.c.h.bf16 %v9384_v34 }
 0x158   : > { %v1578_v4 = vpop.permute.xlu1 %1577 }
 0x159   : > { %v2886_v59 = vpop.permute.xlu0 %2885 }
 0x15a   : > { %v9665_v32 = vsel %vm1943_vm9, %v3030_v41, %v2886_v59  ;;  %v11721_v41 = vld [vmem:[#allocation17_spill] sm:$0xff] }
 0x15b   : > { %2895 = vrot.lane.b32.xlu0 %v1423_v58, %s7547_s23  ;;  %6881 = vmatmul.mubr.msk.bf16.gmra.mrb[16].mxu1 %vm2002_vm10, %v9665_v32  ;;  %v473_v58 = vsel %vm461_vm1, %v440_v45, %v456_v19 }
 0x15c   : > { %v1626_v13 = vpop.permute.xlu1 %1625  ;;  %v537_v43 = vpack.c.bf16 %v473_v58, %v516_v11 }
 0x15d   : > { %v1576_v61 = vpop.permute.xlu0 %1575 }
 0x15e   : > { %v1866_v60 = vsel %vm1844_vm6, %v1828_v29, %v1576_v61  ;;  %v1831_v7 = vsel %vm1795_vm5, %v537_v43, %v1466_v33  ;;  %v416_v33 = vunpack.c.l.bf16 %v9348_v16 }
 0x15f   : > { %v1868_v44 = vsel %vm1844_vm6, %v1831_v7, %v1578_v4 }
 0x160   : > { %v2728_v63 = vpop.permute.xlu1 %2727  ;;  %v1901_v25 = vsel %vm1877_vm7, %v1868_v44, %v1626_v13  ;;  %v441_v19 = vrot.slane %v416_v33, 7 }
 0x161   : > { %v1624_v2 = vpop.permute.xlu0 %1623  ;;  %v2931_v35 = vsel %vm1795_vm5, %v11720_v23, %v2728_v63 }
 0x162   : > { %v1899_v51 = vsel %vm1877_vm7, %v1866_v60, %v1624_v2  ;;  %v490_v58 = vsel %vm461_vm1, %v457_v42, %v441_v19  ;;  %v474_v34 = vsel %vm461_vm1, %v441_v19, %v457_v42 }
 0x164   : > { %v1784_v40 = vpop.permute.xlu1 %1783 }
 0x165   : > { %v1736_v48 = vpop.permute.xlu0 %1735 }
 0x166   : > { %v1932_v54 = vsel %vm1910_vm8, %v1899_v51, %v1736_v48  ;;  %v458_v51 = vrot.slane %v419_v21, 7  ;;  %v518_v48 = vsel %vm427_vm0, 0.0, %v490_v58  ;;  %v421_v21 = vunpack.c.h.bf16 %v9551_v38 }
 0x167   : > { %v9688_v46 = vsel %vm1943_vm9, %v1932_v54, %v1784_v40  ;;  %v442_v40 = vrot.slane %v418_v24, 7 }
 0x168   : > { %6770 = vmatprep.mubr.msk.bf16.mxu0 %vm2002_vm10, %v9688_v46  ;;  %v2760_v10 = vpop.permute.xlu1 %2759 }
 0x169   : > { %v1738_v1 = vpop.permute.xlu0 %1737  ;;  %v2968_v4 = vsel %vm1844_vm6, %v2931_v35, %v2760_v10  ;;  %v538_v10 = vpack.c.bf16 %v474_v34, %v518_v48  ;;  %v459_v34 = vrot.slane %v421_v21, 7 }
 0x16a   : > { %v1934_v57 = vsel %vm1910_vm8, %v1901_v25, %v1738_v1  ;;  %v491_v1 = vsel %vm461_vm1, %v458_v51, %v442_v40 }
 0x16b   : > { %v520_v25 = vsel %vm427_vm0, 0.0, %v491_v1 }
 0x16c   : > { %v2762_v53 = vpop.permute.xlu1 %2761 }
 0x16d   : > { %v2730_v17 = vpop.permute.xlu0 %2729 }
 0x16e   : > { %v2934_v26 = vsel %vm1795_vm5, %v11721_v41, %v2730_v17  ;;  %v475_v17 = vsel %vm461_vm1, %v442_v40, %v458_v51 }
 0x16f   : > { %v2970_v16 = vsel %vm1844_vm6, %v2934_v26, %v2762_v53 }
 0x170   : > { %v2794_v30 = vpop.permute.xlu1 %2793 }
 0x171   : > { %v1786_v37 = vpop.permute.xlu0 %1785  ;;  %v3002_v63 = vsel %vm1877_vm7, %v2970_v16, %v2794_v30 }
 0x172   : > { %v9697_v50 = vsel %vm1943_vm9, %v1934_v57, %v1786_v37 }
 0x173   : > { %6771 = vmatmul.mubr.msk.bf16.gmra.mrb[20].mxu0 %vm2002_vm10, %v9697_v50 }
 0x174   : > { %v2842_v14 = vpop.permute.xlu1 %2841 }
 0x175   : > { %v2792_v0 = vpop.permute.xlu0 %2791  ;;  %v3034_v29 = vsel %vm1910_vm8, %v3002_v63, %v2842_v14 }
 0x176   : > { %v3000_v59 = vsel %vm1877_vm7, %v2968_v4, %v2792_v0  ;;  %v539_v0 = vpack.c.bf16 %v475_v17, %v520_v25 }
 0x178   : > { %v1468_v56 = vpop.permute.xlu1 %1467 }
 0x179   : > { %v2840_v47 = vpop.permute.xlu0 %2839  ;;  %v1834_v44 = vsel %vm1795_vm5, %v538_v10, %v1468_v56 }
 0x17a   : > { %v3032_v55 = vsel %vm1910_vm8, %v3000_v59, %v2840_v47 }
 0x17c   : > { %v1470_v45 = vpop.permute.xlu1 %1469 }
 0x17d   : > { %v2888_v13 = vpop.permute.xlu0 %2887  ;;  %v1837_v23 = vsel %vm1795_vm5, %v539_v0, %v1470_v45  ;;  %v420_v45 = vunpack.c.l.bf16 %v9551_v38 }
 0x17e   : > { %v9711_v61 = vsel %vm1943_vm9, %v3032_v55, %v2888_v13 }
 0x17f   : > { %6884 = vmatprep.mubr.msk.bf16.mxu1 %vm2002_vm10, %v9711_v61  ;;  %v443_v51 = vrot.slane %v420_v45, 7 }
 0x180   : > { %v1582_v2 = vpop.permute.xlu1 %1581 }
 0x181   : > { %v2890_v11 = vpop.permute.xlu0 %2889  ;;  %v1872_v4 = vsel %vm1844_vm6, %v1837_v23, %v1582_v2 }
 0x182   : > { %v9723_v60 = vsel %vm1943_vm9, %v3034_v29, %v2890_v11 }
 0x183   : > { %6885 = vmatmul.mubr.msk.bf16.gmra.mrb[20].mxu1 %vm2002_vm10, %v9723_v60 }
 0x184   : > { %v1630_v43 = vpop.permute.xlu1 %1629 }
 0x185   : > { %v1580_v54 = vpop.permute.xlu0 %1579  ;;  %v1905_v26 = vsel %vm1877_vm7, %v1872_v4, %v1630_v43 }
 0x186   : > { %v1870_v30 = vsel %vm1844_vm6, %v1834_v44, %v1580_v54 }
 0x188   : > { %v2732_v7 = vpop.permute.xlu1 %2731 }
 0x189   : > { %v1628_v53 = vpop.permute.xlu0 %1627  ;;  %v2937_v2 = vsel %vm1795_vm5, %v9312_v8, %v2732_v7  ;;  %v422_v8 = vunpack.c.l.bf16 %v9574_v3 }
 0x18a   : > { %v1903_v37 = vsel %vm1877_vm7, %v1870_v30, %v1628_v53  ;;  %v492_v53 = vsel %vm461_vm1, %v459_v34, %v443_v51 }
 0x18b   : > { %v444_v25 = vrot.slane %v422_v8, 7 }
 0x18c   : > { %v1788_v57 = vpop.permute.xlu1 %1787 }
 0x18d   : > { %v1740_v14 = vpop.permute.xlu0 %1739 }
 0x18e   : > { %v1936_v33 = vsel %vm1910_vm8, %v1903_v37, %v1740_v14 }
 0x18f   : > { %v9742_v9 = vsel %vm1943_vm9, %v1936_v33, %v1788_v57  ;;  %v522_v57 = vsel %vm427_vm0, 0.0, %v492_v53  ;;  %v11722_v53 = vld [vmem:[#allocation9_spill] sm:$0xff] }
 0x190   : > { %6774 = vmatprep.mubr.msk.bf16.mxu0 %vm2002_vm10, %v9742_v9  ;;  %v2764_v56 = vpop.permute.xlu1 %2763 }
 0x191   : > { %v1742_v47 = vpop.permute.xlu0 %1741  ;;  %v2972_v29 = vsel %vm1844_vm6, %v2937_v2, %v2764_v56 }
 0x192   : > { %v1938_v19 = vsel %vm1910_vm8, %v1905_v26, %v1742_v47 }
 0x194   : > { %v2766_v35 = vpop.permute.xlu1 %2765 }
 0x195   : > { %v2734_v41 = vpop.permute.xlu0 %2733 }
 0x196   : > { %v2940_v58 = vsel %vm1795_vm5, %v9279_v52, %v2734_v41  ;;  %v423_v52 = vunpack.c.h.bf16 %v9574_v3  ;;  %v476_v3 = vsel %vm461_vm1, %v443_v51, %v459_v34 }
 0x197   : > { %v2974_v38 = vsel %vm1844_vm6, %v2940_v58, %v2766_v35  ;;  %v540_v0 = vpack.c.bf16 %v476_v3, %v522_v57  ;;  %v11723_v3 = vld [vmem:[#allocation10_spill] sm:$0xff] }
 0x198   : > { %v2798_v59 = vpop.permute.xlu1 %2797  ;;  %v460_v30 = vrot.slane %v423_v52, 7 }
 0x199   : > { %v1790_v42 = vpop.permute.xlu0 %1789  ;;  %v3006_v10 = vsel %vm1877_vm7, %v2974_v38, %v2798_v59 }
 0x19a   : > { %v9751_v55 = vsel %vm1943_vm9, %v1938_v19, %v1790_v42  ;;  %v493_v33 = vsel %vm461_vm1, %v460_v30, %v444_v25  ;;  %v477_v35 = vsel %vm461_vm1, %v444_v25, %v460_v30 }
 0x19b   : > { %6775 = vmatmul.mubr.msk.bf16.gmra.mrb[24].mxu0 %vm2002_vm10, %v9751_v55  ;;  %v524_v4 = vsel %vm427_vm0, 0.0, %v493_v33 }
 0x19c   : > { %v2846_v13 = vpop.permute.xlu1 %2845  ;;  %v541_v42 = vpack.c.bf16 %v477_v35, %v524_v4  ;;  %v11726_v35 = vld [vmem:[#allocation12_spill] sm:$0xff]  ;;  %v11727_v4 = vld [vmem:[#allocation13_spill] sm:$0xff] }
 0x19d   : > { %v2796_v16 = vpop.permute.xlu0 %2795  ;;  %v3038_v7 = vsel %vm1910_vm8, %v3006_v10, %v2846_v13  ;;  %v7498_v10 = vld [vmem:[%s11598_s2 + $0x30] sm:$0xff]  }
 0x19e   : > { %v3004_v11 = vsel %vm1877_vm7, %v2972_v29, %v2796_v16 }
 0x1a0   : > { %v1472_v24 = vpop.permute.xlu1 %1471 }
 0x1a1   : > { %v2844_v63 = vpop.permute.xlu0 %2843  ;;  %v1840_v23 = vsel %vm1795_vm5, %v540_v0, %v1472_v24 }
 0x1a2   : > { %v3036_v48 = vsel %vm1910_vm8, %v3004_v11, %v2844_v63 }
 0x1a4   : > { %v1474_v40 = vpop.permute.xlu1 %1473 }
 0x1a5   : > { %v2892_v43 = vpop.permute.xlu0 %2891  ;;  %v1843_v21 = vsel %vm1795_vm5, %v541_v42, %v1474_v40 }
 0x1a6   : > { %v9765_v54 = vsel %vm1943_vm9, %v3036_v48, %v2892_v43  ;;  %v11641_v43 = vmov 0  }
 0x1a7   : > { %6888 = vmatprep.mubr.msk.bf16.mxu1 %vm2002_vm10, %v9765_v54 }
 0x1a8   : > { %v1586_v1 = vpop.permute.xlu1 %1585 }
 0x1a9   : > { %v2894_v44 = vpop.permute.xlu0 %2893  ;;  %v1876_v2 = vsel %vm1844_vm6, %v1843_v21, %v1586_v1 }
 0x1aa   : > { %v9777_v17 = vsel %vm1943_vm9, %v3038_v7, %v2894_v44 }
 0x1ab   : > { %6889 = vmatmul.mubr.msk.bf16.gmra.mrb[24].mxu1 %vm2002_vm10, %v9777_v17 }
 0x1ac   : > { %v1634_v37 = vpop.permute.xlu1 %1633 }
 0x1ad   : > { %v1584_v14 = vpop.permute.xlu0 %1583  ;;  %v1909_v58 = vsel %vm1877_vm7, %v1876_v2, %v1634_v37  ;;  %v7499_v37 = vld [vmem:[%s11598_s2 + $0x38] ss:$0 sps:$4 sm:$0x33]  }
 0x1ae   : > { %v1874_v41 = vsel %vm1844_vm6, %v1840_v23, %v1584_v14  ;;  %v11725_v23 = vld [vmem:[#allocation16_spill] sm:$0xff] }
 0x1b0   : > { %v2736_v56 = vpop.permute.xlu1 %2735 }
 0x1b1   : > { %v1632_v47 = vpop.permute.xlu0 %1631  ;;  %v2943_v1 = vsel %vm1795_vm5, %v9526_v20, %v2736_v56  ;;  %v2404_v56 = vsel %vm2035_vm4, %v7499_v37, 0 }
 0x1b2   : > { %v1907_v59 = vsel %vm1877_vm7, %v1874_v41, %v1632_v47  ;;  %v11724_v47 = vld [vmem:[#allocation15_spill] sm:$0xff]  ;;  %v11728_v41 = vld [vmem:[#allocation21_spill] sm:$0xff] }
 0x1b4   : > { %v1792_v26 = vpop.permute.xlu1 %1791 }
 0x1b5   : > { %v1744_v19 = vpop.permute.xlu0 %1743 }
 0x1b6   : > { %v1940_v13 = vsel %vm1910_vm8, %v1907_v59, %v1744_v19  ;;  %v11730_v59 = vld [vmem:[#allocation2_spill] sm:$0xff] }
 0x1b7   : > { %v9796_v16 = vsel %vm1943_vm9, %v1940_v13, %v1792_v26  ;;  %v11729_v26 = vld [vmem:[#allocation23_spill] sm:$0xff]  ;;  %v11731_v19 = vld [vmem:[#allocation18_spill] sm:$0xff] }
 0x1b8   : > { %6778 = vmatprep.mubr.msk.bf16.mxu0 %vm2002_vm10, %v9796_v16  ;;  %v2768_v24 = vpop.permute.xlu1 %2767 }
 0x1b9   : > { %v1746_v45 = vpop.permute.xlu0 %1745  ;;  %v2976_v7 = vsel %vm1844_vm6, %v2943_v1, %v2768_v24 }
 0x1ba   : > { %v1942_v51 = vsel %vm1910_vm8, %v1909_v58, %v1746_v45 }
 0x1bc   : > { %v2770_v63 = vpop.permute.xlu1 %2769 }
 0x1bd   : > { %v2738_v29 = vpop.permute.xlu0 %2737 }
 0x1be   : > { %v2946_v8 = vsel %vm1795_vm5, %v9495_v62, %v2738_v29 }
 0x1bf   : > { %v2978_v44 = vsel %vm1844_vm6, %v2946_v8, %v2770_v63 }
 0x1c0   : > { %v2802_v11 = vpop.permute.xlu1 %2801 }
 0x1c1   : > { %v1794_v34 = vpop.permute.xlu0 %1793  ;;  %v3010_v62 = vsel %vm1877_vm7, %v2978_v44, %v2802_v11 }
 0x1c2   : > { %v9805_v48 = vsel %vm1943_vm9, %v1942_v51, %v1794_v34 }
 0x1c3   : > { %6779 = vmatmul.mubr.msk.bf16.gmra.mrb[28].mxu0 %vm2002_vm10, %v9805_v48 }
 0x1c4   : > { %6788 = vmatprep.mubr.bf16.mxu0 %v11641_v43  ;;  %v2850_v38 = vpop.permute.xlu1 %2849 }
 0x1c5   : > { %v2800_v40 = vpop.permute.xlu0 %2799  ;;  %v3042_v14 = vsel %vm1910_vm8, %v3010_v62, %v2850_v38 }
 0x1c6   : > { %v3008_v25 = vsel %vm1877_vm7, %v2976_v7, %v2800_v40 }
 0x1c8   : > { %v2898_v30 = vpop.permute.xlu1 %2897 }
 0x1c9   : > { %v2848_v52 = vpop.permute.xlu0 %2847  ;;  %v9835_v33 = vsel %vm1943_vm9, %v3042_v14, %v2898_v30 }
 0x1ca   : > { %v3040_v57 = vsel %vm1910_vm8, %v3008_v25, %v2848_v52 }
 0x1cb   : > { %6789 = vmatmul.mubr.msk.bf16.vlgmr.msra.gmra.mrb[0].mxu0 %vm2002_vm10, %v11722_v53 }
 0x1cc   : > { %6792 = vmatprep.mubr.msk.bf16.mxu0 %vm2002_vm10, %v11723_v3  ;;  %6821 = vmatpush3.bf16.msra.mxu0 %v9644_v49 }
 0x1cd   : > { %v2896_v20 = vpop.permute.xlu0 %2895  ;;  %6822 = vmatprep.subr.bf16.mxu0 %v7498_v10 }
 0x1ce   : > { %v9832_v0 = vsel %vm1943_vm9, %v3040_v57, %v2896_v20 }
 0x1cf   : > { %6892 = vmatprep.mubr.msk.bf16.mxu1 %vm2002_vm10, %v9832_v0 }
 0x1d0   : > { %6893 = vmatmul.mubr.msk.bf16.gmra.mrb[28].mxu1 %vm2002_vm10, %v9835_v33  ;;  %6823 = vmatpush3.bf16.msra.mxu0 %v7498_v10 }
 0x1d1   : > { %6902 = vmatprep.mubr.bf16.mxu1 %v11641_v43  ;;  %7434 = vmatprep.subr.msk.bf16.mxu0 %vm2035_vm4, %v7499_v37 }
 0x1d3   : > { %6793 = vmatmul.mubr.msk.bf16.gmra.mrb[4].mxu0 %vm2002_vm10, %v11724_v47 }
 0x1d4   : > { %6796 = vmatprep.mubr.msk.bf16.mxu0 %vm2002_vm10, %v11725_v23  ;;  %6825 = vmatpush3.bf16.msra.mxu0 %v2404_v56 }
 0x1d8   : > { %6903 = vmatmul.mubr.msk.bf16.vlgmr.msra.gmra.mrb[0].mxu1 %vm2002_vm10, %v11726_v35 }
 0x1d9   : > { %6935 = vmatpush3.bf16.msra.mxu1 %v9644_v49  ;;  %6906 = vmatprep.mubr.msk.bf16.mxu1 %vm2002_vm10, %v11727_v4 }
 0x1da   : > { %6936 = vmatprep.subr.bf16.mxu1 %v7498_v10 }
 0x1db   : > { %6797 = vmatmul.mubr.msk.bf16.gmra.mrb[8].mxu0 %vm2002_vm10, %v11728_v41 }
 0x1dc   : > { %6800 = vmatprep.mubr.msk.bf16.mxu0 %vm2002_vm10, %v11729_v26 }
 0x1dd   : > { %6937 = vmatpush3.bf16.msra.mxu1 %v7498_v10 }
 0x1de   : > { %7437 = vmatprep.subr.msk.bf16.mxu1 %vm2035_vm4, %v7499_v37 }
 0x1e0   : > { %6907 = vmatmul.mubr.msk.bf16.gmra.mrb[4].mxu1 %vm2002_vm10, %v11730_v59 }
 0x1e1   : > { %6910 = vmatprep.mubr.msk.bf16.mxu1 %vm2002_vm10, %v11731_v19  ;;  %6939 = vmatpush3.bf16.msra.mxu1 %v2404_v56 }
 0x1e3   : > { %6801 = vmatmul.mubr.msk.bf16.gmra.mrb[12].mxu0 %vm2002_vm10, %v9354_v22 }
 0x1e4   : > { %6804 = vmatprep.mubr.msk.bf16.mxu0 %vm2002_vm10, %v9417_v12 }
 0x1e8   : > { %6911 = vmatmul.mubr.msk.bf16.gmra.mrb[8].mxu1 %vm2002_vm10, %v9258_v18 }
 0x1e9   : > { %6914 = vmatprep.mubr.msk.bf16.mxu1 %vm2002_vm10, %v9293_v31 }
 0x1eb   : > { %6805 = vmatmul.mubr.msk.bf16.gmra.mrb[16].mxu0 %vm2002_vm10, %v9562_v39 }
 0x1ec   : > { %6808 = vmatprep.mubr.msk.bf16.mxu0 %vm2002_vm10, %v9605_v6 }
 0x1f0   : > { %6915 = vmatmul.mubr.msk.bf16.gmra.mrb[12].mxu1 %vm2002_vm10, %v9480_v28 }
 0x1f1   : > { %6918 = vmatprep.mubr.msk.bf16.mxu1 %vm2002_vm10, %v9510_v27 }
 0x1f3   : > { %6809 = vmatmul.mubr.msk.bf16.gmra.mrb[20].mxu0 %vm2002_vm10, %v9688_v46 }
 0x1f4   : > { %6812 = vmatprep.mubr.msk.bf16.mxu0 %vm2002_vm10, %v9697_v50 }
 0x1f8   : > { %6919 = vmatmul.mubr.msk.bf16.gmra.mrb[16].mxu1 %vm2002_vm10, %v9648_v36 }
 0x1f9   : > { %6922 = vmatprep.mubr.msk.bf16.mxu1 %vm2002_vm10, %v9665_v32 }
 0x1fb   : > { %6813 = vmatmul.mubr.msk.bf16.gmra.mrb[24].mxu0 %vm2002_vm10, %v9742_v9 }
 0x1fc   : > { %6816 = vmatprep.mubr.msk.bf16.mxu0 %vm2002_vm10, %v9751_v55 }
 0x200   : > { %6923 = vmatmul.mubr.msk.bf16.gmra.mrb[20].mxu1 %vm2002_vm10, %v9711_v61 }
 0x201   : > { %6926 = vmatprep.mubr.msk.bf16.mxu1 %vm2002_vm10, %v9723_v60 }
 0x203   : > { %6817 = vmatmul.mubr.msk.bf16.gmra.mrb[28].mxu0 %vm2002_vm10, %v9796_v16 }
 0x204   : > { %6826 = vmatprep.mubr.msk.bf16.mxu0 %vm2002_vm10, %v11723_v3 }
 0x208   : > { %6927 = vmatmul.mubr.msk.bf16.gmra.mrb[24].mxu1 %vm2002_vm10, %v9765_v54 }
 0x209   : > { %6930 = vmatprep.mubr.msk.bf16.mxu1 %vm2002_vm10, %v9777_v17 }
 0x20b   : > { %6827 = vmatmul.mubr.msk.bf16.vlgmr.msra.gmra.mrb[0].mxu0 %vm2002_vm10, %v11724_v47 }
 0x20c   : > { %6830 = vmatprep.mubr.msk.bf16.mxu0 %vm2002_vm10, %v11725_v23 }
 0x210   : > { %6931 = vmatmul.mubr.msk.bf16.gmra.mrb[28].mxu1 %vm2002_vm10, %v9832_v0 }
 0x211   : > { %6940 = vmatprep.mubr.msk.bf16.mxu1 %vm2002_vm10, %v11727_v4 }
 0x213   : > { %6831 = vmatmul.mubr.msk.bf16.gmra.mrb[4].mxu0 %vm2002_vm10, %v11728_v41 }
 0x214   : > { %6834 = vmatprep.mubr.msk.bf16.mxu0 %vm2002_vm10, %v11729_v26 }
 0x218   : > { %6941 = vmatmul.mubr.msk.bf16.vlgmr.msra.gmra.mrb[0].mxu1 %vm2002_vm10, %v11730_v59 }
 0x219   : > { %6944 = vmatprep.mubr.msk.bf16.mxu1 %vm2002_vm10, %v11731_v19 }
 0x21b   : > { %6835 = vmatmul.mubr.msk.bf16.gmra.mrb[8].mxu0 %vm2002_vm10, %v9354_v22 }
 0x21c   : > { %6838 = vmatprep.mubr.msk.bf16.mxu0 %vm2002_vm10, %v9417_v12 }
 0x220   : > { %6945 = vmatmul.mubr.msk.bf16.gmra.mrb[4].mxu1 %vm2002_vm10, %v9258_v18  ;;  %v9967_v18 = vld [vmem:[%s11599_s3] ss:$0 sm:$0xff] }
 0x221   : > { %6948 = vmatprep.mubr.msk.bf16.mxu1 %vm2002_vm10, %v9293_v31  ;;  %v9972_v31 = vld [vmem:[%s11600_s4] ss:$0 sm:$0xff] }
 0x223   : > { %6839 = vmatmul.mubr.msk.bf16.gmra.mrb[12].mxu0 %vm2002_vm10, %v9562_v39 }
 0x224   : > { %6842 = vmatprep.mubr.msk.bf16.mxu0 %vm2002_vm10, %v9605_v6 }
 0x228   : > { %6949 = vmatmul.mubr.msk.bf16.gmra.mrb[8].mxu1 %vm2002_vm10, %v9480_v28 }
 0x229   : > { %6952 = vmatprep.mubr.msk.bf16.mxu1 %vm2002_vm10, %v9510_v27 }
 0x22b   : > { %6843 = vmatmul.mubr.msk.bf16.gmra.mrb[16].mxu0 %vm2002_vm10, %v9688_v46 }
 0x22c   : > { %6846 = vmatprep.mubr.msk.bf16.mxu0 %vm2002_vm10, %v9697_v50 }
 0x230   : > { %6953 = vmatmul.mubr.msk.bf16.gmra.mrb[12].mxu1 %vm2002_vm10, %v9648_v36 }
 0x231   : > { %6956 = vmatprep.mubr.msk.bf16.mxu1 %vm2002_vm10, %v9665_v32 }
 0x233   : > { %6847 = vmatmul.mubr.msk.bf16.gmra.mrb[20].mxu0 %vm2002_vm10, %v9742_v9 }
 0x234   : > { %6850 = vmatprep.mubr.msk.bf16.mxu0 %vm2002_vm10, %v9751_v55 }
 0x238   : > { %6957 = vmatmul.mubr.msk.bf16.gmra.mrb[16].mxu1 %vm2002_vm10, %v9711_v61 }
 0x239   : > { %6960 = vmatprep.mubr.msk.bf16.mxu1 %vm2002_vm10, %v9723_v60 }
 0x23b   : > { %6851 = vmatmul.mubr.msk.bf16.gmra.mrb[24].mxu0 %vm2002_vm10, %v9796_v16 }
 0x23c   : > { %6854 = vmatprep.mubr.msk.bf16.mxu0 %vm2002_vm10, %v9805_v48 }
 0x240   : > { %6961 = vmatmul.mubr.msk.bf16.gmra.mrb[20].mxu1 %vm2002_vm10, %v9765_v54 }
 0x241   : > { %6964 = vmatprep.mubr.msk.bf16.mxu1 %vm2002_vm10, %v9777_v17 }
 0x243   : > { %6855 = vmatmul.mubr.bf16.gmra.mrb[28].mxu0 %v11641_v43 }
 0x248   : > { %6965 = vmatmul.mubr.msk.bf16.gmra.mrb[24].mxu1 %vm2002_vm10, %v9832_v0 }
 0x249   : > { %6968 = vmatprep.mubr.msk.bf16.mxu1 %vm2002_vm10, %v9835_v33 }
 0x250   : > { %6969 = vmatmul.mubr.bf16.gmra.mrb[28].mxu1 %v11641_v43 }
 0x2de   : > { %v6828_v22 = vpop.f32.mrb[0].mxu0 }
 0x2df   : > { %v2607_v12 = vmul.f32 %v6828_v22, %v9967_v18  ;;  %v2440_v28 = vpop.f32.mrb[1].mxu0 }
 0x2e0   : > { %v2605_v27 = vmul.f32 %v9967_v18, %v2440_v28  ;;  %v6829_v39 = vpop.f32.mrb[2].mxu0 }
 0x2e1   : > { %v2645_v6 = vadd.f32 %v9972_v31, %v2607_v12  ;;  %v2608_v49 = vmul.f32 %v6829_v39, %v9967_v18  ;;  %v2443_v36 = vpop.f32.mrb[3].mxu0 }
 0x2e2   : > { %v2643_v32 = vadd.f32 %v9972_v31, %v2605_v27  ;;  %v2606_v46 = vmul.f32 %v9967_v18, %v2443_v36 }
 0x2e3   : > { %v2677_v50 = vmax.f32 %v2645_v6, 0.0  ;;  %v2646_v61 = vadd.f32 %v9972_v31, %v2608_v49 }
 0x2e4   : > { %v2675_v60 = vmax.f32 %v2643_v32, 0.0  ;;  %v2644_v9 = vadd.f32 %v9972_v31, %v2606_v46 }
 0x2e5   : > { %v2678_v55 = vmax.f32 %v2646_v61, 0.0  ;;  %v3831_v42 = vrot.slane %v2677_v50, 1 }
 0x2e6   : > { %v2676_v54 = vmax.f32 %v2644_v9, 0.0  ;;  %v6832_v17 = vpop.f32.mrb[4].mxu0  ;;  %v3830_v21 = vrot.slane %v2675_v60, 1 }
 0x2e7   : > { %v3847_v13 = vrot.slane %v2678_v55, 1  ;;  %v9982_v16 = vpack.c.bf16 %v2678_v55, %v2677_v50  ;;  %v2611_v24 = vmul.f32 %v6832_v17, %v9967_v18  ;;  %v2456_v45 = vpop.f32.mrb[5].mxu0 }
 0x2e8   : > { %v3846_v63 = vrot.slane %v2676_v54, 1  ;;  %v9985_v2 = vpack.c.bf16 %v2676_v54, %v2675_v60  ;;  %v2609_v29 = vmul.f32 %v9967_v18, %v2456_v45  ;;  %v6833_v58 = vpop.f32.mrb[6].mxu0 }
 0x2e9   : > { %11732 = vst [vmem:[#allocation7_spill] sm:$0xff] %v9982_v16  ;;  %v2649_v11 = vadd.f32 %v9972_v31, %v2611_v24  ;;  %v2612_v51 = vmul.f32 %v6833_v58, %v9967_v18  ;;  %3994 = vrot.lane.b32.xlu0 %v9982_v16, %s7545_s21  ;;  %v2459_v34 = vpop.f32.mrb[7].mxu0  ;;  %v9994_v48 = vsel %vm608_vm2, %v3831_v42, %v3847_v13 }
 0x2ea   : > { %11733 = vst [vmem:[#allocation4_spill] sm:$0xff] %v9985_v2  ;;  %v3879_v40 = vsel %vm608_vm2, %v3847_v13, %v3831_v42  ;;  %v2647_v38 = vadd.f32 %v9972_v31, %v2609_v29  ;;  %v2610_v8 = vmul.f32 %v9967_v18, %v2459_v34  ;;  %v10006_v10 = vsel %vm608_vm2, %v3830_v21, %v3846_v63 }
 0x2eb   : > { %v10002_v52 = vsel %vm575_vm3, 0.0, %v3879_v40  ;;  %v2681_v1 = vmax.f32 %v2649_v11, 0.0  ;;  %v2650_v7 = vadd.f32 %v9972_v31, %v2612_v51  ;;  %v6942_v53 = vpop.f32.mrb[0].mxu1  ;;  %v3878_v25 = vsel %vm608_vm2, %v3846_v63, %v3830_v21 }
 0x2ec   : > { %v3927_v44 = vpack.c.bf16 %v10002_v52, %v9994_v48  ;;  %v2679_v30 = vmax.f32 %v2647_v38, 0.0  ;;  %v2648_v3 = vadd.f32 %v9972_v31, %v2610_v8  ;;  %v3624_v62 = vmul.f32 %v6942_v53, %v9967_v18  ;;  %v3463_v57 = vpop.f32.mrb[1].mxu1 }
 0x2ed   : > { %v10017_v20 = vsel %vm575_vm3, 0.0, %v3878_v25  ;;  %v2682_v37 = vmax.f32 %v2650_v7, 0.0  ;;  %v3622_v14 = vmul.f32 %v9967_v18, %v3463_v57  ;;  %v6943_v0 = vpop.f32.mrb[2].mxu1  ;;  %v10028_v22 = vrot.slane %v2681_v1, 1 }
 0x2ee   : > { %v3926_v33 = vpack.c.bf16 %v10017_v20, %v10006_v10  ;;  %v2680_v56 = vmax.f32 %v2648_v3, 0.0  ;;  %v3656_v47 = vadd.f32 %v9972_v31, %v3624_v62  ;;  %v3625_v23 = vmul.f32 %v6943_v0, %v9967_v18  ;;  %v6836_v35 = vpop.f32.mrb[8].mxu0  ;;  %v3466_v4 = vpop.f32.mrb[3].mxu1 }
 0x2ef   : > { %v10024_v41 = vpack.c.bf16 %v2682_v37, %v2681_v1  ;;  %v3654_v26 = vadd.f32 %v9972_v31, %v3622_v14  ;;  %v2615_v59 = vmul.f32 %v6836_v35, %v9967_v18  ;;  %v2472_v19 = vpop.f32.mrb[9].mxu0  ;;  %v10030_v12 = vrot.slane %v2679_v30, 1 }
 0x2f0   : > { %v10032_v28 = vpack.c.bf16 %v2680_v56, %v2679_v30  ;;  %v3657_v27 = vadd.f32 %v9972_v31, %v3625_v23  ;;  %v6837_v39 = vpop.f32.mrb[10].mxu0  ;;  %v3688_v6 = vmax.f32 %v3656_v47, 0.0  ;;  %v3623_v36 = vmul.f32 %v9967_v18, %v3466_v4 }
 0x2f1   : > { %11734 = vst [vmem:[#allocation3_spill] sm:$0xff] %v10024_v41  ;;  %v2653_v49 = vadd.f32 %v9972_v31, %v2615_v59  ;;  %v2613_v32 = vmul.f32 %v9967_v18, %v2472_v19  ;;  %v2475_v46 = vpop.f32.mrb[11].mxu0  ;;  %v10038_v50 = vrot.slane %v2682_v37, 1  ;;  %v2616_v60 = vmul.f32 %v6837_v39, %v9967_v18 }
 0x2f2   : > { %11735 = vst [vmem:[#allocation8_spill] sm:$0xff] %v10032_v28  ;;  %v3689_v61 = vmax.f32 %v3657_v27, 0.0  ;;  %v2614_v9 = vmul.f32 %v9967_v18, %v2475_v46  ;;  %v10042_v55 = vrot.slane %v2680_v56, 1  ;;  %v3686_v54 = vmax.f32 %v3654_v26, 0.0 }
 0x2f3   : > { %v3655_v17 = vadd.f32 %v9972_v31, %v3623_v36  ;;  %v2651_v42 = vadd.f32 %v9972_v31, %v2613_v32  ;;  %v6946_v13 = vpop.f32.mrb[4].mxu1  ;;  %v2685_v45 = vmax.f32 %v2653_v49, 0.0  ;;  %v2654_v21 = vadd.f32 %v9972_v31, %v2616_v60 }
 0x2f4   : > { %v3959_v24 = vpack.c.bf16 %v3689_v61, %v3688_v6  ;;  %v2652_v63 = vadd.f32 %v9972_v31, %v2614_v9  ;;  %v3479_v29 = vpop.f32.mrb[5].mxu1  ;;  %v10048_v58 = vrot.slane %v3688_v6, 7  ;;  %v3628_v34 = vmul.f32 %v6946_v13, %v9967_v18 }
 0x2f5   : > { %v3687_v11 = vmax.f32 %v3655_v17, 0.0  ;;  %v2683_v51 = vmax.f32 %v2651_v42, 0.0  ;;  %v6947_v40 = vpop.f32.mrb[6].mxu1  ;;  %v2686_v38 = vmax.f32 %v2654_v21, 0.0  ;;  %v3626_v1 = vmul.f32 %v9967_v18, %v3479_v29 }
 0x2f6   : > { %v2684_v8 = vmax.f32 %v2652_v63, 0.0  ;;  %v3629_v7 = vmul.f32 %v6947_v40, %v9967_v18  ;;  %v6840_v53 = vpop.f32.mrb[12].mxu0  ;;  %4845 = vrot.lane.b32.xlu0 %v3959_v24, %s7545_s21  ;;  %v3482_v25 = vpop.f32.mrb[7].mxu1  ;;  %v10054_v30 = vrot.slane %v3686_v54, 7  ;;  %v10056_v3 = vrot.slane %v3689_v61, 7 }
 0x2f7   : > { %v3958_v62 = vpack.c.bf16 %v3687_v11, %v3686_v54  ;;  %v3660_v57 = vadd.f32 %v9972_v31, %v3628_v34  ;;  %v2488_v37 = vpop.f32.mrb[13].mxu0  ;;  %v10059_v14 = vrot.slane %v2685_v45, 1  ;;  %v10061_v0 = vrot.slane %v3687_v11, 7 }
 0x2f8   : > { %v10063_v56 = vpack.c.bf16 %v2686_v38, %v2685_v45  ;;  %v10065_v47 = vpack.c.bf16 %v2684_v8, %v2683_v51  ;;  %v6841_v23 = vpop.f32.mrb[14].mxu0  ;;  %v3658_v4 = vadd.f32 %v9972_v31, %v3626_v1  ;;  %v3661_v26 = vadd.f32 %v9972_v31, %v3629_v7 }
 0x2f9   : > { %v3692_v35 = vmax.f32 %v3660_v57, 0.0  ;;  %v2619_v59 = vmul.f32 %v6840_v53, %v9967_v18  ;;  %4843 = vrot.lane.b32.xlu1 %v3958_v62, %s7545_s21  ;;  %v2491_v19 = vpop.f32.mrb[15].mxu0  ;;  %v3627_v27 = vmul.f32 %v9967_v18, %v3482_v25  ;;  %v2617_v39 = vmul.f32 %v9967_v18, %v2488_v37 }
 0x2fa   : > { %11736 = vst [vmem:[#allocation6_spill] sm:$0xff] %v10063_v56  ;;  %11737 = vst [vmem:[#allocation5_spill] sm:$0xff] %v10065_v47  ;;  %v2620_v6 = vmul.f32 %v6841_v23, %v9967_v18  ;;  %v2618_v49 = vmul.f32 %v9967_v18, %v2491_v19  ;;  %4042 = vrot.lane.b32.xlu0 %v3959_v24, %s7549_s24  ;;  %v10076_v36 = vrot.slane %v2683_v51, 1  ;;  %v3690_v32 = vmax.f32 %v3658_v4, 0.0 }
 0x2fb   : > { %v3693_v46 = vmax.f32 %v3661_v26, 0.0  ;;  %v2657_v61 = vadd.f32 %v9972_v31, %v2619_v59  ;;  %v6950_v60 = vpop.f32.mrb[8].mxu1  ;;  %v3659_v9 = vadd.f32 %v9972_v31, %v3627_v27  ;;  %v2655_v54 = vadd.f32 %v9972_v31, %v2617_v39 }
 0x2fc   : > { %v2658_v17 = vadd.f32 %v9972_v31, %v2620_v6  ;;  %v2656_v42 = vadd.f32 %v9972_v31, %v2618_v49  ;;  %v3495_v13 = vpop.f32.mrb[9].mxu1  ;;  %v10083_v45 = vrot.slane %v2686_v38, 1  ;;  %v10085_v21 = vrot.slane %v2684_v8, 1 }
 0x2fd   : > { %v10087_v24 = vpack.c.bf16 %v3693_v46, %v3692_v35  ;;  %v2689_v63 = vmax.f32 %v2657_v61, 0.0  ;;  %4040 = vrot.lane.b32.xlu1 %v3958_v62, %s7549_s24  ;;  %v6951_v29 = vpop.f32.mrb[10].mxu1  ;;  %v10090_v11 = vrot.slane %v3692_v35, 7  ;;  %v3691_v51 = vmax.f32 %v3659_v9, 0.0 }
 0x2fe   : > { %v2690_v34 = vmax.f32 %v2658_v17, 0.0  ;;  %v2688_v40 = vmax.f32 %v2656_v42, 0.0  ;;  %v6844_v1 = vpop.f32.mrb[16].mxu0  ;;  %3992 = vrot.lane.b32.xlu0 %v9985_v2, %s7545_s21  ;;  %v3498_v7 = vpop.f32.mrb[11].mxu1  ;;  %v2687_v38 = vmax.f32 %v2655_v54, 0.0  ;;  %v3632_v8 = vmul.f32 %v6950_v60, %v9967_v18 }
 0x2ff   : > { %11738 = vst [vmem:[#allocation20_spill] sm:$0xff] %v10090_v11  ;;  %v3630_v53 = vmul.f32 %v9967_v18, %v3495_v13  ;;  %v3633_v25 = vmul.f32 %v6951_v29, %v9967_v18  ;;  %v2504_v57 = vpop.f32.mrb[17].mxu0  ;;  %v10097_v62 = vrot.slane %v3690_v32, 7  ;;  %v10099_v37 = vrot.slane %v3693_v46, 7 }
 0x300   : > { %v10101_v23 = vrot.slane %v2689_v63, 1  ;;  %v10103_v35 = vpack.c.bf16 %v3691_v51, %v3690_v32  ;;  %v6845_v4 = vpop.f32.mrb[18].mxu0  ;;  %v10105_v26 = vrot.slane %v3691_v51, 7  ;;  %v10107_v59 = vpack.c.bf16 %v2690_v34, %v2689_v63 }
 0x301   : > { %11739 = vst [vmem:[#allocation14_spill] sm:$0xff] %v10097_v62  ;;  %11740 = vst [vmem:[#allocation11_spill] sm:$0xff] %v10099_v37  ;;  %v10109_v19 = vpack.c.bf16 %v2688_v40, %v2687_v38  ;;  %v3664_v27 = vadd.f32 %v9972_v31, %v3632_v8  ;;  %4893 = vrot.lane.b32.xlu1 %v3927_v44, %s7549_s24  ;;  %v2507_v39 = vpop.f32.mrb[19].mxu0  ;;  %v3662_v6 = vadd.f32 %v9972_v31, %v3630_v53 }
 0x302   : > { %11741 = vst [vmem:[#allocation22_spill] sm:$0xff] %v10105_v26  ;;  %11742 = vst [vmem:[#allocation19_spill] sm:$0xff] %v10107_v59  ;;  %v3665_v49 = vadd.f32 %v9972_v31, %v3633_v25  ;;  %v2623_v32 = vmul.f32 %v6844_v1, %v9967_v18  ;;  %v3631_v46 = vmul.f32 %v9967_v18, %v3498_v7  ;;  %3998 = vrot.lane.b32.xlu0 %v10024_v41, %s7545_s21 }
 0x303   : > { %v3696_v61 = vmax.f32 %v3664_v27, 0.0  ;;  %v2621_v60 = vmul.f32 %v9967_v18, %v2504_v57  ;;  %v2624_v9 = vmul.f32 %v6845_v4, %v9967_v18  ;;  %v2622_v48 = vmul.f32 %v9967_v18, %v2507_v39  ;;  %v6954_v52 = vpop.f32.mrb[12].mxu1 }
 0x304   : > { %v10125_v44 = vrot.slane %v2687_v38, 1  ;;  %v3697_v54 = vmax.f32 %v3665_v49, 0.0  ;;  %v2661_v17 = vadd.f32 %v9972_v31, %v2623_v32  ;;  %v3663_v42 = vadd.f32 %v9972_v31, %v3631_v46  ;;  %v3511_v13 = vpop.f32.mrb[13].mxu1 }
 0x305   : > { %v3694_v63 = vmax.f32 %v3662_v6, 0.0  ;;  %v2659_v29 = vadd.f32 %v9972_v31, %v2621_v60  ;;  %v2662_v51 = vadd.f32 %v9972_v31, %v2624_v9  ;;  %v2660_v1 = vadd.f32 %v9972_v31, %v2622_v48  ;;  %4891 = vrot.lane.b32.xlu1 %v3926_v33, %s7549_s24  ;;  %v6955_v7 = vpop.f32.mrb[14].mxu1 }
 0x306   : > { %v10136_v38 = vrot.slane %v2690_v34, 1  ;;  %v10138_v8 = vrot.slane %v2688_v40, 1  ;;  %v10140_v53 = vpack.c.bf16 %v3697_v54, %v3696_v61  ;;  %v2693_v25 = vmax.f32 %v2661_v17, 0.0  ;;  %v6848_v57 = vpop.f32.mrb[20].mxu0  ;;  %4849 = vrot.lane.b32.xlu0 %v10087_v24, %s7545_s21  ;;  %v3514_v4 = vpop.f32.mrb[15].mxu1 }
 0x307   : > { %v10144_v27 = vrot.slane %v3696_v61, 7  ;;  %v3695_v39 = vmax.f32 %v3663_v42, 0.0  ;;  %v2694_v6 = vmax.f32 %v2662_v51, 0.0  ;;  %v2692_v49 = vmax.f32 %v2660_v1, 0.0  ;;  %v2520_v10 = vpop.f32.mrb[21].mxu0 }
 0x308   : > { %v2691_v20 = vmax.f32 %v2659_v29, 0.0  ;;  %v3636_v33 = vmul.f32 %v6954_v52, %v9967_v18  ;;  %v3634_v34 = vmul.f32 %v9967_v18, %v3511_v13  ;;  %v3637_v40 = vmul.f32 %v6955_v7, %v9967_v18  ;;  %v6849_v32 = vpop.f32.mrb[22].mxu0 }
 0x309   : > { %11743 = vst [vmem:[#allocation17_spill] sm:$0xff] %v10144_v27  ;;  %v10149_v46 = vrot.slane %v3694_v63, 7  ;;  %v10151_v60 = vrot.slane %v3697_v54, 7  ;;  %v10153_v9 = vrot.slane %v2693_v25, 1  ;;  %v10155_v61 = vpack.c.bf16 %v3695_v39, %v3694_v63  ;;  %4847 = vrot.lane.b32.xlu1 %v10103_v35, %s7545_s21  ;;  %v2523_v48 = vpop.f32.mrb[23].mxu0  ;;  %v11764_v15 = vld [vmem:[#allocation22_spill] sm:$0xff] }
 0x30a   : > { %v10159_v17 = vrot.slane %v3695_v39, 7  ;;  %v10161_v52 = vpack.c.bf16 %v2694_v6, %v2693_v25  ;;  %v10163_v42 = vpack.c.bf16 %v2692_v49, %v2691_v20  ;;  %v3668_v13 = vadd.f32 %v9972_v31, %v3636_v33  ;;  %4046 = vrot.lane.b32.xlu0 %v10087_v24, %s7549_s24 }
 0x30b   : > { %11744 = vst [vmem:[#allocation9_spill] sm:$0xff] %v10149_v46  ;;  %11745 = vst [vmem:[#allocation10_spill] sm:$0xff] %v10151_v60  ;;  %v3666_v54 = vadd.f32 %v9972_v31, %v3634_v34  ;;  %v3669_v63 = vadd.f32 %v9972_v31, %v3637_v40  ;;  %v2627_v29 = vmul.f32 %v6848_v57, %v9967_v18  ;;  %v6958_v1 = vpop.f32.mrb[16].mxu1  ;;  %v10175_v41 = vrot.slane %v2691_v20, 1 }
 0x30c   : > { %11746 = vst [vmem:[#allocation15_spill] sm:$0xff] %v10159_v17  ;;  %11747 = vst [vmem:[#allocation16_spill] sm:$0xff] %v10161_v52  ;;  %v3635_v51 = vmul.f32 %v9967_v18, %v3514_v4  ;;  %v3700_v7 = vmax.f32 %v3668_v13, 0.0  ;;  %v2625_v25 = vmul.f32 %v9967_v18, %v2520_v10  ;;  %v2628_v39 = vmul.f32 %v6849_v32, %v9967_v18  ;;  %v3527_v33 = vpop.f32.mrb[17].mxu1 }
 0x30d   : > { %v2626_v43 = vmul.f32 %v9967_v18, %v2523_v48  ;;  %v3701_v24 = vmax.f32 %v3669_v63, 0.0  ;;  %v2665_v34 = vadd.f32 %v9972_v31, %v2627_v29  ;;  %4044 = vrot.lane.b32.xlu1 %v10103_v35, %s7549_s24  ;;  %v6959_v57 = vpop.f32.mrb[18].mxu1  ;;  %v3698_v4 = vmax.f32 %v3666_v54, 0.0 }
 0x30e   : > { %v3667_v40 = vadd.f32 %v9972_v31, %v3635_v51  ;;  %v2663_v13 = vadd.f32 %v9972_v31, %v2625_v25  ;;  %v2666_v10 = vadd.f32 %v9972_v31, %v2628_v39  ;;  %v6852_v48 = vpop.f32.mrb[24].mxu0  ;;  %3996 = vrot.lane.b32.xlu0 %v10032_v28, %s7545_s21  ;;  %v3530_v20 = vpop.f32.mrb[19].mxu1  ;;  %v10186_v63 = vrot.slane %v2694_v6, 1 }
 0x30f   : > { %v2664_v32 = vadd.f32 %v9972_v31, %v2626_v43  ;;  %v10188_v29 = vrot.slane %v2692_v49, 1  ;;  %v10190_v51 = vpack.c.bf16 %v3701_v24, %v3700_v7  ;;  %v2697_v35 = vmax.f32 %v2665_v34, 0.0  ;;  %v2536_v16 = vpop.f32.mrb[25].mxu0 }
 0x310   : > { %v10192_v54 = vrot.slane %v3700_v7, 7  ;;  %v3699_v25 = vmax.f32 %v3667_v40, 0.0  ;;  %v2698_v2 = vmax.f32 %v2666_v10, 0.0  ;;  %v6853_v46 = vpop.f32.mrb[26].mxu0  ;;  %v2695_v43 = vmax.f32 %v2663_v13, 0.0 }
 0x311   : > { %v2696_v39 = vmax.f32 %v2664_v32, 0.0  ;;  %v3640_v17 = vmul.f32 %v6958_v1, %v9967_v18  ;;  %v3638_v28 = vmul.f32 %v9967_v18, %v3527_v33  ;;  %v3641_v6 = vmul.f32 %v6959_v57, %v9967_v18  ;;  %v2539_v27 = vpop.f32.mrb[27].mxu0 }
 0x312   : > { %11748 = vst [vmem:[#allocation12_spill] sm:$0xff] %v10192_v54  ;;  %v10197_v49 = vrot.slane %v3698_v4, 7  ;;  %v10199_v60 = vrot.slane %v3701_v24, 7  ;;  %v10201_v34 = vrot.slane %v2697_v35, 1  ;;  %v10203_v7 = vpack.c.bf16 %v3699_v25, %v3698_v4  ;;  %4002 = vrot.lane.b32.xlu0 %v10063_v56, %s7545_s21 }
 0x313   : > { %v10207_v40 = vrot.slane %v3699_v25, 7  ;;  %v10209_v13 = vpack.c.bf16 %v2698_v2, %v2697_v35  ;;  %v10211_v1 = vpack.c.bf16 %v2696_v39, %v2695_v43  ;;  %v3672_v33 = vadd.f32 %v9972_v31, %v3640_v17  ;;  %v6962_v57 = vpop.f32.mrb[20].mxu1 }
 0x314   : > { %11749 = vst [vmem:[#allocation13_spill] sm:$0xff] %v10197_v49  ;;  %11750 = vst [vmem:[#allocation21_spill] sm:$0xff] %v10199_v60  ;;  %v3670_v10 = vadd.f32 %v9972_v31, %v3638_v28  ;;  %v3673_v24 = vadd.f32 %v9972_v31, %v3641_v6  ;;  %v2631_v32 = vmul.f32 %v6852_v48, %v9967_v18  ;;  %v3543_v49 = vpop.f32.mrb[21].mxu1 }
 0x315   : > { %11751 = vst [vmem:[#allocation23_spill] sm:$0xff] %v10207_v40  ;;  %11752 = vst [vmem:[#allocation2_spill] sm:$0xff] %v10209_v13  ;;  %v3639_v4 = vmul.f32 %v9967_v18, %v3530_v20  ;;  %v3704_v54 = vmax.f32 %v3672_v33, 0.0  ;;  %v2629_v25 = vmul.f32 %v9967_v18, %v2536_v16  ;;  %v3865_v35 = vsel %vm608_vm2, %v10028_v22, %v10038_v50  ;;  %v6963_v17 = vpop.f32.mrb[22].mxu1 }
 0x316   : > { %11753 = vst [vmem:[#allocation18_spill] sm:$0xff] %v10211_v1  ;;  %v3881_v28 = vsel %vm608_vm2, %v10038_v50, %v10028_v22  ;;  %v3702_v6 = vmax.f32 %v3670_v10, 0.0  ;;  %v3705_v56 = vmax.f32 %v3673_v24, 0.0  ;;  %v2669_v48 = vadd.f32 %v9972_v31, %v2631_v32  ;;  %v6856_v33 = vpop.f32.mrb[28].mxu0  ;;  %4853 = vrot.lane.b32.xlu0 %v10140_v53, %s7545_s21  ;;  %v3546_v16 = vpop.f32.mrb[23].mxu1 }
 0x317   : > { %v3671_v20 = vadd.f32 %v9972_v31, %v3639_v4  ;;  %v10231_v1 = vrot.slane %v2695_v43, 1  ;;  %v2667_v40 = vadd.f32 %v9972_v31, %v2629_v25  ;;  %v3901_v60 = vsel %vm575_vm3, 0.0, %v3881_v28  ;;  %v2552_v50 = vpop.f32.mrb[29].mxu0 }
 0x318   : > { %v2632_v22 = vmul.f32 %v6853_v46, %v9967_v18  ;;  %v10237_v10 = vrot.slane %v2698_v2, 1  ;;  %v10239_v24 = vrot.slane %v2696_v39, 1  ;;  %v10241_v32 = vrot.slane %v3704_v54, 7  ;;  %v6857_v13 = vpop.f32.mrb[30].mxu0 }
 0x319   : > { %v10243_v4 = vpack.c.bf16 %v3705_v56, %v3704_v54  ;;  %v2701_v62 = vmax.f32 %v2669_v48, 0.0  ;;  %v3703_v43 = vmax.f32 %v3671_v20, 0.0  ;;  %v3929_v26 = vpack.c.bf16 %v3901_v60, %v3865_v35  ;;  %v2555_v11 = vpop.f32.mrb[31].mxu0 }
 0x31a   : > { %v2670_v25 = vadd.f32 %v9972_v31, %v2632_v22  ;;  %v10246_v37 = vrot.slane %v3702_v6, 7  ;;  %v2630_v46 = vmul.f32 %v9967_v18, %v2539_v27  ;;  %v3864_v2 = vsel %vm608_vm2, %v10030_v12, %v10042_v55  ;;  %4050 = vrot.lane.b32.xlu0 %v10140_v53, %s7549_s24 }
 0x31b   : > { %v3880_v54 = vsel %vm608_vm2, %v10042_v55, %v10030_v12  ;;  %v10259_v60 = vrot.slane %v3705_v56, 7  ;;  %v10261_v39 = vpack.c.bf16 %v3703_v43, %v3702_v6  ;;  %v2699_v35 = vmax.f32 %v2667_v40, 0.0  ;;  %4897 = vrot.lane.b32.xlu1 %v3929_v26, %s7549_s24  ;;  %v6966_v28 = vpop.f32.mrb[24].mxu1 }
 0x31c   : > { %v2702_v27 = vmax.f32 %v2670_v25, 0.0  ;;  %v2668_v48 = vadd.f32 %v9972_v31, %v2630_v46  ;;  %v3899_v20 = vsel %vm575_vm3, 0.0, %v3880_v54  ;;  %v3644_v22 = vmul.f32 %v6962_v57, %v9967_v18  ;;  %v3559_v55 = vpop.f32.mrb[25].mxu1 }
 0x31d   : > { %11754 = vst [vmem:[#allocation24_spill] sm:$0xff] %v10261_v39  ;;  %v3642_v12 = vmul.f32 %v9967_v18, %v3543_v49  ;;  %v10269_v53 = vrot.slane %v2701_v62, 1  ;;  %v3928_v6 = vpack.c.bf16 %v3899_v20, %v3864_v2  ;;  %v3645_v40 = vmul.f32 %v6963_v17, %v9967_v18  ;;  %v6967_v26 = vpop.f32.mrb[26].mxu1 }
 0x31e   : > { %v10271_v56 = vpack.c.bf16 %v2702_v27, %v2701_v62  ;;  %v2700_v25 = vmax.f32 %v2668_v48, 0.0  ;;  %v3676_v39 = vadd.f32 %v9972_v31, %v3644_v22  ;;  %v2635_v54 = vmul.f32 %v6856_v33, %v9967_v18  ;;  %4000 = vrot.lane.b32.xlu0 %v10065_v47, %s7545_s21  ;;  %v3562_v49 = vpop.f32.mrb[27].mxu1 }
 0x31f   : > { %v3674_v46 = vadd.f32 %v9972_v31, %v3642_v12  ;;  %4895 = vrot.lane.b32.xlu1 %v3928_v6, %s7549_s24  ;;  %v3677_v62 = vadd.f32 %v9972_v31, %v3645_v40  ;;  %v3643_v57 = vmul.f32 %v9967_v18, %v3546_v16  ;;  %v2633_v17 = vmul.f32 %v9967_v18, %v2552_v50 }
 0x320   : > { %11755 = vst [vmem:[#allocation25_spill] sm:$0xff] %v10271_v56  ;;  %v2636_v2 = vmul.f32 %v6857_v13, %v9967_v18  ;;  %v10284_v48 = vrot.slane %v3703_v43, 7  ;;  %v10286_v20 = vrot.slane %v2699_v35, 1  ;;  %v10288_v22 = vpack.c.bf16 %v2700_v25, %v2699_v35 }
 0x321   : > { %v3708_v33 = vmax.f32 %v3676_v39, 0.0  ;;  %v3706_v12 = vmax.f32 %v3674_v46, 0.0  ;;  %v3709_v47 = vmax.f32 %v3677_v62, 0.0  ;;  %v2673_v56 = vadd.f32 %v9972_v31, %v2635_v54 }
 0x322   : > { %11756 = vst [vmem:[#allocation26_spill] sm:$0xff] %v10288_v22  ;;  %v3675_v6 = vadd.f32 %v9972_v31, %v3643_v57  ;;  %v10292_v40 = vrot.slane %v2702_v27, 1  ;;  %v2671_v16 = vadd.f32 %v9972_v31, %v2633_v17  ;;  %v2674_v50 = vadd.f32 %v9972_v31, %v2636_v2  ;;  %4006 = vrot.lane.b32.xlu0 %v10107_v59, %s7545_s21 }
 0x323   : > { %v2634_v13 = vmul.f32 %v9967_v18, %v2555_v11  ;;  %v10299_v43 = vrot.slane %v2700_v25, 1  ;;  %v10301_v39 = vpack.c.bf16 %v3709_v47, %v3708_v33  ;;  %v2705_v35 = vmax.f32 %v2673_v56, 0.0  ;;  %4851 = vrot.lane.b32.xlu1 %v10155_v61, %s7545_s21  ;;  %v6970_v27 = vpop.f32.mrb[28].mxu1 }
 0x324   : > { %v3707_v46 = vmax.f32 %v3675_v6, 0.0  ;;  %v10305_v54 = vrot.slane %v3708_v33, 7  ;;  %v2706_v62 = vmax.f32 %v2674_v50, 0.0  ;;  %v3648_v11 = vmul.f32 %v6966_v28, %v9967_v18  ;;  %v3575_v17 = vpop.f32.mrb[29].mxu1 }
 0x325   : > { %11757 = vst [vmem:[#allocation27_spill] sm:$0xff] %v10301_v39  ;;  %v2672_v57 = vadd.f32 %v9972_v31, %v2634_v13  ;;  %v10309_v2 = vrot.slane %v3706_v12, 7  ;;  %v10311_v25 = vrot.slane %v3709_v47, 7  ;;  %v3646_v56 = vmul.f32 %v9967_v18, %v3559_v55  ;;  %v6971_v6 = vpop.f32.mrb[30].mxu1 }
 0x326   : > { %v10313_v59 = vpack.c.bf16 %v3707_v46, %v3706_v12  ;;  %v10316_v22 = vrot.slane %v2705_v35, 1  ;;  %v2703_v39 = vmax.f32 %v2671_v16, 0.0  ;;  %v10318_v33 = vpack.c.bf16 %v2706_v62, %v2705_v35  ;;  %4857 = vrot.lane.b32.xlu0 %v10190_v51, %s7545_s21  ;;  %v3578_v28 = vpop.f32.mrb[31].mxu1 }
 0x327   : > { %11758 = vst [vmem:[#allocation28_spill] sm:$0xff] %v10309_v2  ;;  %v2704_v50 = vmax.f32 %v2672_v57, 0.0  ;;  %4048 = vrot.lane.b32.xlu1 %v10155_v61, %s7549_s24  ;;  %v3680_v47 = vadd.f32 %v9972_v31, %v3648_v11  ;;  %v3678_v12 = vadd.f32 %v9972_v31, %v3646_v56  ;;  %v3649_v55 = vmul.f32 %v6967_v26, %v9967_v18  ;;  %v11782_v5 = vld [vmem:[#allocation25_spill] sm:$0xff] }
 0x328   : > { %11759 = vst [vmem:[#allocation29_spill] sm:$0xff] %v10313_v59  ;;  %11760 = vst [vmem:[#allocation30_spill] sm:$0xff] %v10318_v33  ;;  %v3647_v13 = vmul.f32 %v9967_v18, %v3562_v49  ;;  %v10328_v59 = vrot.slane %v3707_v46, 7  ;;  %v3867_v35 = vsel %vm608_vm2, %v10059_v14, %v10083_v45  ;;  %v3883_v61 = vsel %vm608_vm2, %v10083_v45, %v10059_v14 }
 0x329   : > { %v10330_v16 = vpack.c.bf16 %v2704_v50, %v2703_v39  ;;  %v3712_v57 = vmax.f32 %v3680_v47, 0.0  ;;  %v3710_v11 = vmax.f32 %v3678_v12, 0.0  ;;  %v3681_v26 = vadd.f32 %v9972_v31, %v3649_v55 }
 0x32a   : > { %v3679_v49 = vadd.f32 %v9972_v31, %v3647_v13  ;;  %v3905_v46 = vsel %vm575_vm3, 0.0, %v3883_v61  ;;  %v3866_v56 = vsel %vm608_vm2, %v10076_v36, %v10085_v21  ;;  %v3652_v14 = vmul.f32 %v6970_v27, %v9967_v18  ;;  %4054 = vrot.lane.b32.xlu0 %v10190_v51, %s7549_s24 }
 0x32b   : > { %11761 = vst [vmem:[#allocation31_spill] sm:$0xff] %v10330_v16  ;;  %v3882_v16 = vsel %vm608_vm2, %v10085_v21, %v10076_v36  ;;  %v10355_v45 = vrot.slane %v2703_v39, 1  ;;  %v10357_v47 = vrot.slane %v2706_v62, 1  ;;  %v3713_v12 = vmax.f32 %v3681_v26, 0.0 }
 0x32c   : > { %v3711_v55 = vmax.f32 %v3679_v49, 0.0  ;;  %v3931_v13 = vpack.c.bf16 %v3905_v46, %v3867_v35  ;;  %v3903_v61 = vsel %vm575_vm3, 0.0, %v3882_v16  ;;  %v3684_v33 = vadd.f32 %v9972_v31, %v3652_v14 }
 0x32d   : > { %v3650_v2 = vmul.f32 %v9967_v18, %v3575_v17  ;;  %v10363_v36 = vrot.slane %v2704_v50, 1  ;;  %v10365_v21 = vrot.slane %v3712_v57, 7  ;;  %v10367_v27 = vpack.c.bf16 %v3713_v12, %v3712_v57 }
 0x32e   : > { %v10369_v51 = vpack.c.bf16 %v3711_v55, %v3710_v11  ;;  %v10371_v39 = vrot.slane %v3710_v11, 7  ;;  %4901 = vrot.lane.b32.xlu1 %v3931_v13, %s7549_s24  ;;  %v3930_v62 = vpack.c.bf16 %v3903_v61, %v3866_v56  ;;  %v3653_v16 = vmul.f32 %v6971_v6, %v9967_v18  ;;  %4004 = vrot.lane.b32.xlu0 %v10109_v19, %s7545_s21 }
 0x32f   : > { %v3682_v35 = vadd.f32 %v9972_v31, %v3650_v2  ;;  %v3651_v17 = vmul.f32 %v9967_v18, %v3578_v28  ;;  %v10383_v50 = vsel %vm608_vm2, %v10101_v23, %v10136_v38  ;;  %v3885_v57 = vsel %vm608_vm2, %v10136_v38, %v10101_v23 }
 0x330   : > { %v10393_v2 = vsel %vm608_vm2, %v10125_v44, %v10138_v8  ;;  %v10395_v6 = vrot.slane %v3713_v12, 7  ;;  %v3716_v18 = vmax.f32 %v3684_v33, 0.0  ;;  %v10398_v28 = vadd.f32 %v9972_v31, %v3653_v16 }
 0x331   : > { %v10402_v11 = vsel %vm575_vm3, 0.0, %v3885_v57  ;;  %v10405_v26 = vadd.f32 %v9972_v31, %v3651_v17  ;;  %v3884_v38 = vsel %vm608_vm2, %v10138_v8, %v10125_v44  ;;  %v10417_v33 = vsel %vm608_vm2, %v10153_v9, %v10186_v63 }
 0x332   : > { %v3933_v23 = vpack.c.bf16 %v10402_v11, %v10383_v50  ;;  %4899 = vrot.lane.b32.xlu1 %v3930_v62, %s7549_s24  ;;  %v3714_v49 = vmax.f32 %v3682_v35, 0.0  ;;  %v3717_v31 = vmax.f32 %v10398_v28, 0.0  ;;  %4010 = vrot.lane.b32.xlu0 %v10161_v52, %s7545_s21  ;;  %v10425_v46 = vsel %vm575_vm3, 0.0, %v3884_v38  ;;  %v11767_v50 = vld [vmem:[#allocation17_spill] sm:$0xff]  ;;  %v11778_v28 = vld [vmem:[#allocation28_spill] sm:$0xff] }
 0x333   : > { %v3887_v44 = vsel %vm608_vm2, %v10186_v63, %v10153_v9  ;;  %v11672_v8 = vmax.f32 %v10405_v26, 0.0  ;;  %v3932_v56 = vpack.c.bf16 %v10425_v46, %v10393_v2  ;;  %v10442_v12 = vsel %vm608_vm2, %v10175_v41, %v10188_v29  ;;  %v11772_v63 = vld [vmem:[#allocation12_spill] sm:$0xff] }
 0x334   : > { %v10436_v14 = vsel %vm575_vm3, 0.0, %v3887_v44  ;;  %v10444_v13 = vrot.slane %v3711_v55, 7  ;;  %v10448_v9 = vpack.c.bf16 %v3717_v31, %v3716_v18  ;;  %v3886_v61 = vsel %vm608_vm2, %v10188_v29, %v10175_v41 }
 0x335   : > { %v10456_v62 = vrot.slane %v3716_v18, 7  ;;  %v10460_v35 = vpack.c.bf16 %v11672_v8, %v3714_v49  ;;  %v10464_v55 = vsel %vm575_vm3, 0.0, %v3886_v61  ;;  %v10470_v16 = vsel %vm608_vm2, %v10201_v34, %v10237_v10 }
 0x336   : > { %v10472_v17 = vrot.slane %v3714_v49, 7  ;;  %4855 = vrot.lane.b32.xlu1 %v10203_v7, %s7545_s21  ;;  %4861 = vrot.lane.b32.xlu0 %v10243_v4, %s7545_s21  ;;  %v3889_v29 = vsel %vm608_vm2, %v10237_v10, %v10201_v34  ;;  %v10488_v57 = vsel %vm608_vm2, %v10231_v1, %v10239_v24  ;;  %v3888_v38 = vsel %vm608_vm2, %v10239_v24, %v10231_v1  ;;  %v7500_v49 = vld [vmem:[%s11601_s5 + $0x8] sm:$0x3f]  }
 0x337   : > { %v10492_v18 = vsel %vm575_vm3, 0.0, %v3889_v29  ;;  %v10502_v34 = vsel %vm461_vm1, %v10048_v58, %v10056_v3  ;;  %v3767_v10 = vsel %vm461_vm1, %v10056_v3, %v10048_v58  ;;  %v10515_v1 = vsel %vm575_vm3, 0.0, %v3888_v38  ;;  %7438 = vmatprep.subr.msk.bf16.mxu0 %vm4195_vm11, %v7500_v49  ;;  %7441 = vmatprep.subr.msk.bf16.mxu1 %vm4195_vm11, %v7500_v49  ;;  %v11769_v3 = vld [vmem:[#allocation9_spill] sm:$0xff] }
 0x338   : > { %v10519_v24 = vsel %vm427_vm0, 0.0, %v3767_v10  ;;  %v10525_v58 = vsel %vm608_vm2, %v10269_v53, %v10292_v40  ;;  %v3891_v29 = vsel %vm608_vm2, %v10292_v40, %v10269_v53  ;;  %v10539_v38 = vsel %vm608_vm2, %v10286_v20, %v10299_v43 }
 0x339   : > { %v10547_v10 = vsel %vm575_vm3, 0.0, %v3891_v29  ;;  %v3890_v53 = vsel %vm608_vm2, %v10299_v43, %v10286_v20  ;;  %v10557_v40 = vsel %vm608_vm2, %v10355_v45, %v10363_v36  ;;  %v4197_v20 = vsel %vm4195_vm11, %v7500_v49, 0  ;;  %v11762_v49 = vld [vmem:[#allocation11_spill] sm:$0xff]  ;;  %v11763_v29 = vld [vmem:[#allocation20_spill] sm:$0xff] }
 0x33a   : > { %4052 = vrot.lane.b32.xlu1 %v10203_v7, %s7549_s24  ;;  %4058 = vrot.lane.b32.xlu0 %v10243_v4, %s7549_s24  ;;  %v10563_v4 = vsel %vm575_vm3, 0.0, %v3890_v53  ;;  %v3892_v43 = vsel %vm608_vm2, %v10363_v36, %v10355_v45  ;;  %v10582_v61 = vsel %vm461_vm1, %v10054_v30, %v10061_v0  ;;  %v3766_v45 = vsel %vm461_vm1, %v10061_v0, %v10054_v30  ;;  %v10591_v36 = vld [vmem:[%s11601_s5] sm:$0x3f]  }
 0x33b   : > { %6973 = vmatpush3.bf16.msra.mxu0 %v4197_v20  ;;  %7075 = vmatpush3.bf16.msra.mxu1 %v4197_v20  ;;  %v10576_v53 = vsel %vm575_vm3, 0.0, %v3892_v43  ;;  %v10597_v20 = vsel %vm427_vm0, 0.0, %v3766_v45  ;;  %v10603_v43 = vsel %vm608_vm2, %v10316_v22, %v10357_v47  ;;  %v3893_v30 = vsel %vm608_vm2, %v10357_v47, %v10316_v22 }
 0x33c   : > { %v10619_v45 = vsel %vm575_vm3, 0.0, %v3893_v30  ;;  %v10625_v22 = vsel %vm461_vm1, %v11763_v29, %v11762_v49  ;;  %v3769_v47 = vsel %vm461_vm1, %v11762_v49, %v11763_v29  ;;  %7439 = vmatprep.subr.msk.bf16.mxu0 %vm4195_vm11, %v10591_v36  ;;  %7442 = vmatprep.subr.msk.bf16.mxu1 %vm4195_vm11, %v10591_v36  ;;  %v3775_v46 = vsel %vm461_vm1, %v10259_v60, %v10241_v32 }
 0x33d   : > { %v10635_v11 = vsel %vm427_vm0, 0.0, %v3769_v47  ;;  %v11766_v47 = vld [vmem:[#allocation10_spill] sm:$0xff] }
 0x33e   : > { %4905 = vrot.lane.b32.xlu1 %v3933_v23, %s7549_s24  ;;  %4008 = vrot.lane.b32.xlu0 %v10163_v42, %s7545_s21  ;;  %v11765_v23 = vld [vmem:[#allocation14_spill] sm:$0xff]  ;;  %v10661_v7 = vsel %vm461_vm1, %v11767_v50, %v11766_v47 }
 0x33f   : > { %v10641_v30 = vsel %vm461_vm1, %v11765_v23, %v11764_v15  ;;  %v3768_v0 = vsel %vm461_vm1, %v11764_v15, %v11765_v23  ;;  %v3771_v15 = vsel %vm461_vm1, %v11766_v47, %v11767_v50  ;;  %v11770_v50 = vld [vmem:[#allocation2_spill] sm:$0xff]  ;;  %v11771_v23 = vld [vmem:[#allocation21_spill] sm:$0xff] }
 0x340   : > { %v10655_v49 = vsel %vm427_vm0, 0.0, %v3768_v0  ;;  %v10671_v29 = vsel %vm427_vm0, 0.0, %v3771_v15  ;;  %v11768_v0 = vld [vmem:[#allocation15_spill] sm:$0xff]  ;;  %v3773_v2 = vsel %vm461_vm1, %v11771_v23, %v11772_v63 }
 0x341   : > { %v10677_v44 = vsel %vm461_vm1, %v11769_v3, %v11768_v0  ;;  %v3770_v41 = vsel %vm461_vm1, %v11768_v0, %v11769_v3  ;;  %v10699_v3 = vsel %vm461_vm1, %v11772_v63, %v11771_v23  ;;  %v11774_v0 = vld [vmem:[#allocation13_spill] sm:$0xff]  ;;  %v10749_v63 = vsel %vm461_vm1, %v10246_v37, %v10284_v48 }
 0x342   : > { %4903 = vrot.lane.b32.xlu1 %v3932_v56, %s7549_s24  ;;  %4014 = vrot.lane.b32.xlu0 %v11770_v50, %s7545_s21  ;;  %v10693_v15 = vsel %vm427_vm0, 0.0, %v3770_v41  ;;  %v10709_v56 = vsel %vm427_vm0, 0.0, %v3773_v2  ;;  %v11773_v41 = vld [vmem:[#allocation23_spill] sm:$0xff]  ;;  %v10731_v2 = vsel %vm461_vm1, %v10241_v32, %v10259_v60  ;;  %v11775_v50 = vmax.f32 %v10405_v26, 0.0  ;;  %v11776_v32 = vld [vmem:[#allocation24_spill] sm:$0xff] }
 0x343   : > { %v10715_v47 = vsel %vm461_vm1, %v11774_v0, %v11773_v41  ;;  %v3772_v8 = vsel %vm461_vm1, %v11773_v41, %v11774_v0  ;;  %v3749_v41 = vrot.slane %v3717_v31, 7  ;;  %v11777_v60 = vld [vmem:[#allocation27_spill] sm:$0xff]  ;;  %v3774_v31 = vsel %vm461_vm1, %v10284_v48, %v10246_v37 }
 0x344   : > { %v10725_v23 = vsel %vm427_vm0, 0.0, %v3772_v8  ;;  %v10743_v8 = vsel %vm427_vm0, 0.0, %v3775_v46  ;;  %v3748_v52 = vrot.slane %v11775_v50, 7  ;;  %v10767_v26 = vsel %vm461_vm1, %v10305_v54, %v10311_v25 }
 0x345   : > { %v10771_v50 = vsel %vm427_vm0, 0.0, %v3774_v31  ;;  %v3777_v46 = vsel %vm461_vm1, %v10311_v25, %v10305_v54  ;;  %v10781_v37 = vsel %vm461_vm1, %v11778_v28, %v10328_v59  ;;  %v3776_v48 = vsel %vm461_vm1, %v10328_v59, %v11778_v28 }
 0x346   : > { %4859 = vrot.lane.b32.xlu1 %v11776_v32, %s7545_s21  ;;  %4865 = vrot.lane.b32.xlu0 %v11777_v60, %s7545_s21  ;;  %v3822_v31 = vpack.c.bf16 %v10749_v63, %v10771_v50  ;;  %v10791_v0 = vsel %vm427_vm0, 0.0, %v3777_v46  ;;  %v10795_v54 = vsel %vm427_vm0, 0.0, %v3776_v48  ;;  %v10801_v25 = vsel %vm461_vm1, %v10365_v21, %v10395_v6 }
 0x347   : > { %v3779_v46 = vsel %vm461_vm1, %v10395_v6, %v10365_v21  ;;  %v10815_v48 = vsel %vm461_vm1, %v10371_v39, %v10444_v13  ;;  %v3778_v21 = vsel %vm461_vm1, %v10444_v13, %v10371_v39  ;;  %v10832_v6 = vsel %vm461_vm1, %v10456_v62, %v3749_v41 }
 0x348   : > { %v10823_v59 = vsel %vm427_vm0, 0.0, %v3779_v46  ;;  %v10841_v46 = vsel %vm427_vm0, 0.0, %v3778_v21  ;;  %v10850_v39 = vsel %vm461_vm1, %v10472_v17, %v3748_v52 }
 0x34a   : > { %4056 = vrot.lane.b32.xlu1 %v11776_v32, %s7549_s24  ;;  %4062 = vrot.lane.b32.xlu0 %v11777_v60, %s7549_s24  ;;  %v3781_v32 = vsel %vm461_vm1, %v3749_v41, %v10456_v62  ;;  %v3780_v41 = vsel %vm461_vm1, %v3748_v52, %v10472_v17  ;;  %v11780_v60 = vld [vmem:[#allocation18_spill] sm:$0xff]  ;;  %v11781_v62 = vpack.c.bf16 %v10464_v55, %v10442_v12  ;;  %v11783_v52 = vld [vmem:[#allocation29_spill] sm:$0xff] }
 0x34b   : > { %v10845_v28 = vsel %vm427_vm0, 0.0, %v3781_v32  ;;  %v10861_v21 = vsel %vm427_vm0, 0.0, %v3780_v41  ;;  %v11779_v32 = vpack.c.bf16 %v10436_v14, %v10417_v33  ;;  %v11784_v33 = vpack.c.bf16 %v10492_v18, %v10470_v16  ;;  %v11785_v14 = vld [vmem:[#allocation26_spill] sm:$0xff]  ;;  %v11788_v16 = vld [vmem:[#allocation31_spill] sm:$0xff] }
 0x34c   : > { %v3828_v13 = vpack.c.bf16 %v10850_v39, %v10861_v21  ;;  %v11786_v12 = vpack.c.bf16 %v10515_v1, %v10488_v57  ;;  %v11787_v55 = vld [vmem:[#allocation30_spill] sm:$0xff]  ;;  %v11789_v1 = vpack.c.bf16 %v10547_v10, %v10525_v58  ;;  %v11792_v58 = vpack.c.bf16 %v10563_v4, %v10539_v38 }
 0x34d   : > { %v4368_v10 = vsel %vm4195_vm11, %v10591_v36, 0  ;;  %v11794_v36 = vld [vmem:[#allocation7_spill] sm:$0xff] }
 0x34e   : > { %4909 = vrot.lane.b32.xlu1 %v11779_v32, %s7549_s24  ;;  %4012 = vrot.lane.b32.xlu0 %v11780_v60, %s7545_s21  ;;  %v11790_v32 = vpack.c.bf16 %v10582_v61, %v10597_v20 }
 0x352   : > { %4907 = vrot.lane.b32.xlu1 %v11781_v62, %s7549_s24  ;;  %4018 = vrot.lane.b32.xlu0 %v11782_v5, %s7545_s21 }
 0x356   : > { %4863 = vrot.lane.b32.xlu1 %v11783_v52, %s7545_s21  ;;  %4869 = vrot.lane.b32.xlu0 %v10367_v27, %s7545_s21 }
 0x35a   : > { %4060 = vrot.lane.b32.xlu1 %v11783_v52, %s7549_s24  ;;  %4066 = vrot.lane.b32.xlu0 %v10367_v27, %s7549_s24  ;;  %v11791_v52 = vpack.c.bf16 %v10502_v34, %v10519_v24  ;;  %v11793_v24 = vld [vmem:[#allocation4_spill] sm:$0xff] }
 0x35b   : > { %v3995_v17 = vpop.permute.xlu0 %3994 }
 0x35e   : > { %4913 = vrot.lane.b32.xlu1 %v11784_v33, %s7549_s24  ;;  %4016 = vrot.lane.b32.xlu0 %v11785_v14, %s7545_s21  ;;  %v4077_v33 = vsel %vm1795_vm5, %v11791_v52, %v3995_v17 }
 0x362   : > { %4911 = vrot.lane.b32.xlu1 %v11786_v12, %s7549_s24  ;;  %4022 = vrot.lane.b32.xlu0 %v11787_v55, %s7545_s21 }
 0x366   : > { %4867 = vrot.lane.b32.xlu1 %v10369_v51, %s7545_s21  ;;  %4873 = vrot.lane.b32.xlu0 %v10448_v9, %s7545_s21 }
 0x368   : > { %v4846_v27 = vpop.permute.xlu0 %4845 }
 0x369   : > { %v4928_v12 = vsel %vm1795_vm5, %v11794_v36, %v4846_v27 }
 0x36a   : > { %4064 = vrot.lane.b32.xlu1 %v10369_v51, %s7549_s24  ;;  %4020 = vrot.lane.b32.xlu0 %v11788_v16, %s7545_s21 }
 0x36b   : > { %v4844_v18 = vpop.permute.xlu1 %4843 }
 0x36c   : > { %v4043_v57 = vpop.permute.xlu0 %4042  ;;  %v4925_v38 = vsel %vm1795_vm5, %v11793_v24, %v4844_v18  ;;  %v11800_v24 = vld [vmem:[#allocation3_spill] sm:$0xff] }
 0x36d   : > { %v10929_v61 = vsel %vm4120_vm12, %v4077_v33, %v4043_v57  ;;  %v11797_v33 = vpack.c.bf16 %v10619_v45, %v10603_v43 }
 0x36e   : > { %4917 = vrot.lane.b32.xlu1 %v11789_v1, %s7549_s24  ;;  %4070 = vrot.lane.b32.xlu0 %v10448_v9, %s7549_s24  ;;  %v10947_v1 = vld [vmem:[%s11601_s5 + $0x10] sm:$0x3f]  }
 0x36f   : > { %v4041_v62 = vpop.permute.xlu1 %4040 }
 0x370   : > { %v3993_v41 = vpop.permute.xlu0 %3992 }
 0x371   : > { %v4074_v51 = vsel %vm1795_vm5, %v11790_v32, %v3993_v41  ;;  %v11795_v41 = vpack.c.bf16 %v10576_v53, %v10557_v40 }
 0x372   : > { %4915 = vrot.lane.b32.xlu1 %v11792_v58, %s7549_s24  ;;  %v10924_v9 = vsel %vm4120_vm12, %v4074_v51, %v4041_v62  ;;  %v11798_v58 = vpack.c.bf16 %v10625_v22, %v10635_v11  ;;  %v11799_v22 = vld [vmem:[#allocation8_spill] sm:$0xff] }
 0x373   : > { %v4894_v20 = vpop.permute.xlu1 %4893  ;;  %6974 = vmatprep.mubr.msk.bf16.mxu0 %vm1844_vm6, %v10924_v9 }
 0x374   : > { %6975 = vmatmul.mubr.msk.bf16.vlgmr.msra.gmra.mrb[32].mxu0 %vm1844_vm6, %v10929_v61  ;;  %v3999_v34 = vpop.permute.xlu0 %3998  ;;  %v10950_v62 = vsel %vm4120_vm12, %v4928_v12, %v4894_v20 }
 0x375   : > { %7007 = vmatpush3.bf16.msra.mxu0 %v4368_v10 }
 0x376   : > { %4871 = vrot.lane.b32.xlu1 %v10460_v35, %s7545_s21  ;;  %7440 = vmatprep.subr.msk.bf16.mxu0 %vm4195_vm11, %v10947_v1 }
 0x377   : > { %v4892_v4 = vpop.permute.xlu1 %4891 }
 0x378   : > { %v10942_v17 = vsel %vm4120_vm12, %v4925_v38, %v4892_v4  ;;  %v4850_v57 = vpop.permute.xlu0 %4849 }
 0x379   : > { %7076 = vmatprep.mubr.msk.bf16.mxu1 %vm1844_vm6, %v10942_v17  ;;  %v4934_v38 = vsel %vm1795_vm5, %v11800_v24, %v4850_v57  ;;  %v11805_v24 = vpack.c.bf16 %v10715_v47, %v10725_v23 }
 0x37a   : > { %4068 = vrot.lane.b32.xlu1 %v10460_v35, %s7549_s24  ;;  %7077 = vmatmul.mubr.msk.bf16.vlgmr.msra.gmra.mrb[32].mxu1 %vm1844_vm6, %v10950_v62  ;;  %v11796_v35 = vpack.c.bf16 %v10641_v30, %v10655_v49 }
 0x37b   : > { %v4848_v27 = vpop.permute.xlu1 %4847  ;;  %7109 = vmatpush3.bf16.msra.mxu1 %v4368_v10  ;;  %v4083_v10 = vsel %vm1795_vm5, %v11798_v58, %v3999_v34 }
 0x37c   : > { %v4047_v18 = vpop.permute.xlu0 %4046  ;;  %7443 = vmatprep.subr.msk.bf16.mxu1 %vm4195_vm11, %v10947_v1  ;;  %v4931_v11 = vsel %vm1795_vm5, %v11799_v22, %v4848_v27  ;;  %v11801_v27 = vpack.c.bf16 %v10677_v44, %v10693_v15 }
 0x37d   : > { %v10982_v53 = vsel %vm4120_vm12, %v4083_v10, %v4047_v18  ;;  %v11803_v10 = vld [vmem:[#allocation5_spill] sm:$0xff] }
 0x37e   : > { %4919 = vrot.lane.b32.xlu1 %v11795_v41, %s7549_s24 }
 0x37f   : > { %v4045_v51 = vpop.permute.xlu1 %4044 }
 0x380   : > { %v3997_v32 = vpop.permute.xlu0 %3996 }
 0x381   : > { %v4080_v52 = vsel %vm1795_vm5, %v11796_v35, %v3997_v32 }
 0x382   : > { %4921 = vrot.lane.b32.xlu1 %v11797_v33, %s7549_s24  ;;  %v10979_v40 = vsel %vm4120_vm12, %v4080_v52, %v4045_v51  ;;  %v11802_v51 = vpack.c.bf16 %v10661_v7, %v10671_v29 }
 0x383   : > { %6978 = vmatprep.mubr.msk.bf16.mxu0 %vm1844_vm6, %v10979_v40 }
 0x384   : > { %6979 = vmatmul.mubr.msk.bf16.gmra.mrb[36].mxu0 %vm1844_vm6, %v10982_v53  ;;  %v4003_v30 = vpop.permute.xlu0 %4002 }
 0x385   : > { %v4089_v35 = vsel %vm1795_vm5, %v11802_v51, %v4003_v30 }
 0x388   : > { %v4854_v43 = vpop.permute.xlu0 %4853 }
 0x38c   : > { %v4051_v45 = vpop.permute.xlu0 %4050 }
 0x38d   : > { %v4898_v49 = vpop.permute.xlu1 %4897  ;;  %v11014_v33 = vsel %vm4120_vm12, %v4089_v35, %v4051_v45 }
 0x38e   : > { %v10996_v36 = vsel %vm4120_vm12, %v4934_v38, %v4898_v49  ;;  %v11804_v49 = vld [vmem:[#allocation6_spill] sm:$0xff] }
 0x390   : > { %v4001_v20 = vpop.permute.xlu0 %4000 }
 0x391   : > { %v4896_v34 = vpop.permute.xlu1 %4895  ;;  %v4086_v41 = vsel %vm1795_vm5, %v11801_v27, %v4001_v20  ;;  %v4940_v20 = vsel %vm1795_vm5, %v11804_v49, %v4854_v43  ;;  %v11806_v27 = vpack.c.bf16 %v10699_v3, %v10709_v56  ;;  %v11808_v49 = vpack.c.bf16 %v10731_v2, %v10743_v8 }
 0x392   : > { %v10993_v4 = vsel %vm4120_vm12, %v4931_v11, %v4896_v34 }
 0x393   : > { %7080 = vmatprep.mubr.msk.bf16.mxu1 %vm1844_vm6, %v10993_v4 }
 0x394   : > { %7081 = vmatmul.mubr.msk.bf16.gmra.mrb[36].mxu1 %vm1844_vm6, %v10996_v36  ;;  %v4007_v12 = vpop.permute.xlu0 %4006 }
 0x395   : > { %v4852_v18 = vpop.permute.xlu1 %4851 }
 0x396   : > { %v4937_v7 = vsel %vm1795_vm5, %v11803_v10, %v4852_v18 }
 0x398   : > { %v4858_v57 = vpop.permute.xlu0 %4857 }
 0x399   : > { %v4049_v32 = vpop.permute.xlu1 %4048 }
 0x39a   : > { %v11011_v52 = vsel %vm4120_vm12, %v4086_v41, %v4049_v32  ;;  %v4095_v41 = vsel %vm1795_vm5, %v11806_v27, %v4007_v12  ;;  %v11807_v12 = vld [vmem:[#allocation19_spill] sm:$0xff] }
 0x39b   : > { %6982 = vmatprep.mubr.msk.bf16.mxu0 %vm1844_vm6, %v11011_v52 }
 0x39c   : > { %6983 = vmatmul.mubr.msk.bf16.gmra.mrb[40].mxu0 %vm1844_vm6, %v11014_v33  ;;  %v4055_v44 = vpop.permute.xlu0 %4054 }
 0x39d   : > { %v11046_v51 = vsel %vm4120_vm12, %v4095_v41, %v4055_v44 }
 0x3a0   : > { %v4902_v15 = vpop.permute.xlu1 %4901  ;;  %v4005_v58 = vpop.permute.xlu0 %4004 }
 0x3a1   : > { %v11028_v22 = vsel %vm4120_vm12, %v4940_v20, %v4902_v15  ;;  %v4092_v38 = vsel %vm1795_vm5, %v11805_v24, %v4005_v58  ;;  %v4946_v15 = vsel %vm1795_vm5, %v11807_v12, %v4858_v57 }
 0x3a4   : > { %v4900_v29 = vpop.permute.xlu1 %4899  ;;  %v4011_v30 = vpop.permute.xlu0 %4010 }
 0x3a5   : > { %v11025_v45 = vsel %vm4120_vm12, %v4937_v7, %v4900_v29  ;;  %v4101_v20 = vsel %vm1795_vm5, %v11808_v49, %v4011_v30  ;;  %v11809_v30 = vld [vmem:[#allocation16_spill] sm:$0xff] }
 0x3a6   : > { %7084 = vmatprep.mubr.msk.bf16.mxu1 %vm1844_vm6, %v11025_v45 }
 0x3a7   : > { %7085 = vmatmul.mubr.msk.bf16.gmra.mrb[40].mxu1 %vm1844_vm6, %v11028_v22 }
 0x3a8   : > { %v4856_v11 = vpop.permute.xlu1 %4855  ;;  %v4862_v34 = vpop.permute.xlu0 %4861 }
 0x3a9   : > { %v4943_v35 = vsel %vm1795_vm5, %v10109_v19, %v4856_v11 }
 0x3ac   : > { %v4053_v43 = vpop.permute.xlu1 %4052  ;;  %v4059_v18 = vpop.permute.xlu0 %4058 }
 0x3ad   : > { %v11043_v32 = vsel %vm4120_vm12, %v4092_v38, %v4053_v43  ;;  %v11078_v24 = vsel %vm4120_vm12, %v4101_v20, %v4059_v18  ;;  %v4952_v38 = vsel %vm1795_vm5, %v11809_v30, %v4862_v34 }
 0x3ae   : > { %6986 = vmatprep.mubr.msk.bf16.mxu0 %vm1844_vm6, %v11043_v32 }
 0x3af   : > { %6987 = vmatmul.mubr.msk.bf16.gmra.mrb[44].mxu0 %vm1844_vm6, %v11046_v51 }
 0x3b0   : > { %v4906_v47 = vpop.permute.xlu1 %4905  ;;  %v4009_v23 = vpop.permute.xlu0 %4008 }
 0x3b1   : > { %v11060_v44 = vsel %vm4120_vm12, %v4946_v15, %v4906_v47  ;;  %v4098_v19 = vsel %vm1795_vm5, %v3822_v31, %v4009_v23 }
 0x3b4   : > { %v4904_v3 = vpop.permute.xlu1 %4903  ;;  %v4015_v56 = vpop.permute.xlu0 %4014 }
 0x3b5   : > { %v11057_v58 = vsel %vm4120_vm12, %v4943_v35, %v4904_v3  ;;  %v11811_v35 = vpack.c.bf16 %v10767_v26, %v10791_v0  ;;  %v11812_v26 = vld [vmem:[#allocation2_spill] sm:$0xff] }
 0x3b6   : > { %7088 = vmatprep.mubr.msk.bf16.mxu1 %vm1844_vm6, %v11057_v58 }
 0x3b7   : > { %7089 = vmatmul.mubr.msk.bf16.gmra.mrb[44].mxu1 %vm1844_vm6, %v11060_v44  ;;  %v4107_v3 = vsel %vm1795_vm5, %v11811_v35, %v4015_v56 }
 0x3b8   : > { %v4860_v10 = vpop.permute.xlu1 %4859  ;;  %v4866_v7 = vpop.permute.xlu0 %4865 }
 0x3b9   : > { %v4949_v31 = vsel %vm1795_vm5, %v10163_v42, %v4860_v10  ;;  %v11810_v42 = vpack.c.bf16 %v10781_v37, %v10795_v54  ;;  %v4958_v56 = vsel %vm1795_vm5, %v11812_v26, %v4866_v7 }
 0x3bc   : > { %v4057_v57 = vpop.permute.xlu1 %4056  ;;  %v4063_v29 = vpop.permute.xlu0 %4062 }
 0x3bd   : > { %v11075_v11 = vsel %vm4120_vm12, %v4098_v19, %v4057_v57  ;;  %v11110_v15 = vsel %vm4120_vm12, %v4107_v3, %v4063_v29 }
 0x3be   : > { %6990 = vmatprep.mubr.msk.bf16.mxu0 %vm1844_vm6, %v11075_v11 }
 0x3bf   : > { %6991 = vmatmul.mubr.msk.bf16.gmra.mrb[48].mxu0 %vm1844_vm6, %v11078_v24 }
 0x3c0   : > { %v4910_v63 = vpop.permute.xlu1 %4909  ;;  %v4013_v50 = vpop.permute.xlu0 %4012 }
 0x3c1   : > { %v11092_v18 = vsel %vm4120_vm12, %v4952_v38, %v4910_v63  ;;  %v4104_v47 = vsel %vm1795_vm5, %v11810_v42, %v4013_v50  ;;  %v11814_v63 = vpack.c.bf16 %v10801_v25, %v10823_v59 }
 0x3c4   : > { %v4908_v2 = vpop.permute.xlu1 %4907  ;;  %v4019_v8 = vpop.permute.xlu0 %4018 }
 0x3c5   : > { %v11089_v43 = vsel %vm4120_vm12, %v4949_v31, %v4908_v2  ;;  %v4113_v50 = vsel %vm1795_vm5, %v11814_v63, %v4019_v8 }
 0x3c6   : > { %7092 = vmatprep.mubr.msk.bf16.mxu1 %vm1844_vm6, %v11089_v43 }
 0x3c7   : > { %7093 = vmatmul.mubr.msk.bf16.gmra.mrb[48].mxu1 %vm1844_vm6, %v11092_v18 }
 0x3c8   : > { %v4864_v27 = vpop.permute.xlu1 %4863  ;;  %v4870_v41 = vpop.permute.xlu0 %4869 }
 0x3c9   : > { %v4955_v10 = vsel %vm1795_vm5, %v11780_v60, %v4864_v27  ;;  %v11813_v60 = vpack.c.bf16 %v10815_v48, %v10841_v46  ;;  %v4964_v8 = vsel %vm1795_vm5, %v11782_v5, %v4870_v41  ;;  %v11815_v5 = vpack.c.bf16 %v10832_v6, %v10845_v28 }
 0x3ca   : > { %v11816_v28 = vmov 0  }
 0x3cc   : > { %v4061_v34 = vpop.permute.xlu1 %4060  ;;  %v4067_v23 = vpop.permute.xlu0 %4066 }
 0x3cd   : > { %v11107_v12 = vsel %vm4120_vm12, %v4104_v47, %v4061_v34  ;;  %v11142_v30 = vsel %vm4120_vm12, %v4113_v50, %v4067_v23 }
 0x3ce   : > { %6994 = vmatprep.mubr.msk.bf16.mxu0 %vm1844_vm6, %v11107_v12 }
 0x3cf   : > { %6995 = vmatmul.mubr.msk.bf16.gmra.mrb[52].mxu0 %vm1844_vm6, %v11110_v15 }
 0x3d0   : > { %v4914_v37 = vpop.permute.xlu1 %4913  ;;  %v4017_v54 = vpop.permute.xlu0 %4016 }
 0x3d1   : > { %v11124_v57 = vsel %vm4120_vm12, %v4958_v56, %v4914_v37  ;;  %v4110_v20 = vsel %vm1795_vm5, %v11813_v60, %v4017_v54  ;;  %v4540_v54 = vsel %vm4195_vm11, %v10947_v1, 0 }
 0x3d4   : > { %v4912_v0 = vpop.permute.xlu1 %4911  ;;  %v4023_v29 = vpop.permute.xlu0 %4022 }
 0x3d5   : > { %v11121_v19 = vsel %vm4120_vm12, %v4955_v10, %v4912_v0  ;;  %v4119_v41 = vsel %vm1795_vm5, %v11815_v5, %v4023_v29 }
 0x3d6   : > { %7096 = vmatprep.mubr.msk.bf16.mxu1 %vm1844_vm6, %v11121_v19 }
 0x3d7   : > { %7097 = vmatmul.mubr.msk.bf16.gmra.mrb[52].mxu1 %vm1844_vm6, %v11124_v57 }
 0x3d8   : > { %v4868_v49 = vpop.permute.xlu1 %4867  ;;  %v4874_v2 = vpop.permute.xlu0 %4873 }
 0x3d9   : > { %v4961_v25 = vsel %vm1795_vm5, %v11785_v14, %v4868_v49  ;;  %v4970_v21 = vsel %vm1795_vm5, %v11787_v55, %v4874_v2  ;;  %v11323_v55 = vld [vmem:[%s11602_s6] ss:$0 sm:$0xff] }
 0x3dc   : > { %v4065_v7 = vpop.permute.xlu1 %4064  ;;  %v4021_v46 = vpop.permute.xlu0 %4020 }
 0x3dd   : > { %v11139_v31 = vsel %vm4120_vm12, %v4110_v20, %v4065_v7  ;;  %v4116_v14 = vsel %vm1795_vm5, %v3828_v13, %v4021_v46 }
 0x3de   : > { %6998 = vmatprep.mubr.msk.bf16.mxu0 %vm1844_vm6, %v11139_v31 }
 0x3df   : > { %6999 = vmatmul.mubr.msk.bf16.gmra.mrb[56].mxu0 %vm1844_vm6, %v11142_v30 }
 0x3e0   : > { %v4918_v48 = vpop.permute.xlu1 %4917  ;;  %v4071_v47 = vpop.permute.xlu0 %4070 }
 0x3e1   : > { %v11156_v27 = vsel %vm4120_vm12, %v4964_v8, %v4918_v48  ;;  %v11171_v23 = vsel %vm4120_vm12, %v4119_v41, %v4071_v47 }
 0x3e4   : > { %v4916_v59 = vpop.permute.xlu1 %4915 }
 0x3e5   : > { %v11153_v38 = vsel %vm4120_vm12, %v4961_v25, %v4916_v59 }
 0x3e6   : > { %7100 = vmatprep.mubr.msk.bf16.mxu1 %vm1844_vm6, %v11153_v38 }
 0x3e7   : > { %7101 = vmatmul.mubr.msk.bf16.gmra.mrb[56].mxu1 %vm1844_vm6, %v11156_v27 }
 0x3e8   : > { %v4872_v42 = vpop.permute.xlu1 %4871 }
 0x3e9   : > { %v4967_v39 = vsel %vm1795_vm5, %v11788_v16, %v4872_v42  ;;  %v11328_v16 = vld [vmem:[%s11603_s7] ss:$0 sm:$0xff] }
 0x3ec   : > { %v4069_v34 = vpop.permute.xlu1 %4068 }
 0x3ed   : > { %v11174_v35 = vsel %vm4120_vm12, %v4116_v14, %v4069_v34 }
 0x3ee   : > { %7002 = vmatprep.mubr.msk.bf16.mxu0 %vm1844_vm6, %v11174_v35 }
 0x3ef   : > { %7003 = vmatmul.mubr.msk.bf16.gmra.mrb[60].mxu0 %vm1844_vm6, %v11171_v23 }
 0x3f0   : > { %v4920_v13 = vpop.permute.xlu1 %4919  ;;  %7008 = vmatprep.mubr.bf16.mxu0 %v11816_v28 }
 0x3f1   : > { %v11184_v6 = vsel %vm4120_vm12, %v4967_v39, %v4920_v13 }
 0x3f2   : > { %7104 = vmatprep.mubr.msk.bf16.mxu1 %vm1844_vm6, %v11184_v6 }
 0x3f4   : > { %v4922_v3 = vpop.permute.xlu1 %4921 }
 0x3f5   : > { %v11191_v37 = vsel %vm4120_vm12, %v4970_v21, %v4922_v3 }
 0x3f6   : > { %7105 = vmatmul.mubr.msk.bf16.gmra.mrb[60].mxu1 %vm1844_vm6, %v11191_v37 }
 0x3f7   : > { %7009 = vmatmul.mubr.msk.bf16.vlgmr.msra.gmra.mrb[32].mxu0 %vm1844_vm6, %v10924_v9  ;;  %7110 = vmatprep.mubr.bf16.mxu1 %v11816_v28 }
 0x3f8   : > { %7012 = vmatprep.mubr.msk.bf16.mxu0 %vm1844_vm6, %v10929_v61  ;;  %7041 = vmatpush3.bf16.msra.mxu0 %v4540_v54 }
 0x3fe   : > { %7111 = vmatmul.mubr.msk.bf16.vlgmr.msra.gmra.mrb[32].mxu1 %vm1844_vm6, %v10942_v17 }
 0x3ff   : > { %7143 = vmatpush3.bf16.msra.mxu1 %v4540_v54  ;;  %7114 = vmatprep.mubr.msk.bf16.mxu1 %vm1844_vm6, %v10950_v62 }
 0x400   : > { %7013 = vmatmul.mubr.msk.bf16.gmra.mrb[36].mxu0 %vm1844_vm6, %v10979_v40 }
 0x401   : > { %7016 = vmatprep.mubr.msk.bf16.mxu0 %vm1844_vm6, %v10982_v53 }
 0x406   : > { %7115 = vmatmul.mubr.msk.bf16.gmra.mrb[36].mxu1 %vm1844_vm6, %v10993_v4 }
 0x407   : > { %7118 = vmatprep.mubr.msk.bf16.mxu1 %vm1844_vm6, %v10996_v36 }
 0x408   : > { %7017 = vmatmul.mubr.msk.bf16.gmra.mrb[40].mxu0 %vm1844_vm6, %v11011_v52 }
 0x409   : > { %7020 = vmatprep.mubr.msk.bf16.mxu0 %vm1844_vm6, %v11014_v33 }
 0x40e   : > { %7119 = vmatmul.mubr.msk.bf16.gmra.mrb[40].mxu1 %vm1844_vm6, %v11025_v45 }
 0x40f   : > { %7122 = vmatprep.mubr.msk.bf16.mxu1 %vm1844_vm6, %v11028_v22 }
 0x410   : > { %7021 = vmatmul.mubr.msk.bf16.gmra.mrb[44].mxu0 %vm1844_vm6, %v11043_v32 }
 0x411   : > { %7024 = vmatprep.mubr.msk.bf16.mxu0 %vm1844_vm6, %v11046_v51 }
 0x416   : > { %7123 = vmatmul.mubr.msk.bf16.gmra.mrb[44].mxu1 %vm1844_vm6, %v11057_v58 }
 0x417   : > { %7126 = vmatprep.mubr.msk.bf16.mxu1 %vm1844_vm6, %v11060_v44 }
 0x418   : > { %7025 = vmatmul.mubr.msk.bf16.gmra.mrb[48].mxu0 %vm1844_vm6, %v11075_v11 }
 0x419   : > { %7028 = vmatprep.mubr.msk.bf16.mxu0 %vm1844_vm6, %v11078_v24 }
 0x41e   : > { %7127 = vmatmul.mubr.msk.bf16.gmra.mrb[48].mxu1 %vm1844_vm6, %v11089_v43 }
 0x41f   : > { %7130 = vmatprep.mubr.msk.bf16.mxu1 %vm1844_vm6, %v11092_v18 }
 0x420   : > { %7029 = vmatmul.mubr.msk.bf16.gmra.mrb[52].mxu0 %vm1844_vm6, %v11107_v12 }
 0x421   : > { %7032 = vmatprep.mubr.msk.bf16.mxu0 %vm1844_vm6, %v11110_v15 }
 0x426   : > { %7131 = vmatmul.mubr.msk.bf16.gmra.mrb[52].mxu1 %vm1844_vm6, %v11121_v19 }
 0x427   : > { %7134 = vmatprep.mubr.msk.bf16.mxu1 %vm1844_vm6, %v11124_v57 }
 0x428   : > { %7033 = vmatmul.mubr.msk.bf16.gmra.mrb[56].mxu0 %vm1844_vm6, %v11139_v31 }
 0x429   : > { %7036 = vmatprep.mubr.msk.bf16.mxu0 %vm1844_vm6, %v11142_v30 }
 0x42e   : > { %7135 = vmatmul.mubr.msk.bf16.gmra.mrb[56].mxu1 %vm1844_vm6, %v11153_v38 }
 0x42f   : > { %7138 = vmatprep.mubr.msk.bf16.mxu1 %vm1844_vm6, %v11156_v27 }
 0x430   : > { %7037 = vmatmul.mubr.msk.bf16.gmra.mrb[60].mxu0 %vm1844_vm6, %v11174_v35 }
 0x431   : > { %7042 = vmatprep.mubr.msk.bf16.mxu0 %vm1844_vm6, %v10929_v61 }
 0x436   : > { %7139 = vmatmul.mubr.msk.bf16.gmra.mrb[60].mxu1 %vm1844_vm6, %v11184_v6 }
 0x437   : > { %7144 = vmatprep.mubr.msk.bf16.mxu1 %vm1844_vm6, %v10950_v62 }
 0x438   : > { %7043 = vmatmul.mubr.msk.bf16.vlgmr.msra.gmra.mrb[32].mxu0 %vm1844_vm6, %v10979_v40 }
 0x439   : > { %7046 = vmatprep.mubr.msk.bf16.mxu0 %vm1844_vm6, %v10982_v53 }
 0x43e   : > { %7145 = vmatmul.mubr.msk.bf16.vlgmr.msra.gmra.mrb[32].mxu1 %vm1844_vm6, %v10993_v4 }
 0x43f   : > { %7148 = vmatprep.mubr.msk.bf16.mxu1 %vm1844_vm6, %v10996_v36 }
 0x440   : > { %7047 = vmatmul.mubr.msk.bf16.gmra.mrb[36].mxu0 %vm1844_vm6, %v11011_v52 }
 0x441   : > { %7050 = vmatprep.mubr.msk.bf16.mxu0 %vm1844_vm6, %v11014_v33 }
 0x446   : > { %7149 = vmatmul.mubr.msk.bf16.gmra.mrb[36].mxu1 %vm1844_vm6, %v11025_v45 }
 0x447   : > { %7152 = vmatprep.mubr.msk.bf16.mxu1 %vm1844_vm6, %v11028_v22 }
 0x448   : > { %7051 = vmatmul.mubr.msk.bf16.gmra.mrb[40].mxu0 %vm1844_vm6, %v11043_v32 }
 0x449   : > { %7054 = vmatprep.mubr.msk.bf16.mxu0 %vm1844_vm6, %v11046_v51 }
 0x44e   : > { %7153 = vmatmul.mubr.msk.bf16.gmra.mrb[40].mxu1 %vm1844_vm6, %v11057_v58 }
 0x44f   : > { %7156 = vmatprep.mubr.msk.bf16.mxu1 %vm1844_vm6, %v11060_v44 }
 0x450   : > { %7055 = vmatmul.mubr.msk.bf16.gmra.mrb[44].mxu0 %vm1844_vm6, %v11075_v11 }
 0x451   : > { %7058 = vmatprep.mubr.msk.bf16.mxu0 %vm1844_vm6, %v11078_v24 }
 0x456   : > { %7157 = vmatmul.mubr.msk.bf16.gmra.mrb[44].mxu1 %vm1844_vm6, %v11089_v43 }
 0x457   : > { %7160 = vmatprep.mubr.msk.bf16.mxu1 %vm1844_vm6, %v11092_v18 }
 0x458   : > { %7059 = vmatmul.mubr.msk.bf16.gmra.mrb[48].mxu0 %vm1844_vm6, %v11107_v12 }
 0x459   : > { %7062 = vmatprep.mubr.msk.bf16.mxu0 %vm1844_vm6, %v11110_v15 }
 0x45e   : > { %7161 = vmatmul.mubr.msk.bf16.gmra.mrb[48].mxu1 %vm1844_vm6, %v11121_v19 }
 0x45f   : > { %7164 = vmatprep.mubr.msk.bf16.mxu1 %vm1844_vm6, %v11124_v57 }
 0x460   : > { %7063 = vmatmul.mubr.msk.bf16.gmra.mrb[52].mxu0 %vm1844_vm6, %v11139_v31 }
 0x461   : > { %7066 = vmatprep.mubr.msk.bf16.mxu0 %vm1844_vm6, %v11142_v30 }
 0x466   : > { %7165 = vmatmul.mubr.msk.bf16.gmra.mrb[52].mxu1 %vm1844_vm6, %v11153_v38 }
 0x467   : > { %7168 = vmatprep.mubr.msk.bf16.mxu1 %vm1844_vm6, %v11156_v27 }
 0x468   : > { %7067 = vmatmul.mubr.msk.bf16.gmra.mrb[56].mxu0 %vm1844_vm6, %v11174_v35 }
 0x469   : > { %7070 = vmatprep.mubr.msk.bf16.mxu0 %vm1844_vm6, %v11171_v23 }
 0x46e   : > { %7169 = vmatmul.mubr.msk.bf16.gmra.mrb[56].mxu1 %vm1844_vm6, %v11184_v6 }
 0x46f   : > { %7172 = vmatprep.mubr.msk.bf16.mxu1 %vm1844_vm6, %v11191_v37 }
 0x470   : > { %7071 = vmatmul.mubr.bf16.gmra.mrb[60].mxu0 %v11816_v28 }
 0x476   : > { %7173 = vmatmul.mubr.bf16.gmra.mrb[60].mxu1 %v11816_v28 }
 0x50b   : > { %v7044_v9 = vpop.f32.mrb[32].mxu0 }
 0x50c   : > { %v4743_v61 = vmul.f32 %v7044_v9, %v11323_v55  ;;  %v4576_v17 = vpop.f32.mrb[33].mxu0 }
 0x50d   : > { %v4741_v1 = vmul.f32 %v11323_v55, %v4576_v17  ;;  %v7045_v62 = vpop.f32.mrb[34].mxu0 }
 0x50e   : > { %v4781_v40 = vadd.f32 %v11328_v16, %v4743_v61  ;;  %v4744_v53 = vmul.f32 %v7045_v62, %v11323_v55  ;;  %v4579_v4 = vpop.f32.mrb[35].mxu0 }
 0x50f   : > { %v4779_v36 = vadd.f32 %v11328_v16, %v4741_v1  ;;  %v4742_v52 = vmul.f32 %v11323_v55, %v4579_v4 }
 0x510   : > { %v4813_v33 = vmax.f32 %v4781_v40, 0.0  ;;  %v4782_v45 = vadd.f32 %v11328_v16, %v4744_v53 }
 0x511   : > { %v4811_v22 = vmax.f32 %v4779_v36, 0.0  ;;  %v4780_v32 = vadd.f32 %v11328_v16, %v4742_v52  ;;  %v7146_v51 = vpop.f32.mrb[32].mxu1 }
 0x512   : > { %v6427_v58 = vpack.c.bf16 %v4813_v33, %v4813_v33  ;;  %v4814_v44 = vmax.f32 %v4782_v45, 0.0  ;;  %v5552_v11 = vmul.f32 %v7146_v51, %v11323_v55  ;;  %v5391_v24 = vpop.f32.mrb[33].mxu1 }
 0x513   : > { %v6425_v43 = vpack.c.bf16 %v4811_v22, %v4811_v22  ;;  %v4812_v18 = vmax.f32 %v4780_v32, 0.0  ;;  %v5550_v12 = vmul.f32 %v11323_v55, %v5391_v24  ;;  %v7147_v15 = vpop.f32.mrb[34].mxu1  ;;  %v7048_v10 = vpop.f32.mrb[36].mxu0 }
 0x514   : > { %5777 = vst.msk [vmem:[%s11342_s17 + $0x8] sm:$0xf] %vm5774_vm13, %v6427_v58  ;;  %v6428_v0 = vpack.c.bf16 %v4814_v44, %v4814_v44  ;;  %v5584_v26 = vadd.f32 %v11328_v16, %v5552_v11  ;;  %v5553_v56 = vmul.f32 %v7147_v15, %v11323_v55  ;;  %v4747_v19 = vmul.f32 %v7048_v10, %v11323_v55  ;;  %v5394_v57 = vpop.f32.mrb[35].mxu1  ;;  %v4592_v29 = vpop.f32.mrb[37].mxu0 }
 0x515   : > { %5775 = vst.msk [vmem:[%s11342_s17] sm:$0xf] %vm5774_vm13, %v6425_v43  ;;  %v6426_v49 = vpack.c.bf16 %v4812_v18, %v4812_v18  ;;  %v5582_v60 = vadd.f32 %v11328_v16, %v5550_v12  ;;  %v5551_v20 = vmul.f32 %v11323_v55, %v5394_v57  ;;  %v4745_v7 = vmul.f32 %v11323_v55, %v4592_v29  ;;  %v7049_v63 = vpop.f32.mrb[38].mxu0 }
 0x516   : > { %5778 = vst.msk [vmem:[%s11342_s17 + $0xc] sm:$0xf] %vm5774_vm13, %v6428_v0  ;;  %v5616_v50 = vmax.f32 %v5584_v26, 0.0  ;;  %v5585_v31 = vadd.f32 %v11328_v16, %v5553_v56  ;;  %v4785_v2 = vadd.f32 %v11328_v16, %v4747_v19  ;;  %v4748_v30 = vmul.f32 %v7049_v63, %v11323_v55  ;;  %v4595_v48 = vpop.f32.mrb[39].mxu0 }
 0x517   : > { %5776 = vst.msk [vmem:[%s11342_s17 + $0x4] sm:$0xf] %vm5774_vm13, %v6426_v49  ;;  %v5614_v46 = vmax.f32 %v5582_v60, 0.0  ;;  %v5583_v25 = vadd.f32 %v11328_v16, %v5551_v20  ;;  %v4783_v59 = vadd.f32 %v11328_v16, %v4745_v7  ;;  %v4746_v8 = vmul.f32 %v11323_v55, %v4595_v48 }
 0x518   : > { %v6459_v38 = vpack.c.bf16 %v5616_v50, %v5616_v50  ;;  %v5617_v27 = vmax.f32 %v5585_v31, 0.0  ;;  %v4817_v42 = vmax.f32 %v4785_v2, 0.0  ;;  %v4786_v47 = vadd.f32 %v11328_v16, %v4748_v30 }
 0x519   : > { %v6457_v14 = vpack.c.bf16 %v5614_v46, %v5614_v46  ;;  %v5615_v5 = vmax.f32 %v5583_v25, 0.0  ;;  %v4815_v41 = vmax.f32 %v4783_v59, 0.0  ;;  %v4784_v34 = vadd.f32 %v11328_v16, %v4746_v8  ;;  %v7150_v23 = vpop.f32.mrb[36].mxu1 }
 0x51a   : > { %6390 = vst.msk [vmem:[%s11342_s17 + $0x88] sm:$0xf] %vm5774_vm13, %v6459_v38  ;;  %v6460_v35 = vpack.c.bf16 %v5617_v27, %v5617_v27  ;;  %v6431_v39 = vpack.c.bf16 %v4817_v42, %v4817_v42  ;;  %v4818_v13 = vmax.f32 %v4786_v47, 0.0  ;;  %v5556_v28 = vmul.f32 %v7150_v23, %v11323_v55  ;;  %v5407_v6 = vpop.f32.mrb[37].mxu1 }
 0x51b   : > { %6388 = vst.msk [vmem:[%s11342_s17 + $0x80] sm:$0xf] %vm5774_vm13, %v6457_v14  ;;  %v6458_v21 = vpack.c.bf16 %v5615_v5, %v5615_v5  ;;  %v6429_v3 = vpack.c.bf16 %v4815_v41, %v4815_v41  ;;  %v4816_v37 = vmax.f32 %v4784_v34, 0.0  ;;  %v5554_v54 = vmul.f32 %v11323_v55, %v5407_v6  ;;  %v7151_v9 = vpop.f32.mrb[38].mxu1  ;;  %v7052_v61 = vpop.f32.mrb[40].mxu0 }
 0x51c   : > { %6391 = vst.msk [vmem:[%s11342_s17 + $0x8c] sm:$0xf] %vm5774_vm13, %v6460_v35  ;;  %5781 = vst.msk [vmem:[%s11342_s17 + $0x18] sm:$0xf] %vm5774_vm13, %v6431_v39  ;;  %v6432_v17 = vpack.c.bf16 %v4818_v13, %v4818_v13  ;;  %v5588_v1 = vadd.f32 %v11328_v16, %v5556_v28  ;;  %v5557_v62 = vmul.f32 %v7151_v9, %v11323_v55  ;;  %v5410_v53 = vpop.f32.mrb[39].mxu1  ;;  %v4608_v4 = vpop.f32.mrb[41].mxu0 }
 0x51d   : > { %v4751_v40 = vmul.f32 %v7052_v61, %v11323_v55  ;;  %6389 = vst.msk [vmem:[%s11342_s17 + $0x84] sm:$0xf] %vm5774_vm13, %v6458_v21  ;;  %5779 = vst.msk [vmem:[%s11342_s17 + $0x10] sm:$0xf] %vm5774_vm13, %v6429_v3  ;;  %v6430_v36 = vpack.c.bf16 %v4816_v37, %v4816_v37  ;;  %v5586_v52 = vadd.f32 %v11328_v16, %v5554_v54  ;;  %v7053_v22 = vpop.f32.mrb[42].mxu0 }
 0x51e   : > { %v5555_v33 = vmul.f32 %v11323_v55, %v5410_v53  ;;  %v4749_v45 = vmul.f32 %v11323_v55, %v4608_v4  ;;  %5782 = vst.msk [vmem:[%s11342_s17 + $0x1c] sm:$0xf] %vm5774_vm13, %v6432_v17  ;;  %v5620_v32 = vmax.f32 %v5588_v1, 0.0  ;;  %v5589_v51 = vadd.f32 %v11328_v16, %v5557_v62  ;;  %v4611_v11 = vpop.f32.mrb[43].mxu0 }
 0x51f   : > { %v4789_v58 = vadd.f32 %v11328_v16, %v4751_v40  ;;  %v4752_v44 = vmul.f32 %v7053_v22, %v11323_v55  ;;  %5780 = vst.msk [vmem:[%s11342_s17 + $0x14] sm:$0xf] %vm5774_vm13, %v6430_v36  ;;  %v5618_v24 = vmax.f32 %v5586_v52, 0.0  ;;  %v4750_v12 = vmul.f32 %v11323_v55, %v4611_v11 }
 0x520   : > { %v5587_v43 = vadd.f32 %v11328_v16, %v5555_v33  ;;  %v4787_v18 = vadd.f32 %v11328_v16, %v4749_v45  ;;  %v6463_v15 = vpack.c.bf16 %v5620_v32, %v5620_v32  ;;  %v5621_v10 = vmax.f32 %v5589_v51, 0.0 }
 0x521   : > { %v4821_v0 = vmax.f32 %v4789_v58, 0.0  ;;  %v4790_v26 = vadd.f32 %v11328_v16, %v4752_v44  ;;  %v6461_v56 = vpack.c.bf16 %v5618_v24, %v5618_v24  ;;  %v4788_v29 = vadd.f32 %v11328_v16, %v4750_v12  ;;  %v7154_v49 = vpop.f32.mrb[40].mxu1 }
 0x522   : > { %v5619_v19 = vmax.f32 %v5587_v43, 0.0  ;;  %v4819_v57 = vmax.f32 %v4787_v18, 0.0  ;;  %6394 = vst.msk [vmem:[%s11342_s17 + $0x98] sm:$0xf] %vm5774_vm13, %v6463_v15  ;;  %v6464_v60 = vpack.c.bf16 %v5621_v10, %v5621_v10  ;;  %v5560_v63 = vmul.f32 %v7154_v49, %v11323_v55  ;;  %v5423_v50 = vpop.f32.mrb[41].mxu1 }
 0x523   : > { %v6435_v20 = vpack.c.bf16 %v4821_v0, %v4821_v0  ;;  %v4822_v7 = vmax.f32 %v4790_v26, 0.0  ;;  %6392 = vst.msk [vmem:[%s11342_s17 + $0x90] sm:$0xf] %vm5774_vm13, %v6461_v56  ;;  %v4820_v30 = vmax.f32 %v4788_v29, 0.0  ;;  %v5558_v48 = vmul.f32 %v11323_v55, %v5423_v50  ;;  %v7155_v46 = vpop.f32.mrb[42].mxu1  ;;  %v7056_v25 = vpop.f32.mrb[44].mxu0 }
 0x524   : > { %v6462_v31 = vpack.c.bf16 %v5619_v19, %v5619_v19  ;;  %v6433_v2 = vpack.c.bf16 %v4819_v57, %v4819_v57  ;;  %6395 = vst.msk [vmem:[%s11342_s17 + $0x9c] sm:$0xf] %vm5774_vm13, %v6464_v60  ;;  %v5592_v8 = vadd.f32 %v11328_v16, %v5560_v63  ;;  %v5561_v38 = vmul.f32 %v7155_v46, %v11323_v55  ;;  %v5426_v42 = vpop.f32.mrb[43].mxu1  ;;  %v4624_v47 = vpop.f32.mrb[45].mxu0 }
 0x525   : > { %5785 = vst.msk [vmem:[%s11342_s17 + $0x28] sm:$0xf] %vm5774_vm13, %v6435_v20  ;;  %v6436_v59 = vpack.c.bf16 %v4822_v7, %v4822_v7  ;;  %v4755_v27 = vmul.f32 %v7056_v25, %v11323_v55  ;;  %v6434_v14 = vpack.c.bf16 %v4820_v30, %v4820_v30  ;;  %v5590_v5 = vadd.f32 %v11328_v16, %v5558_v48  ;;  %v7057_v23 = vpop.f32.mrb[46].mxu0 }
 0x526   : > { %6393 = vst.msk [vmem:[%s11342_s17 + $0x94] sm:$0xf] %vm5774_vm13, %v6462_v31  ;;  %5783 = vst.msk [vmem:[%s11342_s17 + $0x20] sm:$0xf] %vm5774_vm13, %v6433_v2  ;;  %v5559_v41 = vmul.f32 %v11323_v55, %v5426_v42  ;;  %v4753_v34 = vmul.f32 %v11323_v55, %v4624_v47  ;;  %v5624_v35 = vmax.f32 %v5592_v8, 0.0  ;;  %v5593_v39 = vadd.f32 %v11328_v16, %v5561_v38  ;;  %v4627_v6 = vpop.f32.mrb[47].mxu0 }
 0x527   : > { %5786 = vst.msk [vmem:[%s11342_s17 + $0x2c] sm:$0xf] %vm5774_vm13, %v6436_v59  ;;  %v4793_v13 = vadd.f32 %v11328_v16, %v4755_v27  ;;  %v4756_v28 = vmul.f32 %v7057_v23, %v11323_v55  ;;  %5784 = vst.msk [vmem:[%s11342_s17 + $0x24] sm:$0xf] %vm5774_vm13, %v6434_v14  ;;  %v5622_v21 = vmax.f32 %v5590_v5, 0.0  ;;  %v4754_v54 = vmul.f32 %v11323_v55, %v4627_v6 }
 0x528   : > { %v5591_v3 = vadd.f32 %v11328_v16, %v5559_v41  ;;  %v4791_v37 = vadd.f32 %v11328_v16, %v4753_v34  ;;  %v6467_v9 = vpack.c.bf16 %v5624_v35, %v5624_v35  ;;  %v5625_v61 = vmax.f32 %v5593_v39, 0.0 }
 0x529   : > { %v4825_v17 = vmax.f32 %v4793_v13, 0.0  ;;  %v4794_v1 = vadd.f32 %v11328_v16, %v4756_v28  ;;  %v6465_v62 = vpack.c.bf16 %v5622_v21, %v5622_v21  ;;  %v4792_v4 = vadd.f32 %v11328_v16, %v4754_v54  ;;  %v7158_v36 = vpop.f32.mrb[44].mxu1 }
 0x52a   : > { %v5623_v40 = vmax.f32 %v5591_v3, 0.0  ;;  %v4823_v53 = vmax.f32 %v4791_v37, 0.0  ;;  %6398 = vst.msk [vmem:[%s11342_s17 + $0xa8] sm:$0xf] %vm5774_vm13, %v6467_v9  ;;  %v6468_v52 = vpack.c.bf16 %v5625_v61, %v5625_v61  ;;  %v5564_v22 = vmul.f32 %v7158_v36, %v11323_v55  ;;  %v5439_v32 = vpop.f32.mrb[45].mxu1 }
 0x52b   : > { %v6439_v33 = vpack.c.bf16 %v4825_v17, %v4825_v17  ;;  %v4826_v45 = vmax.f32 %v4794_v1, 0.0  ;;  %6396 = vst.msk [vmem:[%s11342_s17 + $0xa0] sm:$0xf] %vm5774_vm13, %v6465_v62  ;;  %v4824_v44 = vmax.f32 %v4792_v4, 0.0  ;;  %v5562_v11 = vmul.f32 %v11323_v55, %v5439_v32  ;;  %v7159_v24 = vpop.f32.mrb[46].mxu1  ;;  %v7060_v43 = vpop.f32.mrb[48].mxu0 }
 0x52c   : > { %v6466_v51 = vpack.c.bf16 %v5623_v40, %v5623_v40  ;;  %v6437_v58 = vpack.c.bf16 %v4823_v53, %v4823_v53  ;;  %6399 = vst.msk [vmem:[%s11342_s17 + $0xac] sm:$0xf] %vm5774_vm13, %v6468_v52  ;;  %v5596_v12 = vadd.f32 %v11328_v16, %v5564_v22  ;;  %v5565_v15 = vmul.f32 %v7159_v24, %v11323_v55  ;;  %v5442_v0 = vpop.f32.mrb[47].mxu1  ;;  %v4640_v26 = vpop.f32.mrb[49].mxu0 }
 0x52d   : > { %5789 = vst.msk [vmem:[%s11342_s17 + $0x38] sm:$0xf] %vm5774_vm13, %v6439_v33  ;;  %v6440_v18 = vpack.c.bf16 %v4826_v45, %v4826_v45  ;;  %v4759_v10 = vmul.f32 %v7060_v43, %v11323_v55  ;;  %v6438_v56 = vpack.c.bf16 %v4824_v44, %v4824_v44  ;;  %v5594_v19 = vadd.f32 %v11328_v16, %v5562_v11  ;;  %v7061_v49 = vpop.f32.mrb[50].mxu0 }
 0x52e   : > { %6397 = vst.msk [vmem:[%s11342_s17 + $0xa4] sm:$0xf] %vm5774_vm13, %v6466_v51  ;;  %5787 = vst.msk [vmem:[%s11342_s17 + $0x30] sm:$0xf] %vm5774_vm13, %v6437_v58  ;;  %v5563_v57 = vmul.f32 %v11323_v55, %v5442_v0  ;;  %v4757_v29 = vmul.f32 %v11323_v55, %v4640_v26  ;;  %v5628_v60 = vmax.f32 %v5596_v12, 0.0  ;;  %v5597_v20 = vadd.f32 %v11328_v16, %v5565_v15  ;;  %v4643_v50 = vpop.f32.mrb[51].mxu0 }
 0x52f   : > { %5790 = vst.msk [vmem:[%s11342_s17 + $0x3c] sm:$0xf] %vm5774_vm13, %v6440_v18  ;;  %v4797_v7 = vadd.f32 %v11328_v16, %v4759_v10  ;;  %v4760_v63 = vmul.f32 %v7061_v49, %v11323_v55  ;;  %5788 = vst.msk [vmem:[%s11342_s17 + $0x34] sm:$0xf] %vm5774_vm13, %v6438_v56  ;;  %v5626_v31 = vmax.f32 %v5594_v19, 0.0  ;;  %v4758_v48 = vmul.f32 %v11323_v55, %v4643_v50 }
 0x530   : > { %v5595_v2 = vadd.f32 %v11328_v16, %v5563_v57  ;;  %v4795_v30 = vadd.f32 %v11328_v16, %v4757_v29  ;;  %v6471_v46 = vpack.c.bf16 %v5628_v60, %v5628_v60  ;;  %v5629_v25 = vmax.f32 %v5597_v20, 0.0 }
 0x531   : > { %v4829_v59 = vmax.f32 %v4797_v7, 0.0  ;;  %v4798_v8 = vadd.f32 %v11328_v16, %v4760_v63  ;;  %v6469_v38 = vpack.c.bf16 %v5626_v31, %v5626_v31  ;;  %v4796_v47 = vadd.f32 %v11328_v16, %v4758_v48  ;;  %v7162_v14 = vpop.f32.mrb[48].mxu1 }
 0x532   : > { %v5627_v27 = vmax.f32 %v5595_v2, 0.0  ;;  %v4827_v42 = vmax.f32 %v4795_v30, 0.0  ;;  %6402 = vst.msk [vmem:[%s11342_s17 + $0xb8] sm:$0xf] %vm5774_vm13, %v6471_v46  ;;  %v6472_v5 = vpack.c.bf16 %v5629_v25, %v5629_v25  ;;  %v5568_v23 = vmul.f32 %v7162_v14, %v11323_v55  ;;  %v5455_v35 = vpop.f32.mrb[49].mxu1 }
 0x533   : > { %v6443_v41 = vpack.c.bf16 %v4829_v59, %v4829_v59  ;;  %v4830_v34 = vmax.f32 %v4798_v8, 0.0  ;;  %6400 = vst.msk [vmem:[%s11342_s17 + $0xb0] sm:$0xf] %vm5774_vm13, %v6469_v38  ;;  %v4828_v28 = vmax.f32 %v4796_v47, 0.0  ;;  %v5566_v6 = vmul.f32 %v11323_v55, %v5455_v35  ;;  %v7163_v21 = vpop.f32.mrb[50].mxu1  ;;  %v7064_v3 = vpop.f32.mrb[52].mxu0 }
 0x534   : > { %v6470_v39 = vpack.c.bf16 %v5627_v27, %v5627_v27  ;;  %v6441_v13 = vpack.c.bf16 %v4827_v42, %v4827_v42  ;;  %6403 = vst.msk [vmem:[%s11342_s17 + $0xbc] sm:$0xf] %vm5774_vm13, %v6472_v5  ;;  %v5600_v54 = vadd.f32 %v11328_v16, %v5568_v23  ;;  %v5569_v9 = vmul.f32 %v7163_v21, %v11323_v55  ;;  %v5458_v17 = vpop.f32.mrb[51].mxu1  ;;  %v4656_v1 = vpop.f32.mrb[53].mxu0 }
 0x535   : > { %5793 = vst.msk [vmem:[%s11342_s17 + $0x48] sm:$0xf] %vm5774_vm13, %v6443_v41  ;;  %v6444_v37 = vpack.c.bf16 %v4830_v34, %v4830_v34  ;;  %v4763_v61 = vmul.f32 %v7064_v3, %v11323_v55  ;;  %v6442_v62 = vpack.c.bf16 %v4828_v28, %v4828_v28  ;;  %v5598_v40 = vadd.f32 %v11328_v16, %v5566_v6  ;;  %v7065_v36 = vpop.f32.mrb[54].mxu0 }
 0x536   : > { %6401 = vst.msk [vmem:[%s11342_s17 + $0xb4] sm:$0xf] %vm5774_vm13, %v6470_v39  ;;  %5791 = vst.msk [vmem:[%s11342_s17 + $0x40] sm:$0xf] %vm5774_vm13, %v6441_v13  ;;  %v5567_v53 = vmul.f32 %v11323_v55, %v5458_v17  ;;  %v4761_v4 = vmul.f32 %v11323_v55, %v4656_v1  ;;  %v5632_v52 = vmax.f32 %v5600_v54, 0.0  ;;  %v5601_v33 = vadd.f32 %v11328_v16, %v5569_v9  ;;  %v4659_v32 = vpop.f32.mrb[55].mxu0 }
 0x537   : > { %5794 = vst.msk [vmem:[%s11342_s17 + $0x4c] sm:$0xf] %vm5774_vm13, %v6444_v37  ;;  %v4801_v45 = vadd.f32 %v11328_v16, %v4763_v61  ;;  %v4764_v22 = vmul.f32 %v7065_v36, %v11323_v55  ;;  %5792 = vst.msk [vmem:[%s11342_s17 + $0x44] sm:$0xf] %vm5774_vm13, %v6442_v62  ;;  %v5630_v51 = vmax.f32 %v5598_v40, 0.0  ;;  %v4762_v11 = vmul.f32 %v11323_v55, %v4659_v32 }
 0x538   : > { %v5599_v58 = vadd.f32 %v11328_v16, %v5567_v53  ;;  %v4799_v44 = vadd.f32 %v11328_v16, %v4761_v4  ;;  %v6475_v24 = vpack.c.bf16 %v5632_v52, %v5632_v52  ;;  %v5633_v43 = vmax.f32 %v5601_v33, 0.0 }
 0x539   : > { %v4833_v18 = vmax.f32 %v4801_v45, 0.0  ;;  %v4802_v12 = vadd.f32 %v11328_v16, %v4764_v22  ;;  %v6473_v15 = vpack.c.bf16 %v5630_v51, %v5630_v51  ;;  %v4800_v26 = vadd.f32 %v11328_v16, %v4762_v11  ;;  %v7166_v56 = vpop.f32.mrb[52].mxu1 }
 0x53a   : > { %v5631_v10 = vmax.f32 %v5599_v58, 0.0  ;;  %v4831_v0 = vmax.f32 %v4799_v44, 0.0  ;;  %6406 = vst.msk [vmem:[%s11342_s17 + $0xc8] sm:$0xf] %vm5774_vm13, %v6475_v24  ;;  %v6476_v19 = vpack.c.bf16 %v5633_v43, %v5633_v43  ;;  %v5572_v49 = vmul.f32 %v7166_v56, %v11323_v55  ;;  %v5471_v60 = vpop.f32.mrb[53].mxu1 }
 0x53b   : > { %v6447_v57 = vpack.c.bf16 %v4833_v18, %v4833_v18  ;;  %v4834_v29 = vmax.f32 %v4802_v12, 0.0  ;;  %6404 = vst.msk [vmem:[%s11342_s17 + $0xc0] sm:$0xf] %vm5774_vm13, %v6473_v15  ;;  %v4832_v63 = vmax.f32 %v4800_v26, 0.0  ;;  %v5570_v50 = vmul.f32 %v11323_v55, %v5471_v60  ;;  %v7167_v31 = vpop.f32.mrb[54].mxu1  ;;  %v7068_v2 = vpop.f32.mrb[56].mxu0 }
 0x53c   : > { %v6474_v20 = vpack.c.bf16 %v5631_v10, %v5631_v10  ;;  %v6445_v7 = vpack.c.bf16 %v4831_v0, %v4831_v0  ;;  %6407 = vst.msk [vmem:[%s11342_s17 + $0xcc] sm:$0xf] %vm5774_vm13, %v6476_v19  ;;  %v5604_v48 = vadd.f32 %v11328_v16, %v5572_v49  ;;  %v5573_v46 = vmul.f32 %v7167_v31, %v11323_v55  ;;  %v5474_v59 = vpop.f32.mrb[55].mxu1  ;;  %v4672_v8 = vpop.f32.mrb[57].mxu0 }
 0x53d   : > { %5797 = vst.msk [vmem:[%s11342_s17 + $0x58] sm:$0xf] %vm5774_vm13, %v6447_v57  ;;  %v6448_v30 = vpack.c.bf16 %v4834_v29, %v4834_v29  ;;  %v4767_v25 = vmul.f32 %v7068_v2, %v11323_v55  ;;  %v6446_v38 = vpack.c.bf16 %v4832_v63, %v4832_v63  ;;  %v5602_v27 = vadd.f32 %v11328_v16, %v5570_v50  ;;  %v7069_v14 = vpop.f32.mrb[58].mxu0 }
 0x53e   : > { %6405 = vst.msk [vmem:[%s11342_s17 + $0xc4] sm:$0xf] %vm5774_vm13, %v6474_v20  ;;  %5795 = vst.msk [vmem:[%s11342_s17 + $0x50] sm:$0xf] %vm5774_vm13, %v6445_v7  ;;  %v5571_v42 = vmul.f32 %v11323_v55, %v5474_v59  ;;  %v4765_v47 = vmul.f32 %v11323_v55, %v4672_v8  ;;  %v5636_v5 = vmax.f32 %v5604_v48, 0.0  ;;  %v5605_v41 = vadd.f32 %v11328_v16, %v5573_v46  ;;  %v4675_v35 = vpop.f32.mrb[59].mxu0 }
 0x53f   : > { %5798 = vst.msk [vmem:[%s11342_s17 + $0x5c] sm:$0xf] %vm5774_vm13, %v6448_v30  ;;  %v4805_v34 = vadd.f32 %v11328_v16, %v4767_v25  ;;  %v4768_v23 = vmul.f32 %v7069_v14, %v11323_v55  ;;  %5796 = vst.msk [vmem:[%s11342_s17 + $0x54] sm:$0xf] %vm5774_vm13, %v6446_v38  ;;  %v5634_v39 = vmax.f32 %v5602_v27, 0.0  ;;  %v4766_v6 = vmul.f32 %v11323_v55, %v4675_v35 }
 0x540   : > { %v5603_v13 = vadd.f32 %v11328_v16, %v5571_v42  ;;  %v4803_v28 = vadd.f32 %v11328_v16, %v4765_v47  ;;  %v6479_v21 = vpack.c.bf16 %v5636_v5, %v5636_v5  ;;  %v5637_v3 = vmax.f32 %v5605_v41, 0.0 }
 0x541   : > { %v4837_v37 = vmax.f32 %v4805_v34, 0.0  ;;  %v4806_v54 = vadd.f32 %v11328_v16, %v4768_v23  ;;  %v6477_v9 = vpack.c.bf16 %v5634_v39, %v5634_v39  ;;  %v4804_v1 = vadd.f32 %v11328_v16, %v4766_v6  ;;  %v7170_v62 = vpop.f32.mrb[56].mxu1 }
 0x542   : > { %v5635_v61 = vmax.f32 %v5603_v13, 0.0  ;;  %v4835_v17 = vmax.f32 %v4803_v28, 0.0  ;;  %6410 = vst.msk [vmem:[%s11342_s17 + $0xd8] sm:$0xf] %vm5774_vm13, %v6479_v21  ;;  %v6480_v40 = vpack.c.bf16 %v5637_v3, %v5637_v3  ;;  %v5576_v36 = vmul.f32 %v7170_v62, %v11323_v55  ;;  %v5487_v52 = vpop.f32.mrb[57].mxu1 }
 0x543   : > { %v6451_v53 = vpack.c.bf16 %v4837_v37, %v4837_v37  ;;  %v4838_v4 = vmax.f32 %v4806_v54, 0.0  ;;  %6408 = vst.msk [vmem:[%s11342_s17 + $0xd0] sm:$0xf] %vm5774_vm13, %v6477_v9  ;;  %v4836_v22 = vmax.f32 %v4804_v1, 0.0  ;;  %v5574_v32 = vmul.f32 %v11323_v55, %v5487_v52  ;;  %v7171_v51 = vpop.f32.mrb[58].mxu1  ;;  %v7072_v58 = vpop.f32.mrb[60].mxu0 }
 0x544   : > { %v6478_v33 = vpack.c.bf16 %v5635_v61, %v5635_v61  ;;  %v6449_v45 = vpack.c.bf16 %v4835_v17, %v4835_v17  ;;  %6411 = vst.msk [vmem:[%s11342_s17 + $0xdc] sm:$0xf] %vm5774_vm13, %v6480_v40  ;;  %v5608_v11 = vadd.f32 %v11328_v16, %v5576_v36  ;;  %v5577_v24 = vmul.f32 %v7171_v51, %v11323_v55  ;;  %v5490_v18 = vpop.f32.mrb[59].mxu1  ;;  %v4688_v12 = vpop.f32.mrb[61].mxu0 }
 0x545   : > { %5801 = vst.msk [vmem:[%s11342_s17 + $0x68] sm:$0xf] %vm5774_vm13, %v6451_v53  ;;  %v6452_v44 = vpack.c.bf16 %v4838_v4, %v4838_v4  ;;  %v4771_v43 = vmul.f32 %v7072_v58, %v11323_v55  ;;  %v6450_v15 = vpack.c.bf16 %v4836_v22, %v4836_v22  ;;  %v5606_v10 = vadd.f32 %v11328_v16, %v5574_v32  ;;  %v7073_v56 = vpop.f32.mrb[62].mxu0 }
 0x546   : > { %6409 = vst.msk [vmem:[%s11342_s17 + $0xd4] sm:$0xf] %vm5774_vm13, %v6478_v33  ;;  %5799 = vst.msk [vmem:[%s11342_s17 + $0x60] sm:$0xf] %vm5774_vm13, %v6449_v45  ;;  %v5575_v0 = vmul.f32 %v11323_v55, %v5490_v18  ;;  %v4769_v26 = vmul.f32 %v11323_v55, %v4688_v12  ;;  %v5640_v19 = vmax.f32 %v5608_v11, 0.0  ;;  %v5609_v57 = vadd.f32 %v11328_v16, %v5577_v24  ;;  %v4691_v60 = vpop.f32.mrb[63].mxu0 }
 0x547   : > { %5802 = vst.msk [vmem:[%s11342_s17 + $0x6c] sm:$0xf] %vm5774_vm13, %v6452_v44  ;;  %v4809_v29 = vadd.f32 %v11328_v16, %v4771_v43  ;;  %v4772_v49 = vmul.f32 %v7073_v56, %v11323_v55  ;;  %5800 = vst.msk [vmem:[%s11342_s17 + $0x64] sm:$0xf] %vm5774_vm13, %v6450_v15  ;;  %v5638_v20 = vmax.f32 %v5606_v10, 0.0  ;;  %v4770_v50 = vmul.f32 %v11323_v55, %v4691_v60 }
 0x548   : > { %v5607_v7 = vadd.f32 %v11328_v16, %v5575_v0  ;;  %v4807_v63 = vadd.f32 %v11328_v16, %v4769_v26  ;;  %v6483_v31 = vpack.c.bf16 %v5640_v19, %v5640_v19  ;;  %v5641_v2 = vmax.f32 %v5609_v57, 0.0 }
 0x549   : > { %v4841_v30 = vmax.f32 %v4809_v29, 0.0  ;;  %v4810_v48 = vadd.f32 %v11328_v16, %v4772_v49  ;;  %v6481_v46 = vpack.c.bf16 %v5638_v20, %v5638_v20  ;;  %v4808_v8 = vadd.f32 %v11328_v16, %v4770_v50  ;;  %v7174_v38 = vpop.f32.mrb[60].mxu1 }
 0x54a   : > { %v5639_v25 = vmax.f32 %v5607_v7, 0.0  ;;  %v4839_v59 = vmax.f32 %v4807_v63, 0.0  ;;  %6414 = vst.msk [vmem:[%s11342_s17 + $0xe8] sm:$0xf] %vm5774_vm13, %v6483_v31  ;;  %v6484_v27 = vpack.c.bf16 %v5641_v2, %v5641_v2  ;;  %v5580_v14 = vmul.f32 %v7174_v38, %v11323_v55  ;;  %v5503_v5 = vpop.f32.mrb[61].mxu1 }
 0x54b   : > { %v6455_v42 = vpack.c.bf16 %v4841_v30, %v4841_v30  ;;  %v4842_v47 = vmax.f32 %v4810_v48, 0.0  ;;  %6412 = vst.msk [vmem:[%s11342_s17 + $0xe0] sm:$0xf] %vm5774_vm13, %v6481_v46  ;;  %v4840_v23 = vmax.f32 %v4808_v8, 0.0  ;;  %v5578_v35 = vmul.f32 %v11323_v55, %v5503_v5  ;;  %v7175_v39 = vpop.f32.mrb[62].mxu1 }
 0x54c   : > { %v6482_v41 = vpack.c.bf16 %v5639_v25, %v5639_v25  ;;  %v6453_v34 = vpack.c.bf16 %v4839_v59, %v4839_v59  ;;  %6415 = vst.msk [vmem:[%s11342_s17 + $0xec] sm:$0xf] %vm5774_vm13, %v6484_v27  ;;  %v5612_v28 = vadd.f32 %v11328_v16, %v5580_v14  ;;  %v5581_v6 = vmul.f32 %v7175_v39, %v11323_v55  ;;  %v5506_v21 = vpop.f32.mrb[63].mxu1 }
 0x54d   : > { %5805 = vst.msk [vmem:[%s11342_s17 + $0x78] sm:$0xf] %vm5774_vm13, %v6455_v42  ;;  %v6456_v13 = vpack.c.bf16 %v4842_v47, %v4842_v47  ;;  %v6454_v3 = vpack.c.bf16 %v4840_v23, %v4840_v23  ;;  %v5610_v37 = vadd.f32 %v11328_v16, %v5578_v35  ;;  %v5579_v54 = vmul.f32 %v11323_v55, %v5506_v21 }
 0x54e   : > { %6413 = vst.msk [vmem:[%s11342_s17 + $0xe4] sm:$0xf] %vm5774_vm13, %v6482_v41  ;;  %5803 = vst.msk [vmem:[%s11342_s17 + $0x70] sm:$0xf] %vm5774_vm13, %v6453_v34  ;;  %v5644_v9 = vmax.f32 %v5612_v28, 0.0  ;;  %v5613_v61 = vadd.f32 %v11328_v16, %v5581_v6 }
 0x54f   : > { %5806 = vst.msk [vmem:[%s11342_s17 + $0x7c] sm:$0xf] %vm5774_vm13, %v6456_v13  ;;  %5804 = vst.msk [vmem:[%s11342_s17 + $0x74] sm:$0xf] %vm5774_vm13, %v6454_v3  ;;  %v5642_v17 = vmax.f32 %v5610_v37, 0.0  ;;  %v5611_v1 = vadd.f32 %v11328_v16, %v5579_v54 }
 0x550   : > { %v6487_v62 = vpack.c.bf16 %v5644_v9, %v5644_v9  ;;  %v5645_v40 = vmax.f32 %v5613_v61, 0.0 }
 0x551   : > { %v6485_v53 = vpack.c.bf16 %v5642_v17, %v5642_v17  ;;  %v5643_v4 = vmax.f32 %v5611_v1, 0.0 }
 0x552   : > { %6418 = vst.msk [vmem:[%s11342_s17 + $0xf8] sm:$0xf] %vm5774_vm13, %v6487_v62  ;;  %v6488_v36 = vpack.c.bf16 %v5645_v40, %v5645_v40 }
 0x553   : > { %6416 = vst.msk [vmem:[%s11342_s17 + $0xf0] sm:$0xf] %vm5774_vm13, %v6485_v53  ;;  %v6486_v55 = vpack.c.bf16 %v5643_v4, %v5643_v4 }
 0x554   : > { %6419 = vst.msk [vmem:[%s11342_s17 + $0xfc] sm:$0xf] %vm5774_vm13, %v6488_v36 }
 0x555   : > { %6417 = vst.msk [vmem:[%s11342_s17 + $0xf4] sm:$0xf] %vm5774_vm13, %v6486_v55 }
 0x556 PF: > { %s18_s27 = sadd.s32 1, %s7541_s27  }
 0x557   : > { %p15_p4 = scmp.ge.s32.totalorder %s18_s27, 4  }
 0x559   :  { %17 = sbr.rel (!%p15_p4) target bundleno = 1 (0x1), region = 91 }

</bundles_post_ra>
